<compile_context>
chip_gen: v7x
topology: tpu7x:2x2x1
jax: 0.10.0
libtpu: 0.0.40
codegen_flags: <defaults>
</compile_context>

<pallas_src>
import functools

import jax
import jax.numpy as jnp
from jax.experimental import pallas as pl
from jax.experimental.pallas import tpu as pltpu


_ACT_DTYPE = jnp.bfloat16          # activation storage dtype (f32 accumulation inside)
_BN_EPS = 1e-5
_VMEM_LIMIT = 32 * 1024 * 1024     # explicit scoped-VMEM budget (fits v7x's 64 MiB)


def _largest_divisor_leq(n, cap):
    for d in range(min(n, cap), 0, -1):
        if n % d == 0:
            return d
    return 1


def _compiler_params(n_axes):
    return pltpu.CompilerParams(
        dimension_semantics=("parallel",) * n_axes,
        vmem_limit_bytes=_VMEM_LIMIT,
    )


# --------------------------------------------------------------------------
# Kernel 1: ConvTranspose2d(kernel=2, stride=2) -> lane-dense, relayout-free
# --------------------------------------------------------------------------

def _upconv_kernel(x_ref, w_ref, b_ref, o_ref):
    # x_ref: (1, th, W, Cin) bf16      w_ref: (1, Cin, 2*Cout) bf16 (cols = (dj, co))
    # b_ref: (1, 2*Cout) f32           o_ref: (1, th, 1, W, 2*Cout) bf16
    th, w, cin = x_ref.shape[1], x_ref.shape[2], x_ref.shape[3]
    c2 = o_ref.shape[4]
    x2 = x_ref[0].reshape(th * w, cin)
    y = jnp.dot(x2, w_ref[0], preferred_element_type=jnp.float32) + b_ref[...]
    # (th*W, 2*Cout) -> (th, W, 2*Cout): splits sublanes only, lanes untouched.
    o_ref[0, :, 0] = y.reshape(th, w, c2).astype(o_ref.dtype)


def upconv2x2(x_nhwc, w_t, b):
    """ConvTranspose2d(Cin, Cout, kernel=2, stride=2). x_nhwc: (N, H, W, Cin)."""
    N, H, W, Cin = x_nhwc.shape
    Cout = w_t.shape[1]
    th = _largest_divisor_leq(H, 8)

    # wmat[di, cin, dj*Cout + co] = w_t[cin, co, di, dj]
    wmat = jnp.transpose(w_t, (2, 0, 3, 1)).reshape(2, Cin, 2 * Cout).astype(_ACT_DTYPE)
    b2 = jnp.tile(b.astype(jnp.float32), 2).reshape(1, 2 * Cout)

    flops = 2 * N * H * W * Cin * 4 * Cout
    bytes_acc = 2 * (N * H * W * Cin + 2 * Cin * 2 * Cout + 4 * N * H * W * Cout)

    out6 = pl.pallas_call(
        _upconv_kernel,
        out_shape=jax.ShapeDtypeStruct((N, H, 2, W, 2 * Cout), _ACT_DTYPE),
        grid=(N, H // th, 2),
        in_specs=[
            pl.BlockSpec((1, th, W, Cin), lambda n, t, di: (n, t, 0, 0)),
            pl.BlockSpec((1, Cin, 2 * Cout), lambda n, t, di: (di, 0, 0)),
            pl.BlockSpec((1, 2 * Cout), lambda n, t, di: (0, 0)),
        ],
        out_specs=pl.BlockSpec((1, th, 1, W, 2 * Cout),
                               lambda n, t, di: (n, t, di, 0, 0)),
        compiler_params=_compiler_params(3),
        cost_estimate=pl.CostEstimate(flops=flops, transcendentals=0,
                                      bytes_accessed=bytes_acc),
    )(x_nhwc.astype(_ACT_DTYPE), wmat, b2)

    # (N, H, 2, W, 2*Cout) has exactly the row-major layout of (N, 2H, 2W, Cout):
    # pure metadata reshape, no relayout.
    return out6.reshape(N, 2 * H, 2 * W, Cout)


# --------------------------------------------------------------------------
# Kernel 2: fused 3x3 conv (im2col-free, multi-input) + per-channel partial stats
# --------------------------------------------------------------------------

def _conv3x3_stats_kernel(*refs, n_inputs):
    rows = refs[:3 * n_inputs]                   # 3 padded input rows per input
    wts = refs[3 * n_inputs:4 * n_inputs]        # (3, 3, Cin_i, tco) per input
    y_ref, st_ref = refs[4 * n_inputs], refs[4 * n_inputs + 1]
    w_out = y_ref.shape[2]
    tco = y_ref.shape[3]

    acc = jnp.zeros((w_out, tco), jnp.float32)
    for i in range(n_inputs):
        w_i = wts[i]
        for kh in range(3):
            row = rows[3 * i + kh][0, 0]         # (W+2, Cin_i) bf16
            for kw in range(3):
                acc = acc + jnp.dot(row[kw:kw + w_out, :], w_i[kh, kw],
                                    preferred_element_type=jnp.float32)

    y_ref[0, 0] = acc.astype(y_ref.dtype)
    st_ref[0, 0, 0:1, :] = jnp.sum(acc, axis=0, keepdims=True)
    st_ref[0, 0, 1:2, :] = jnp.sum(acc * acc, axis=0, keepdims=True)


def _bn_relu_kernel(y_ref, st_ref, g_ref, b_ref, o_ref, *, inv_count, eps):
    # All BN math in f32 (v5e has no bf16 VPU/EUP path).
    mean = st_ref[0:1, :] * inv_count
    var = st_ref[1:2, :] * inv_count - mean * mean
    scale = g_ref[...] * jax.lax.rsqrt(var + eps)
    shift = b_ref[...] - mean * scale
    y = y_ref[0].astype(jnp.float32)
    o_ref[0] = jnp.maximum(y * scale + shift, 0.0).astype(o_ref.dtype)


def _bn_relu_apply(y, stats, gamma, beta, *, out_dtype=_ACT_DTYPE):
    N, H, W, C = y.shape
    tb = _largest_divisor_leq(H, 8)
    inv_count = 1.0 / float(N * H * W)
    return pl.pallas_call(
        functools.partial(_bn_relu_kernel, inv_count=inv_count, eps=_BN_EPS),
        out_shape=jax.ShapeDtypeStruct((N, H, W, C), out_dtype),
        grid=(N, H // tb),
        in_specs=[
            pl.BlockSpec((1, tb, W, C), lambda n, t: (n, t, 0, 0)),
            pl.BlockSpec((2, C), lambda n, t: (0, 0)),
            pl.BlockSpec((1, C), lambda n, t: (0, 0)),
            pl.BlockSpec((1, C), lambda n, t: (0, 0)),
        ],
        out_specs=pl.BlockSpec((1, tb, W, C), lambda n, t: (n, t, 0, 0)),
        compiler_params=_compiler_params(2),
    )(y, stats.astype(jnp.float32),
      gamma.reshape(1, C).astype(jnp.float32),
      beta.reshape(1, C).astype(jnp.float32))


def conv3x3_bn_relu(inputs, weights, gamma, beta, *, out_dtype=_ACT_DTYPE):
    """3x3 conv (pad=1, NO bias: it cancels exactly under training-mode BN) over the
    channel-concat of `inputs`, then BatchNorm(train) + ReLU.  `weights[i]` is the
    OIHW slab acting on inputs[i]'s channels."""
    n_inputs = len(inputs)
    N, H, W, _ = inputs[0].shape
    Cout = weights[0].shape[0]
    tco = _largest_divisor_leq(Cout, 256)
    n_co = Cout // tco

    # cheap spatial halo padding (channels-last, lane dim untouched) + bf16 cast
    padded = [jnp.pad(x.astype(_ACT_DTYPE), ((0, 0), (1, 1), (1, 1), (0, 0)))
              for x in inputs]
    # OIHW -> (kh, kw, Cin_i, Cout)
    wmats = [jnp.transpose(w, (2, 3, 1, 0)).astype(_ACT_DTYPE) for w in weights]

    args, in_specs = [], []
    for i in range(n_inputs):
        cin_i = padded[i].shape[-1]
        for kh in range(3):
            args.append(padded[i])
            in_specs.append(pl.BlockSpec(
                (1, 1, W + 2, cin_i),
                lambda co, n, h, kh=kh: (n, h + kh, 0, 0)))
    for i in range(n_inputs):
        args.append(wmats[i])
        in_specs.append(pl.BlockSpec(
            (3, 3, wmats[i].shape[2], tco),
            lambda co, n, h: (0, 0, 0, co)))

    cin_tot = sum(w.shape[1] for w in weights)
    flops = 2 * N * H * W * 9 * cin_tot * Cout
    bytes_acc = 2 * (3 * N * H * (W + 2) * cin_tot + 9 * cin_tot * Cout
                     + N * H * W * Cout) + 4 * N * H * 2 * Cout

    y, partial = pl.pallas_call(
        functools.partial(_conv3x3_stats_kernel, n_inputs=n_inputs),
        out_shape=(jax.ShapeDtypeStruct((N, H, W, Cout), _ACT_DTYPE),
                   jax.ShapeDtypeStruct((N, H, 2, Cout), jnp.float32)),
        grid=(n_co, N, H),
        in_specs=in_specs,
        out_specs=(pl.BlockSpec((1, 1, W, tco), lambda co, n, h: (n, h, 0, co)),
                   pl.BlockSpec((1, 1, 2, tco), lambda co, n, h: (n, h, 0, co))),
        compiler_params=_compiler_params(3),
        cost_estimate=pl.CostEstimate(flops=flops, transcendentals=0,
                                      bytes_accessed=bytes_acc),
    )(*args)

    stats = jnp.sum(partial, axis=(0, 1))        # (2, Cout): [sum, sum of squares]
    return _bn_relu_apply(y, stats, gamma, beta, out_dtype=out_dtype)


# ------------------------------- DecoderBlock -------------------------------

def decoder_block_forward(params, x, skip_x):
    """x: (N, C_in, H, W) NCHW; skip_x: (N, C_skip, Hs, Ws) NCHW; returns NCHW."""
    N, C_in, H, W = x.shape
    C_out = params["upconv_b"].shape[0]

    x_nhwc = jnp.transpose(x, (0, 2, 3, 1))
    up = upconv2x2(x_nhwc, params["upconv_w"], params["upconv_b"])  # (N,2H,2W,Cout)
    H2, W2 = 2 * H, 2 * W

    # crop skip exactly like the PyTorch code (uses size(3) for BOTH spatial dims)
    diff = skip_x.shape[3] - W2
    lo = diff // 2
    skip_nhwc = jnp.transpose(skip_x, (0, 2, 3, 1))
    skip_c = skip_nhwc[:, lo:W2 + lo, lo:W2 + lo, :]

    # conv1 over concat([up, skip]) without materializing the concat: two
    # accumulating weight slabs over the two channel groups.
    w1 = params["conv1_w"]
    h1 = conv3x3_bn_relu([up, skip_c], [w1[:, :C_out], w1[:, C_out:]],
                         params["bn1_gamma"], params["bn1_beta"])
    h2 = conv3x3_bn_relu([h1], [params["conv2_w"]],
                         params["bn2_gamma"], params["bn2_beta"])

    return jnp.transpose(h2, (0, 3, 1, 2)).astype(jnp.float32)


# -------------------------- params / f32 reference --------------------------

def init_params(key, in_channels, out_channels):
    ks = jax.random.split(key, 6)
    p = {}
    p["upconv_w"] = 0.1 * jax.random.normal(ks[0], (in_channels, out_channels, 2, 2), jnp.float32)
    p["upconv_b"] = 0.1 * jax.random.normal(ks[1], (out_channels,), jnp.float32)
    p["conv1_w"] = 0.1 * jax.random.normal(ks[2], (out_channels, in_channels, 3, 3), jnp.float32)
    p["conv1_b"] = 0.1 * jax.random.normal(ks[3], (out_channels,), jnp.float32)
    p["bn1_gamma"] = jnp.ones((out_channels,), jnp.float32)
    p["bn1_beta"] = jnp.zeros((out_channels,), jnp.float32)
    p["conv2_w"] = 0.1 * jax.random.normal(ks[4], (out_channels, out_channels, 3, 3), jnp.float32)
    p["conv2_b"] = 0.1 * jax.random.normal(ks[5], (out_channels,), jnp.float32)
    p["bn2_gamma"] = jnp.ones((out_channels,), jnp.float32)
    p["bn2_beta"] = jnp.zeros((out_channels,), jnp.float32)
    return p


def reference_forward(params, x, skip_x):
    """Pure-JAX f32 reference (lax convs, WITH conv biases) mirroring PyTorch."""
    hp = jax.lax.Precision.HIGHEST
    wt = params["upconv_w"]  # (C_in, C_out, 2, 2)
    w_conv = jnp.flip(jnp.transpose(wt, (1, 0, 2, 3)), axis=(2, 3))
    y = jax.lax.conv_general_dilated(
        x, w_conv, window_strides=(1, 1), padding=((1, 1), (1, 1)),
        lhs_dilation=(2, 2), dimension_numbers=("NCHW", "OIHW", "NCHW"),
        precision=hp)
    y = y + params["upconv_b"][None, :, None, None]
    diff = skip_x.shape[3] - y.shape[3]
    lo = diff // 2
    sk = skip_x[:, :, lo:y.shape[3] + lo, lo:y.shape[3] + lo]
    h = jnp.concatenate([y, sk], axis=1)

    def conv_bn_relu(h, w, b, g, beta):
        h = jax.lax.conv_general_dilated(
            h, w, (1, 1), ((1, 1), (1, 1)),
            dimension_numbers=("NCHW", "OIHW", "NCHW"), precision=hp)
        h = h + b[None, :, None, None]
        mean = jnp.mean(h, axis=(0, 2, 3), keepdims=True)
        var = jnp.mean((h - mean) ** 2, axis=(0, 2, 3), keepdims=True)
        h = (h - mean) * jax.lax.rsqrt(var + _BN_EPS) * g[None, :, None, None] \
            + beta[None, :, None, None]
        return jnp.maximum(h, 0.0)

    h = conv_bn_relu(h, params["conv1_w"], params["conv1_b"],
                     params["bn1_gamma"], params["bn1_beta"])
    h = conv_bn_relu(h, params["conv2_w"], params["conv2_b"],
                     params["bn2_gamma"], params["bn2_beta"])
    return h


# ---------------------------------- main ------------------------------------

if __name__ == "__main__":
    # DecoderBlock(256, 128): a real UNet decoder stage at small spatial size,
    # so channel dims are lane-dense (>=128) like the production model.
    in_channels, out_channels = 256, 128
    N, H, W = 2, 16, 16
    Hs = Ws = 34  # skip larger than 2H to exercise the crop path

    key = jax.random.PRNGKey(0)
    k_x, k_s, k_p = jax.random.split(key, 3)
    x = jax.random.normal(k_x, (N, in_channels, H, W), jnp.float32)
    skip_x = jax.random.normal(k_s, (N, out_channels, Hs, Ws), jnp.float32)
    params = init_params(k_p, in_channels, out_channels)

    fwd = jax.jit(decoder_block_forward)
    out = jax.block_until_ready(fwd(params, x, skip_x))
    ref = jax.block_until_ready(reference_forward(params, x, skip_x))

    assert out.shape == (N, out_channels, 2 * H, 2 * W), out.shape
    max_err = float(jnp.max(jnp.abs(out - ref)))
    assert jnp.allclose(out, ref, rtol=3e-2, atol=3e-2), max_err

    print("KERNEL_OK")
</pallas_src>

<mosaic_0001>
module attributes {stable_mosaic.version = 11 : i64} {
  func.func @_upconv_kernel(%arg0: i32, %arg1: i32, %arg2: i32, %arg3: memref<1x8x16x256xbf16, #tpu.memory_space<vmem>>, %arg4: memref<1x256x256xbf16, #tpu.memory_space<vmem>>, %arg5: memref<1x256xf32, #tpu.memory_space<vmem>>, %arg6: memref<1x8x1x16x256xbf16, #tpu.memory_space<vmem>>) attributes {dimension_semantics = [#tpu.dimension_semantics<parallel>, #tpu.dimension_semantics<parallel>, #tpu.dimension_semantics<parallel>], iteration_bounds = array<i64: 2, 2, 2>, scalar_prefetch = 0 : i64, scratch_operands = 0 : i64, tpu.core_type = #tpu.core_type<tc>, window_params = [{transform_indices = @transform_0, window_bounds = array<i64: 1, 8, 16, 256>}, {transform_indices = @transform_1, window_bounds = array<i64: 1, 256, 256>}, {pipeline_mode = #tpu.pipeline_mode<synchronous>, transform_indices = @transform_2, window_bounds = array<i64: 1, 256>}, {transform_indices = @transform_3, window_bounds = array<i64: 1, 8, 1, 16, 256>}]} {
    %c0 = arith.constant 0 : index
    %c0_0 = arith.constant 0 : index
    %c0_1 = arith.constant 0 : index
    %c0_2 = arith.constant 0 : index
    %0 = vector.load %arg3[%c0, %c0_0, %c0_1, %c0_2] : memref<1x8x16x256xbf16, #tpu.memory_space<vmem>>, vector<1x8x16x256xbf16>
    %1 = vector.shape_cast %0 : vector<1x8x16x256xbf16> to vector<8x16x256xbf16>
    %2 = vector.shape_cast %1 : vector<8x16x256xbf16> to vector<128x256xbf16>
    %c0_3 = arith.constant 0 : index
    %c0_4 = arith.constant 0 : index
    %c0_5 = arith.constant 0 : index
    %3 = vector.load %arg4[%c0_3, %c0_4, %c0_5] : memref<1x256x256xbf16, #tpu.memory_space<vmem>>, vector<1x256x256xbf16>
    %4 = vector.shape_cast %3 : vector<1x256x256xbf16> to vector<256x256xbf16>
    %cst = arith.constant dense<0.000000e+00> : vector<128x256xf32>
    %5 = tpu.matmul %2, %4, %cst {dimension_numbers = #tpu.dot_dimension_numbers<[1], [0], [0], [1], [0, 0, 1, 1], [], []>} : vector<128x256xbf16>, vector<256x256xbf16>, vector<128x256xf32> -> vector<128x256xf32>
    %c0_6 = arith.constant 0 : index
    %c0_7 = arith.constant 0 : index
    %6 = vector.load %arg5[%c0_6, %c0_7] : memref<1x256xf32, #tpu.memory_space<vmem>>, vector<1x256xf32>
    %7 = vector.broadcast %6 : vector<1x256xf32> to vector<128x256xf32>
    %8 = arith.addf %5, %7 : vector<128x256xf32>
    %9 = vector.shape_cast %8 : vector<128x256xf32> to vector<8x16x256xf32>
    %10 = arith.truncf %9 : vector<8x16x256xf32> to vector<8x16x256xbf16>
    %c0_8 = arith.constant 0 : index
    %c0_9 = arith.constant 0 : index
    %c0_10 = arith.constant 0 : index
    %c0_11 = arith.constant 0 : index
    %c0_12 = arith.constant 0 : index
    %11 = vector.load %arg6[%c0_8, %c0_9, %c0_10, %c0_11, %c0_12] : memref<1x8x1x16x256xbf16, #tpu.memory_space<vmem>>, vector<1x8x1x16x256xbf16>
    %12 = vector.shape_cast %11 : vector<1x8x1x16x256xbf16> to vector<8x16x256xbf16>
    %13 = vector.shape_cast %10 : vector<8x16x256xbf16> to vector<1x8x1x16x256xbf16>
    tpu.vector_store %arg6[%c0_8, %c0_9, %c0_10, %c0_11, %c0_12], %13 {strides = array<i32>} : memref<1x8x1x16x256xbf16, #tpu.memory_space<vmem>>, vector<1x8x1x16x256xbf16>,
    return
  }
  func.func @transform_0(%arg0: i32, %arg1: i32, %arg2: i32) -> (i32, i32, i32, i32) {
    %c0_i32 = arith.constant 0 : i32
    %c0_i32_0 = arith.constant 0 : i32
    %c0_i32_1 = arith.constant 0 : i32
    return %arg0, %arg1, %c0_i32, %c0_i32_0 : i32, i32, i32, i32
  }
  func.func @transform_1(%arg0: i32, %arg1: i32, %arg2: i32) -> (i32, i32, i32) {
    %c0_i32 = arith.constant 0 : i32
    %c0_i32_0 = arith.constant 0 : i32
    %c0_i32_1 = arith.constant 0 : i32
    return %arg2, %c0_i32, %c0_i32_0 : i32, i32, i32
  }
  func.func @transform_2(%arg0: i32, %arg1: i32, %arg2: i32) -> (i32, i32) {
    %c0_i32 = arith.constant 0 : i32
    %c0_i32_0 = arith.constant 0 : i32
    %c0_i32_1 = arith.constant 0 : i32
    return %c0_i32, %c0_i32_0 : i32, i32
  }
  func.func @transform_3(%arg0: i32, %arg1: i32, %arg2: i32) -> (i32, i32, i32, i32, i32) {
    %c0_i32 = arith.constant 0 : i32
    %c0_i32_0 = arith.constant 0 : i32
    %c0_i32_1 = arith.constant 0 : i32
    return %arg0, %arg1, %arg2, %c0_i32, %c0_i32_0 : i32, i32, i32, i32, i32
  }
}

module attributes {stable_mosaic.version = 11 : i64} {
  func.func @_conv3x3_stats_kernel(%arg0: i32, %arg1: i32, %arg2: i32, %arg3: memref<1x1x34x128xbf16, #tpu.memory_space<vmem>>, %arg4: memref<1x1x34x128xbf16, #tpu.memory_space<vmem>>, %arg5: memref<1x1x34x128xbf16, #tpu.memory_space<vmem>>, %arg6: memref<1x1x34x128xbf16, #tpu.memory_space<vmem>>, %arg7: memref<1x1x34x128xbf16, #tpu.memory_space<vmem>>, %arg8: memref<1x1x34x128xbf16, #tpu.memory_space<vmem>>, %arg9: memref<3x3x128x128xbf16, #tpu.memory_space<vmem>>, %arg10: memref<3x3x128x128xbf16, #tpu.memory_space<vmem>>, %arg11: memref<1x1x32x128xbf16, #tpu.memory_space<vmem>>, %arg12: memref<1x1x2x128xf32, #tpu.memory_space<vmem>>) attributes {dimension_semantics = [#tpu.dimension_semantics<parallel>, #tpu.dimension_semantics<parallel>, #tpu.dimension_semantics<parallel>], iteration_bounds = array<i64: 1, 2, 32>, scalar_prefetch = 0 : i64, scratch_operands = 0 : i64, tpu.core_type = #tpu.core_type<tc>, window_params = [{transform_indices = @transform_0, window_bounds = array<i64: 1, 1, 34, 128>}, {transform_indices = @transform_1, window_bounds = array<i64: 1, 1, 34, 128>}, {transform_indices = @transform_2, window_bounds = array<i64: 1, 1, 34, 128>}, {transform_indices = @transform_3, window_bounds = array<i64: 1, 1, 34, 128>}, {transform_indices = @transform_4, window_bounds = array<i64: 1, 1, 34, 128>}, {transform_indices = @transform_5, window_bounds = array<i64: 1, 1, 34, 128>}, {transform_indices = @transform_6, window_bounds = array<i64: 3, 3, 128, 128>}, {transform_indices = @transform_7, window_bounds = array<i64: 3, 3, 128, 128>}, {transform_indices = @transform_8, window_bounds = array<i64: 1, 1, 32, 128>}, {transform_indices = @transform_9, window_bounds = array<i64: 1, 1, 2, 128>}]} {
    %cst = arith.constant 0.000000e+00 : f32
    %0 = vector.broadcast %cst : f32 to vector<32x128xf32>
    %c0 = arith.constant 0 : index
    %c0_0 = arith.constant 0 : index
    %c0_1 = arith.constant 0 : index
    %c0_2 = arith.constant 0 : index
    %1 = vector.load %arg3[%c0, %c0_0, %c0_1, %c0_2] : memref<1x1x34x128xbf16, #tpu.memory_space<vmem>>, vector<1x1x34x128xbf16>
    %2 = vector.shape_cast %1 : vector<1x1x34x128xbf16> to vector<34x128xbf16>
    %3 = vector.extract_strided_slice %2 {offsets = [0, 0], sizes = [32, 128], strides = [1, 1]} : vector<34x128xbf16> to vector<32x128xbf16>
    %c0_3 = arith.constant 0 : index
    %c0_4 = arith.constant 0 : index
    %c0_5 = arith.constant 0 : index
    %c0_6 = arith.constant 0 : index
    %4 = vector.load %arg9[%c0_3, %c0_4, %c0_5, %c0_6] : memref<3x3x128x128xbf16, #tpu.memory_space<vmem>>, vector<1x1x128x128xbf16>
    %5 = vector.shape_cast %4 : vector<1x1x128x128xbf16> to vector<128x128xbf16>
    %cst_7 = arith.constant dense<0.000000e+00> : vector<32x128xf32>
    %6 = tpu.matmul %3, %5, %cst_7 {dimension_numbers = #tpu.dot_dimension_numbers<[1], [0], [0], [1], [0, 0, 1, 1], [], []>} : vector<32x128xbf16>, vector<128x128xbf16>, vector<32x128xf32> -> vector<32x128xf32>
    %7 = arith.addf %0, %6 : vector<32x128xf32>
    %8 = vector.extract_strided_slice %2 {offsets = [1, 0], sizes = [32, 128], strides = [1, 1]} : vector<34x128xbf16> to vector<32x128xbf16>
    %c0_8 = arith.constant 0 : index
    %c1 = arith.constant 1 : index
    %c0_9 = arith.constant 0 : index
    %c0_10 = arith.constant 0 : index
    %9 = vector.load %arg9[%c0_8, %c1, %c0_9, %c0_10] : memref<3x3x128x128xbf16, #tpu.memory_space<vmem>>, vector<1x1x128x128xbf16>
    %10 = vector.shape_cast %9 : vector<1x1x128x128xbf16> to vector<128x128xbf16>
    %cst_11 = arith.constant dense<0.000000e+00> : vector<32x128xf32>
    %11 = tpu.matmul %8, %10, %cst_11 {dimension_numbers = #tpu.dot_dimension_numbers<[1], [0], [0], [1], [0, 0, 1, 1], [], []>} : vector<32x128xbf16>, vector<128x128xbf16>, vector<32x128xf32> -> vector<32x128xf32>
    %12 = arith.addf %7, %11 : vector<32x128xf32>
    %13 = vector.extract_strided_slice %2 {offsets = [2, 0], sizes = [32, 128], strides = [1, 1]} : vector<34x128xbf16> to vector<32x128xbf16>
    %c0_12 = arith.constant 0 : index
    %c2 = arith.constant 2 : index
    %c0_13 = arith.constant 0 : index
    %c0_14 = arith.constant 0 : index
    %14 = vector.load %arg9[%c0_12, %c2, %c0_13, %c0_14] : memref<3x3x128x128xbf16, #tpu.memory_space<vmem>>, vector<1x1x128x128xbf16>
    %15 = vector.shape_cast %14 : vector<1x1x128x128xbf16> to vector<128x128xbf16>
    %cst_15 = arith.constant dense<0.000000e+00> : vector<32x128xf32>
    %16 = tpu.matmul %13, %15, %cst_15 {dimension_numbers = #tpu.dot_dimension_numbers<[1], [0], [0], [1], [0, 0, 1, 1], [], []>} : vector<32x128xbf16>, vector<128x128xbf16>, vector<32x128xf32> -> vector<32x128xf32>
    %17 = arith.addf %12, %16 : vector<32x128xf32>
    %c0_16 = arith.constant 0 : index
    %c0_17 = arith.constant 0 : index
    %c0_18 = arith.constant 0 : index
    %c0_19 = arith.constant 0 : index
    %18 = vector.load %arg4[%c0_16, %c0_17, %c0_18, %c0_19] : memref<1x1x34x128xbf16, #tpu.memory_space<vmem>>, vector<1x1x34x128xbf16>
    %19 = vector.shape_cast %18 : vector<1x1x34x128xbf16> to vector<34x128xbf16>
    %20 = vector.extract_strided_slice %19 {offsets = [0, 0], sizes = [32, 128], strides = [1, 1]} : vector<34x128xbf16> to vector<32x128xbf16>
    %c1_20 = arith.constant 1 : index
    %c0_21 = arith.constant 0 : index
    %c0_22 = arith.constant 0 : index
    %c0_23 = arith.constant 0 : index
    %21 = vector.load %arg9[%c1_20, %c0_21, %c0_22, %c0_23] : memref<3x3x128x128xbf16, #tpu.memory_space<vmem>>, vector<1x1x128x128xbf16>
    %22 = vector.shape_cast %21 : vector<1x1x128x128xbf16> to vector<128x128xbf16>
    %cst_24 = arith.constant dense<0.000000e+00> : vector<32x128xf32>
    %23 = tpu.matmul %20, %22, %cst_24 {dimension_numbers = #tpu.dot_dimension_numbers<[1], [0], [0], [1], [0, 0, 1, 1], [], []>} : vector<32x128xbf16>, vector<128x128xbf16>, vector<32x128xf32> -> vector<32x128xf32>
    %24 = arith.addf %17, %23 : vector<32x128xf32>
    %25 = vector.extract_strided_slice %19 {offsets = [1, 0], sizes = [32, 128], strides = [1, 1]} : vector<34x128xbf16> to vector<32x128xbf16>
    %c1_25 = arith.constant 1 : index
    %c1_26 = arith.constant 1 : index
    %c0_27 = arith.constant 0 : index
    %c0_28 = arith.constant 0 : index
    %26 = vector.load %arg9[%c1_25, %c1_26, %c0_27, %c0_28] : memref<3x3x128x128xbf16, #tpu.memory_space<vmem>>, vector<1x1x128x128xbf16>
    %27 = vector.shape_cast %26 : vector<1x1x128x128xbf16> to vector<128x128xbf16>
    %cst_29 = arith.constant dense<0.000000e+00> : vector<32x128xf32>
    %28 = tpu.matmul %25, %27, %cst_29 {dimension_numbers = #tpu.dot_dimension_numbers<[1], [0], [0], [1], [0, 0, 1, 1], [], []>} : vector<32x128xbf16>, vector<128x128xbf16>, vector<32x128xf32> -> vector<32x128xf32>
    %29 = arith.addf %24, %28 : vector<32x128xf32>
    %30 = vector.extract_strided_slice %19 {offsets = [2, 0], sizes = [32, 128], strides = [1, 1]} : vector<34x128xbf16> to vector<32x128xbf16>
    %c1_30 = arith.constant 1 : index
    %c2_31 = arith.constant 2 : index
    %c0_32 = arith.constant 0 : index
    %c0_33 = arith.constant 0 : index
    %31 = vector.load %arg9[%c1_30, %c2_31, %c0_32, %c0_33] : memref<3x3x128x128xbf16, #tpu.memory_space<vmem>>, vector<1x1x128x128xbf16>
    %32 = vector.shape_cast %31 : vector<1x1x128x128xbf16> to vector<128x128xbf16>
    %cst_34 = arith.constant dense<0.000000e+00> : vector<32x128xf32>
    %33 = tpu.matmul %30, %32, %cst_34 {dimension_numbers = #tpu.dot_dimension_numbers<[1], [0], [0], [1], [0, 0, 1, 1], [], []>} : vector<32x128xbf16>, vector<128x128xbf16>, vector<32x128xf32> -> vector<32x128xf32>
    %34 = arith.addf %29, %33 : vector<32x128xf32>
    %c0_35 = arith.constant 0 : index
    %c0_36 = arith.constant 0 : index
    %c0_37 = arith.constant 0 : index
    %c0_38 = arith.constant 0 : index
    %35 = vector.load %arg5[%c0_35, %c0_36, %c0_37, %c0_38] : memref<1x1x34x128xbf16, #tpu.memory_space<vmem>>, vector<1x1x34x128xbf16>
    %36 = vector.shape_cast %35 : vector<1x1x34x128xbf16> to vector<34x128xbf16>
    %37 = vector.extract_strided_slice %36 {offsets = [0, 0], sizes = [32, 128], strides = [1, 1]} : vector<34x128xbf16> to vector<32x128xbf16>
    %c2_39 = arith.constant 2 : index
    %c0_40 = arith.constant 0 : index
    %c0_41 = arith.constant 0 : index
    %c0_42 = arith.constant 0 : index
    %38 = vector.load %arg9[%c2_39, %c0_40, %c0_41, %c0_42] : memref<3x3x128x128xbf16, #tpu.memory_space<vmem>>, vector<1x1x128x128xbf16>
    %39 = vector.shape_cast %38 : vector<1x1x128x128xbf16> to vector<128x128xbf16>
    %cst_43 = arith.constant dense<0.000000e+00> : vector<32x128xf32>
    %40 = tpu.matmul %37, %39, %cst_43 {dimension_numbers = #tpu.dot_dimension_numbers<[1], [0], [0], [1], [0, 0, 1, 1], [], []>} : vector<32x128xbf16>, vector<128x128xbf16>, vector<32x128xf32> -> vector<32x128xf32>
    %41 = arith.addf %34, %40 : vector<32x128xf32>
    %42 = vector.extract_strided_slice %36 {offsets = [1, 0], sizes = [32, 128], strides = [1, 1]} : vector<34x128xbf16> to vector<32x128xbf16>
    %c2_44 = arith.constant 2 : index
    %c1_45 = arith.constant 1 : index
    %c0_46 = arith.constant 0 : index
    %c0_47 = arith.constant 0 : index
    %43 = vector.load %arg9[%c2_44, %c1_45, %c0_46, %c0_47] : memref<3x3x128x128xbf16, #tpu.memory_space<vmem>>, vector<1x1x128x128xbf16>
    %44 = vector.shape_cast %43 : vector<1x1x128x128xbf16> to vector<128x128xbf16>
    %cst_48 = arith.constant dense<0.000000e+00> : vector<32x128xf32>
    %45 = tpu.matmul %42, %44, %cst_48 {dimension_numbers = #tpu.dot_dimension_numbers<[1], [0], [0], [1], [0, 0, 1, 1], [], []>} : vector<32x128xbf16>, vector<128x128xbf16>, vector<32x128xf32> -> vector<32x128xf32>
    %46 = arith.addf %41, %45 : vector<32x128xf32>
    %47 = vector.extract_strided_slice %36 {offsets = [2, 0], sizes = [32, 128], strides = [1, 1]} : vector<34x128xbf16> to vector<32x128xbf16>
    %c2_49 = arith.constant 2 : index
    %c2_50 = arith.constant 2 : index
    %c0_51 = arith.constant 0 : index
    %c0_52 = arith.constant 0 : index
    %48 = vector.load %arg9[%c2_49, %c2_50, %c0_51, %c0_52] : memref<3x3x128x128xbf16, #tpu.memory_space<vmem>>, vector<1x1x128x128xbf16>
    %49 = vector.shape_cast %48 : vector<1x1x128x128xbf16> to vector<128x128xbf16>
    %cst_53 = arith.constant dense<0.000000e+00> : vector<32x128xf32>
    %50 = tpu.matmul %47, %49, %cst_53 {dimension_numbers = #tpu.dot_dimension_numbers<[1], [0], [0], [1], [0, 0, 1, 1], [], []>} : vector<32x128xbf16>, vector<128x128xbf16>, vector<32x128xf32> -> vector<32x128xf32>
    %51 = arith.addf %46, %50 : vector<32x128xf32>
    %c0_54 = arith.constant 0 : index
    %c0_55 = arith.constant 0 : index
    %c0_56 = arith.constant 0 : index
    %c0_57 = arith.constant 0 : index
    %52 = vector.load %arg6[%c0_54, %c0_55, %c0_56, %c0_57] : memref<1x1x34x128xbf16, #tpu.memory_space<vmem>>, vector<1x1x34x128xbf16>
    %53 = vector.shape_cast %52 : vector<1x1x34x128xbf16> to vector<34x128xbf16>
    %54 = vector.extract_strided_slice %53 {offsets = [0, 0], sizes = [32, 128], strides = [1, 1]} : vector<34x128xbf16> to vector<32x128xbf16>
    %c0_58 = arith.constant 0 : index
    %c0_59 = arith.constant 0 : index
    %c0_60 = arith.constant 0 : index
    %c0_61 = arith.constant 0 : index
    %55 = vector.load %arg10[%c0_58, %c0_59, %c0_60, %c0_61] : memref<3x3x128x128xbf16, #tpu.memory_space<vmem>>, vector<1x1x128x128xbf16>
    %56 = vector.shape_cast %55 : vector<1x1x128x128xbf16> to vector<128x128xbf16>
    %cst_62 = arith.constant dense<0.000000e+00> : vector<32x128xf32>
    %57 = tpu.matmul %54, %56, %cst_62 {dimension_numbers = #tpu.dot_dimension_numbers<[1], [0], [0], [1], [0, 0, 1, 1], [], []>} : vector<32x128xbf16>, vector<128x128xbf16>, vector<32x128xf32> -> vector<32x128xf32>
    %58 = arith.addf %51, %57 : vector<32x128xf32>
    %59 = vector.extract_strided_slice %53 {offsets = [1, 0], sizes = [32, 128], strides = [1, 1]} : vector<34x128xbf16> to vector<32x128xbf16>
    %c0_63 = arith.constant 0 : index
    %c1_64 = arith.constant 1 : index
    %c0_65 = arith.constant 0 : index
    %c0_66 = arith.constant 0 : index
    %60 = vector.load %arg10[%c0_63, %c1_64, %c0_65, %c0_66] : memref<3x3x128x128xbf16, #tpu.memory_space<vmem>>, vector<1x1x128x128xbf16>
    %61 = vector.shape_cast %60 : vector<1x1x128x128xbf16> to vector<128x128xbf16>
    %cst_67 = arith.constant dense<0.000000e+00> : vector<32x128xf32>
    %62 = tpu.matmul %59, %61, %cst_67 {dimension_numbers = #tpu.dot_dimension_numbers<[1], [0], [0], [1], [0, 0, 1, 1], [], []>} : vector<32x128xbf16>, vector<128x128xbf16>, vector<32x128xf32> -> vector<32x128xf32>
    %63 = arith.addf %58, %62 : vector<32x128xf32>
    %64 = vector.extract_strided_slice %53 {offsets = [2, 0], sizes = [32, 128], strides = [1, 1]} : vector<34x128xbf16> to vector<32x128xbf16>
    %c0_68 = arith.constant 0 : index
    %c2_69 = arith.constant 2 : index
    %c0_70 = arith.constant 0 : index
    %c0_71 = arith.constant 0 : index
    %65 = vector.load %arg10[%c0_68, %c2_69, %c0_70, %c0_71] : memref<3x3x128x128xbf16, #tpu.memory_space<vmem>>, vector<1x1x128x128xbf16>
    %66 = vector.shape_cast %65 : vector<1x1x128x128xbf16> to vector<128x128xbf16>
    %cst_72 = arith.constant dense<0.000000e+00> : vector<32x128xf32>
    %67 = tpu.matmul %64, %66, %cst_72 {dimension_numbers = #tpu.dot_dimension_numbers<[1], [0], [0], [1], [0, 0, 1, 1], [], []>} : vector<32x128xbf16>, vector<128x128xbf16>, vector<32x128xf32> -> vector<32x128xf32>
    %68 = arith.addf %63, %67 : vector<32x128xf32>
    %c0_73 = arith.constant 0 : index
    %c0_74 = arith.constant 0 : index
    %c0_75 = arith.constant 0 : index
    %c0_76 = arith.constant 0 : index
    %69 = vector.load %arg7[%c0_73, %c0_74, %c0_75, %c0_76] : memref<1x1x34x128xbf16, #tpu.memory_space<vmem>>, vector<1x1x34x128xbf16>
    %70 = vector.shape_cast %69 : vector<1x1x34x128xbf16> to vector<34x128xbf16>
    %71 = vector.extract_strided_slice %70 {offsets = [0, 0], sizes = [32, 128], strides = [1, 1]} : vector<34x128xbf16> to vector<32x128xbf16>
    %c1_77 = arith.constant 1 : index
    %c0_78 = arith.constant 0 : index
    %c0_79 = arith.constant 0 : index
    %c0_80 = arith.constant 0 : index
    %72 = vector.load %arg10[%c1_77, %c0_78, %c0_79, %c0_80] : memref<3x3x128x128xbf16, #tpu.memory_space<vmem>>, vector<1x1x128x128xbf16>
    %73 = vector.shape_cast %72 : vector<1x1x128x128xbf16> to vector<128x128xbf16>
    %cst_81 = arith.constant dense<0.000000e+00> : vector<32x128xf32>
    %74 = tpu.matmul %71, %73, %cst_81 {dimension_numbers = #tpu.dot_dimension_numbers<[1], [0], [0], [1], [0, 0, 1, 1], [], []>} : vector<32x128xbf16>, vector<128x128xbf16>, vector<32x128xf32> -> vector<32x128xf32>
    %75 = arith.addf %68, %74 : vector<32x128xf32>
    %76 = vector.extract_strided_slice %70 {offsets = [1, 0], sizes = [32, 128], strides = [1, 1]} : vector<34x128xbf16> to vector<32x128xbf16>
    %c1_82 = arith.constant 1 : index
    %c1_83 = arith.constant 1 : index
    %c0_84 = arith.constant 0 : index
    %c0_85 = arith.constant 0 : index
    %77 = vector.load %arg10[%c1_82, %c1_83, %c0_84, %c0_85] : memref<3x3x128x128xbf16, #tpu.memory_space<vmem>>, vector<1x1x128x128xbf16>
    %78 = vector.shape_cast %77 : vector<1x1x128x128xbf16> to vector<128x128xbf16>
    %cst_86 = arith.constant dense<0.000000e+00> : vector<32x128xf32>
    %79 = tpu.matmul %76, %78, %cst_86 {dimension_numbers = #tpu.dot_dimension_numbers<[1], [0], [0], [1], [0, 0, 1, 1], [], []>} : vector<32x128xbf16>, vector<128x128xbf16>, vector<32x128xf32> -> vector<32x128xf32>
    %80 = arith.addf %75, %79 : vector<32x128xf32>
    %81 = vector.extract_strided_slice %70 {offsets = [2, 0], sizes = [32, 128], strides = [1, 1]} : vector<34x128xbf16> to vector<32x128xbf16>
    %c1_87 = arith.constant 1 : index
    %c2_88 = arith.constant 2 : index
    %c0_89 = arith.constant 0 : index
    %c0_90 = arith.constant 0 : index
    %82 = vector.load %arg10[%c1_87, %c2_88, %c0_89, %c0_90] : memref<3x3x128x128xbf16, #tpu.memory_space<vmem>>, vector<1x1x128x128xbf16>
    %83 = vector.shape_cast %82 : vector<1x1x128x128xbf16> to vector<128x128xbf16>
    %cst_91 = arith.constant dense<0.000000e+00> : vector<32x128xf32>
    %84 = tpu.matmul %81, %83, %cst_91 {dimension_numbers = #tpu.dot_dimension_numbers<[1], [0], [0], [1], [0, 0, 1, 1], [], []>} : vector<32x128xbf16>, vector<128x128xbf16>, vector<32x128xf32> -> vector<32x128xf32>
    %85 = arith.addf %80, %84 : vector<32x128xf32>
    %c0_92 = arith.constant 0 : index
    %c0_93 = arith.constant 0 : index
    %c0_94 = arith.constant 0 : index
    %c0_95 = arith.constant 0 : index
    %86 = vector.load %arg8[%c0_92, %c0_93, %c0_94, %c0_95] : memref<1x1x34x128xbf16, #tpu.memory_space<vmem>>, vector<1x1x34x128xbf16>
    %87 = vector.shape_cast %86 : vector<1x1x34x128xbf16> to vector<34x128xbf16>
    %88 = vector.extract_strided_slice %87 {offsets = [0, 0], sizes = [32, 128], strides = [1, 1]} : vector<34x128xbf16> to vector<32x128xbf16>
    %c2_96 = arith.constant 2 : index
    %c0_97 = arith.constant 0 : index
    %c0_98 = arith.constant 0 : index
    %c0_99 = arith.constant 0 : index
    %89 = vector.load %arg10[%c2_96, %c0_97, %c0_98, %c0_99] : memref<3x3x128x128xbf16, #tpu.memory_space<vmem>>, vector<1x1x128x128xbf16>
    %90 = vector.shape_cast %89 : vector<1x1x128x128xbf16> to vector<128x128xbf16>
    %cst_100 = arith.constant dense<0.000000e+00> : vector<32x128xf32>
    %91 = tpu.matmul %88, %90, %cst_100 {dimension_numbers = #tpu.dot_dimension_numbers<[1], [0], [0], [1], [0, 0, 1, 1], [], []>} : vector<32x128xbf16>, vector<128x128xbf16>, vector<32x128xf32> -> vector<32x128xf32>
    %92 = arith.addf %85, %91 : vector<32x128xf32>
    %93 = vector.extract_strided_slice %87 {offsets = [1, 0], sizes = [32, 128], strides = [1, 1]} : vector<34x128xbf16> to vector<32x128xbf16>
    %c2_101 = arith.constant 2 : index
    %c1_102 = arith.constant 1 : index
    %c0_103 = arith.constant 0 : index
    %c0_104 = arith.constant 0 : index
    %94 = vector.load %arg10[%c2_101, %c1_102, %c0_103, %c0_104] : memref<3x3x128x128xbf16, #tpu.memory_space<vmem>>, vector<1x1x128x128xbf16>
    %95 = vector.shape_cast %94 : vector<1x1x128x128xbf16> to vector<128x128xbf16>
    %cst_105 = arith.constant dense<0.000000e+00> : vector<32x128xf32>
    %96 = tpu.matmul %93, %95, %cst_105 {dimension_numbers = #tpu.dot_dimension_numbers<[1], [0], [0], [1], [0, 0, 1, 1], [], []>} : vector<32x128xbf16>, vector<128x128xbf16>, vector<32x128xf32> -> vector<32x128xf32>
    %97 = arith.addf %92, %96 : vector<32x128xf32>
    %98 = vector.extract_strided_slice %87 {offsets = [2, 0], sizes = [32, 128], strides = [1, 1]} : vector<34x128xbf16> to vector<32x128xbf16>
    %c2_106 = arith.constant 2 : index
    %c2_107 = arith.constant 2 : index
    %c0_108 = arith.constant 0 : index
    %c0_109 = arith.constant 0 : index
    %99 = vector.load %arg10[%c2_106, %c2_107, %c0_108, %c0_109] : memref<3x3x128x128xbf16, #tpu.memory_space<vmem>>, vector<1x1x128x128xbf16>
    %100 = vector.shape_cast %99 : vector<1x1x128x128xbf16> to vector<128x128xbf16>
    %cst_110 = arith.constant dense<0.000000e+00> : vector<32x128xf32>
    %101 = tpu.matmul %98, %100, %cst_110 {dimension_numbers = #tpu.dot_dimension_numbers<[1], [0], [0], [1], [0, 0, 1, 1], [], []>} : vector<32x128xbf16>, vector<128x128xbf16>, vector<32x128xf32> -> vector<32x128xf32>
    %102 = arith.addf %97, %101 : vector<32x128xf32>
    %103 = arith.truncf %102 : vector<32x128xf32> to vector<32x128xbf16>
    %c0_111 = arith.constant 0 : index
    %c0_112 = arith.constant 0 : index
    %c0_113 = arith.constant 0 : index
    %c0_114 = arith.constant 0 : index
    %104 = vector.load %arg11[%c0_111, %c0_112, %c0_113, %c0_114] : memref<1x1x32x128xbf16, #tpu.memory_space<vmem>>, vector<1x1x32x128xbf16>
    %105 = vector.shape_cast %104 : vector<1x1x32x128xbf16> to vector<32x128xbf16>
    %106 = vector.shape_cast %103 : vector<32x128xbf16> to vector<1x1x32x128xbf16>
    tpu.vector_store %arg11[%c0_111, %c0_112, %c0_113, %c0_114], %106 {strides = array<i32>} : memref<1x1x32x128xbf16, #tpu.memory_space<vmem>>, vector<1x1x32x128xbf16>,
    %cst_115 = arith.constant dense<0.000000e+00> : vector<128xf32>
    %107 = vector.multi_reduction <add>, %102, %cst_115 [0] : vector<32x128xf32> to vector<128xf32>
    %108 = vector.shape_cast %107 : vector<128xf32> to vector<1x128xf32>
    %c0_116 = arith.constant 0 : index
    %c0_117 = arith.constant 0 : index
    %c0_118 = arith.constant 0 : index
    %c0_119 = arith.constant 0 : index
    %109 = vector.load %arg12[%c0_116, %c0_117, %c0_118, %c0_119] : memref<1x1x2x128xf32, #tpu.memory_space<vmem>>, vector<1x1x1x128xf32>
    %110 = vector.shape_cast %109 : vector<1x1x1x128xf32> to vector<1x128xf32>
    %111 = vector.shape_cast %108 : vector<1x128xf32> to vector<1x1x1x128xf32>
    tpu.vector_store %arg12[%c0_116, %c0_117, %c0_118, %c0_119], %111 {strides = array<i32>} : memref<1x1x2x128xf32, #tpu.memory_space<vmem>>, vector<1x1x1x128xf32>,
    %112 = arith.mulf %102, %102 : vector<32x128xf32>
    %cst_120 = arith.constant dense<0.000000e+00> : vector<128xf32>
    %113 = vector.multi_reduction <add>, %112, %cst_120 [0] : vector<32x128xf32> to vector<128xf32>
    %114 = vector.shape_cast %113 : vector<128xf32> to vector<1x128xf32>
    %c0_121 = arith.constant 0 : index
    %c0_122 = arith.constant 0 : index
    %c1_123 = arith.constant 1 : index
    %c0_124 = arith.constant 0 : index
    %115 = vector.load %arg12[%c0_121, %c0_122, %c1_123, %c0_124] : memref<1x1x2x128xf32, #tpu.memory_space<vmem>>, vector<1x1x1x128xf32>
    %116 = vector.shape_cast %115 : vector<1x1x1x128xf32> to vector<1x128xf32>
    %117 = vector.shape_cast %114 : vector<1x128xf32> to vector<1x1x1x128xf32>
    tpu.vector_store %arg12[%c0_121, %c0_122, %c1_123, %c0_124], %117 {strides = array<i32>} : memref<1x1x2x128xf32, #tpu.memory_space<vmem>>, vector<1x1x1x128xf32>,
    return
  }
  func.func @transform_0(%arg0: i32, %arg1: i32, %arg2: i32) -> (i32, i32, i32, i32) {
    %c0_i32 = arith.constant 0 : i32
    %0 = arith.addi %arg2, %c0_i32 : i32
    %c0_i32_0 = arith.constant 0 : i32
    %c0_i32_1 = arith.constant 0 : i32
    %c0_i32_2 = arith.constant 0 : i32
    return %arg1, %0, %c0_i32_0, %c0_i32_1 : i32, i32, i32, i32
  }
  func.func @transform_1(%arg0: i32, %arg1: i32, %arg2: i32) -> (i32, i32, i32, i32) {
    %c1_i32 = arith.constant 1 : i32
    %0 = arith.addi %arg2, %c1_i32 : i32
    %c0_i32 = arith.constant 0 : i32
    %c0_i32_0 = arith.constant 0 : i32
    %c0_i32_1 = arith.constant 0 : i32
    return %arg1, %0, %c0_i32, %c0_i32_0 : i32, i32, i32, i32
  }
  func.func @transform_2(%arg0: i32, %arg1: i32, %arg2: i32) -> (i32, i32, i32, i32) {
    %c2_i32 = arith.constant 2 : i32
    %0 = arith.addi %arg2, %c2_i32 : i32
    %c0_i32 = arith.constant 0 : i32
    %c0_i32_0 = arith.constant 0 : i32
    %c0_i32_1 = arith.constant 0 : i32
    return %arg1, %0, %c0_i32, %c0_i32_0 : i32, i32, i32, i32
  }
  func.func @transform_3(%arg0: i32, %arg1: i32, %arg2: i32) -> (i32, i32, i32, i32) {
    %c0_i32 = arith.constant 0 : i32
    %0 = arith.addi %arg2, %c0_i32 : i32
    %c0_i32_0 = arith.constant 0 : i32
    %c0_i32_1 = arith.constant 0 : i32
    %c0_i32_2 = arith.constant 0 : i32
    return %arg1, %0, %c0_i32_0, %c0_i32_1 : i32, i32, i32, i32
  }
  func.func @transform_4(%arg0: i32, %arg1: i32, %arg2: i32) -> (i32, i32, i32, i32) {
    %c1_i32 = arith.constant 1 : i32
    %0 = arith.addi %arg2, %c1_i32 : i32
    %c0_i32 = arith.constant 0 : i32
    %c0_i32_0 = arith.constant 0 : i32
    %c0_i32_1 = arith.constant 0 : i32
    return %arg1, %0, %c0_i32, %c0_i32_0 : i32, i32, i32, i32
  }
  func.func @transform_5(%arg0: i32, %arg1: i32, %arg2: i32) -> (i32, i32, i32, i32) {
    %c2_i32 = arith.constant 2 : i32
    %0 = arith.addi %arg2, %c2_i32 : i32
    %c0_i32 = arith.constant 0 : i32
    %c0_i32_0 = arith.constant 0 : i32
    %c0_i32_1 = arith.constant 0 : i32
    return %arg1, %0, %c0_i32, %c0_i32_0 : i32, i32, i32, i32
  }
  func.func @transform_6(%arg0: i32, %arg1: i32, %arg2: i32) -> (i32, i32, i32, i32) {
    %c0_i32 = arith.constant 0 : i32
    %c0_i32_0 = arith.constant 0 : i32
    %c0_i32_1 = arith.constant 0 : i32
    %c0_i32_2 = arith.constant 0 : i32
    return %c0_i32, %c0_i32_0, %c0_i32_1, %arg0 : i32, i32, i32, i32
  }
  func.func @transform_7(%arg0: i32, %arg1: i32, %arg2: i32) -> (i32, i32, i32, i32) {
    %c0_i32 = arith.constant 0 : i32
    %c0_i32_0 = arith.constant 0 : i32
    %c0_i32_1 = arith.constant 0 : i32
    %c0_i32_2 = arith.constant 0 : i32
    return %c0_i32, %c0_i32_0, %c0_i32_1, %arg0 : i32, i32, i32, i32
  }
  func.func @transform_8(%arg0: i32, %arg1: i32, %arg2: i32) -> (i32, i32, i32, i32) {
    %c0_i32 = arith.constant 0 : i32
    %c0_i32_0 = arith.constant 0 : i32
    return %arg1, %arg2, %c0_i32, %arg0 : i32, i32, i32, i32
  }
  func.func @transform_9(%arg0: i32, %arg1: i32, %arg2: i32) -> (i32, i32, i32, i32) {
    %c0_i32 = arith.constant 0 : i32
    %c0_i32_0 = arith.constant 0 : i32
    return %arg1, %arg2, %c0_i32, %arg0 : i32, i32, i32, i32
  }
}

module attributes {stable_mosaic.version = 11 : i64} {
  func.func @_bn_relu_kernel(%arg0: i32, %arg1: i32, %arg2: memref<1x8x32x128xbf16, #tpu.memory_space<vmem>>, %arg3: memref<2x128xf32, #tpu.memory_space<vmem>>, %arg4: memref<1x128xf32, #tpu.memory_space<vmem>>, %arg5: memref<1x128xf32, #tpu.memory_space<vmem>>, %arg6: memref<1x8x32x128xbf16, #tpu.memory_space<vmem>>) attributes {dimension_semantics = [#tpu.dimension_semantics<parallel>, #tpu.dimension_semantics<parallel>], iteration_bounds = array<i64: 2, 4>, scalar_prefetch = 0 : i64, scratch_operands = 0 : i64, tpu.core_type = #tpu.core_type<tc>, window_params = [{transform_indices = @transform_0, window_bounds = array<i64: 1, 8, 32, 128>}, {pipeline_mode = #tpu.pipeline_mode<synchronous>, transform_indices = @transform_1, window_bounds = array<i64: 2, 128>}, {pipeline_mode = #tpu.pipeline_mode<synchronous>, transform_indices = @transform_2, window_bounds = array<i64: 1, 128>}, {pipeline_mode = #tpu.pipeline_mode<synchronous>, transform_indices = @transform_3, window_bounds = array<i64: 1, 128>}, {transform_indices = @transform_4, window_bounds = array<i64: 1, 8, 32, 128>}]} {
    %c0 = arith.constant 0 : index
    %c0_0 = arith.constant 0 : index
    %0 = vector.load %arg3[%c0, %c0_0] : memref<2x128xf32, #tpu.memory_space<vmem>>, vector<1x128xf32>
    %cst = arith.constant 4.8828125E-4 : f32
    %1 = vector.broadcast %cst : f32 to vector<1x128xf32>
    %2 = arith.mulf %0, %1 : vector<1x128xf32>
    %c1 = arith.constant 1 : index
    %c0_1 = arith.constant 0 : index
    %3 = vector.load %arg3[%c1, %c0_1] : memref<2x128xf32, #tpu.memory_space<vmem>>, vector<1x128xf32>
    %cst_2 = arith.constant 4.8828125E-4 : f32
    %4 = vector.broadcast %cst_2 : f32 to vector<1x128xf32>
    %5 = arith.mulf %3, %4 : vector<1x128xf32>
    %6 = arith.mulf %2, %2 : vector<1x128xf32>
    %7 = arith.subf %5, %6 : vector<1x128xf32>
    %c0_3 = arith.constant 0 : index
    %c0_4 = arith.constant 0 : index
    %8 = vector.load %arg4[%c0_3, %c0_4] : memref<1x128xf32, #tpu.memory_space<vmem>>, vector<1x128xf32>
    %cst_5 = arith.constant 9.99999974E-6 : f32
    %9 = vector.broadcast %cst_5 : f32 to vector<1x128xf32>
    %10 = arith.addf %7, %9 : vector<1x128xf32>
    %11 = math.rsqrt %10 : vector<1x128xf32>
    %12 = arith.mulf %8, %11 : vector<1x128xf32>
    %c0_6 = arith.constant 0 : index
    %c0_7 = arith.constant 0 : index
    %13 = vector.load %arg5[%c0_6, %c0_7] : memref<1x128xf32, #tpu.memory_space<vmem>>, vector<1x128xf32>
    %14 = arith.mulf %2, %12 : vector<1x128xf32>
    %15 = arith.subf %13, %14 : vector<1x128xf32>
    %c0_8 = arith.constant 0 : index
    %c0_9 = arith.constant 0 : index
    %c0_10 = arith.constant 0 : index
    %c0_11 = arith.constant 0 : index
    %16 = vector.load %arg2[%c0_8, %c0_9, %c0_10, %c0_11] : memref<1x8x32x128xbf16, #tpu.memory_space<vmem>>, vector<1x8x32x128xbf16>
    %17 = vector.shape_cast %16 : vector<1x8x32x128xbf16> to vector<8x32x128xbf16>
    %18 = arith.extf %17 : vector<8x32x128xbf16> to vector<8x32x128xf32>
    %19 = vector.shape_cast %12 : vector<1x128xf32> to vector<1x1x128xf32>
    %20 = vector.broadcast %19 : vector<1x1x128xf32> to vector<8x32x128xf32>
    %21 = arith.mulf %18, %20 : vector<8x32x128xf32>
    %22 = vector.shape_cast %15 : vector<1x128xf32> to vector<1x1x128xf32>
    %23 = vector.broadcast %22 : vector<1x1x128xf32> to vector<8x32x128xf32>
    %24 = arith.addf %21, %23 : vector<8x32x128xf32>
    %cst_12 = arith.constant 0.000000e+00 : f32
    %25 = vector.broadcast %cst_12 : f32 to vector<8x32x128xf32>
    %26 = arith.maximumf %24, %25 : vector<8x32x128xf32>
    %27 = arith.truncf %26 : vector<8x32x128xf32> to vector<8x32x128xbf16>
    %c0_13 = arith.constant 0 : index
    %c0_14 = arith.constant 0 : index
    %c0_15 = arith.constant 0 : index
    %c0_16 = arith.constant 0 : index
    %28 = vector.load %arg6[%c0_13, %c0_14, %c0_15, %c0_16] : memref<1x8x32x128xbf16, #tpu.memory_space<vmem>>, vector<1x8x32x128xbf16>
    %29 = vector.shape_cast %28 : vector<1x8x32x128xbf16> to vector<8x32x128xbf16>
    %30 = vector.shape_cast %27 : vector<8x32x128xbf16> to vector<1x8x32x128xbf16>
    tpu.vector_store %arg6[%c0_13, %c0_14, %c0_15, %c0_16], %30 {strides = array<i32>} : memref<1x8x32x128xbf16, #tpu.memory_space<vmem>>, vector<1x8x32x128xbf16>,
    return
  }
  func.func @transform_0(%arg0: i32, %arg1: i32) -> (i32, i32, i32, i32) {
    %c0_i32 = arith.constant 0 : i32
    %c0_i32_0 = arith.constant 0 : i32
    %c0_i32_1 = arith.constant 0 : i32
    return %arg0, %arg1, %c0_i32, %c0_i32_0 : i32, i32, i32, i32
  }
  func.func @transform_1(%arg0: i32, %arg1: i32) -> (i32, i32) {
    %c0_i32 = arith.constant 0 : i32
    %c0_i32_0 = arith.constant 0 : i32
    %c0_i32_1 = arith.constant 0 : i32
    return %c0_i32, %c0_i32_0 : i32, i32
  }
  func.func @transform_2(%arg0: i32, %arg1: i32) -> (i32, i32) {
    %c0_i32 = arith.constant 0 : i32
    %c0_i32_0 = arith.constant 0 : i32
    %c0_i32_1 = arith.constant 0 : i32
    return %c0_i32, %c0_i32_0 : i32, i32
  }
  func.func @transform_3(%arg0: i32, %arg1: i32) -> (i32, i32) {
    %c0_i32 = arith.constant 0 : i32
    %c0_i32_0 = arith.constant 0 : i32
    %c0_i32_1 = arith.constant 0 : i32
    return %c0_i32, %c0_i32_0 : i32, i32
  }
  func.func @transform_4(%arg0: i32, %arg1: i32) -> (i32, i32, i32, i32) {
    %c0_i32 = arith.constant 0 : i32
    %c0_i32_0 = arith.constant 0 : i32
    %c0_i32_1 = arith.constant 0 : i32
    return %arg0, %arg1, %c0_i32, %c0_i32_0 : i32, i32, i32, i32
  }
}

module attributes {stable_mosaic.version = 11 : i64} {
  func.func @_conv3x3_stats_kernel(%arg0: i32, %arg1: i32, %arg2: i32, %arg3: memref<1x1x34x128xbf16, #tpu.memory_space<vmem>>, %arg4: memref<1x1x34x128xbf16, #tpu.memory_space<vmem>>, %arg5: memref<1x1x34x128xbf16, #tpu.memory_space<vmem>>, %arg6: memref<3x3x128x128xbf16, #tpu.memory_space<vmem>>, %arg7: memref<1x1x32x128xbf16, #tpu.memory_space<vmem>>, %arg8: memref<1x1x2x128xf32, #tpu.memory_space<vmem>>) attributes {dimension_semantics = [#tpu.dimension_semantics<parallel>, #tpu.dimension_semantics<parallel>, #tpu.dimension_semantics<parallel>], iteration_bounds = array<i64: 1, 2, 32>, scalar_prefetch = 0 : i64, scratch_operands = 0 : i64, tpu.core_type = #tpu.core_type<tc>, window_params = [{transform_indices = @transform_0, window_bounds = array<i64: 1, 1, 34, 128>}, {transform_indices = @transform_1, window_bounds = array<i64: 1, 1, 34, 128>}, {transform_indices = @transform_2, window_bounds = array<i64: 1, 1, 34, 128>}, {transform_indices = @transform_3, window_bounds = array<i64: 3, 3, 128, 128>}, {transform_indices = @transform_4, window_bounds = array<i64: 1, 1, 32, 128>}, {transform_indices = @transform_5, window_bounds = array<i64: 1, 1, 2, 128>}]} {
    %cst = arith.constant 0.000000e+00 : f32
    %0 = vector.broadcast %cst : f32 to vector<32x128xf32>
    %c0 = arith.constant 0 : index
    %c0_0 = arith.constant 0 : index
    %c0_1 = arith.constant 0 : index
    %c0_2 = arith.constant 0 : index
    %1 = vector.load %arg3[%c0, %c0_0, %c0_1, %c0_2] : memref<1x1x34x128xbf16, #tpu.memory_space<vmem>>, vector<1x1x34x128xbf16>
    %2 = vector.shape_cast %1 : vector<1x1x34x128xbf16> to vector<34x128xbf16>
    %3 = vector.extract_strided_slice %2 {offsets = [0, 0], sizes = [32, 128], strides = [1, 1]} : vector<34x128xbf16> to vector<32x128xbf16>
    %c0_3 = arith.constant 0 : index
    %c0_4 = arith.constant 0 : index
    %c0_5 = arith.constant 0 : index
    %c0_6 = arith.constant 0 : index
    %4 = vector.load %arg6[%c0_3, %c0_4, %c0_5, %c0_6] : memref<3x3x128x128xbf16, #tpu.memory_space<vmem>>, vector<1x1x128x128xbf16>
    %5 = vector.shape_cast %4 : vector<1x1x128x128xbf16> to vector<128x128xbf16>
    %cst_7 = arith.constant dense<0.000000e+00> : vector<32x128xf32>
    %6 = tpu.matmul %3, %5, %cst_7 {dimension_numbers = #tpu.dot_dimension_numbers<[1], [0], [0], [1], [0, 0, 1, 1], [], []>} : vector<32x128xbf16>, vector<128x128xbf16>, vector<32x128xf32> -> vector<32x128xf32>
    %7 = arith.addf %0, %6 : vector<32x128xf32>
    %8 = vector.extract_strided_slice %2 {offsets = [1, 0], sizes = [32, 128], strides = [1, 1]} : vector<34x128xbf16> to vector<32x128xbf16>
    %c0_8 = arith.constant 0 : index
    %c1 = arith.constant 1 : index
    %c0_9 = arith.constant 0 : index
    %c0_10 = arith.constant 0 : index
    %9 = vector.load %arg6[%c0_8, %c1, %c0_9, %c0_10] : memref<3x3x128x128xbf16, #tpu.memory_space<vmem>>, vector<1x1x128x128xbf16>
    %10 = vector.shape_cast %9 : vector<1x1x128x128xbf16> to vector<128x128xbf16>
    %cst_11 = arith.constant dense<0.000000e+00> : vector<32x128xf32>
    %11 = tpu.matmul %8, %10, %cst_11 {dimension_numbers = #tpu.dot_dimension_numbers<[1], [0], [0], [1], [0, 0, 1, 1], [], []>} : vector<32x128xbf16>, vector<128x128xbf16>, vector<32x128xf32> -> vector<32x128xf32>
    %12 = arith.addf %7, %11 : vector<32x128xf32>
    %13 = vector.extract_strided_slice %2 {offsets = [2, 0], sizes = [32, 128], strides = [1, 1]} : vector<34x128xbf16> to vector<32x128xbf16>
    %c0_12 = arith.constant 0 : index
    %c2 = arith.constant 2 : index
    %c0_13 = arith.constant 0 : index
    %c0_14 = arith.constant 0 : index
    %14 = vector.load %arg6[%c0_12, %c2, %c0_13, %c0_14] : memref<3x3x128x128xbf16, #tpu.memory_space<vmem>>, vector<1x1x128x128xbf16>
    %15 = vector.shape_cast %14 : vector<1x1x128x128xbf16> to vector<128x128xbf16>
    %cst_15 = arith.constant dense<0.000000e+00> : vector<32x128xf32>
    %16 = tpu.matmul %13, %15, %cst_15 {dimension_numbers = #tpu.dot_dimension_numbers<[1], [0], [0], [1], [0, 0, 1, 1], [], []>} : vector<32x128xbf16>, vector<128x128xbf16>, vector<32x128xf32> -> vector<32x128xf32>
    %17 = arith.addf %12, %16 : vector<32x128xf32>
    %c0_16 = arith.constant 0 : index
    %c0_17 = arith.constant 0 : index
    %c0_18 = arith.constant 0 : index
    %c0_19 = arith.constant 0 : index
    %18 = vector.load %arg4[%c0_16, %c0_17, %c0_18, %c0_19] : memref<1x1x34x128xbf16, #tpu.memory_space<vmem>>, vector<1x1x34x128xbf16>
    %19 = vector.shape_cast %18 : vector<1x1x34x128xbf16> to vector<34x128xbf16>
    %20 = vector.extract_strided_slice %19 {offsets = [0, 0], sizes = [32, 128], strides = [1, 1]} : vector<34x128xbf16> to vector<32x128xbf16>
    %c1_20 = arith.constant 1 : index
    %c0_21 = arith.constant 0 : index
    %c0_22 = arith.constant 0 : index
    %c0_23 = arith.constant 0 : index
    %21 = vector.load %arg6[%c1_20, %c0_21, %c0_22, %c0_23] : memref<3x3x128x128xbf16, #tpu.memory_space<vmem>>, vector<1x1x128x128xbf16>
    %22 = vector.shape_cast %21 : vector<1x1x128x128xbf16> to vector<128x128xbf16>
    %cst_24 = arith.constant dense<0.000000e+00> : vector<32x128xf32>
    %23 = tpu.matmul %20, %22, %cst_24 {dimension_numbers = #tpu.dot_dimension_numbers<[1], [0], [0], [1], [0, 0, 1, 1], [], []>} : vector<32x128xbf16>, vector<128x128xbf16>, vector<32x128xf32> -> vector<32x128xf32>
    %24 = arith.addf %17, %23 : vector<32x128xf32>
    %25 = vector.extract_strided_slice %19 {offsets = [1, 0], sizes = [32, 128], strides = [1, 1]} : vector<34x128xbf16> to vector<32x128xbf16>
    %c1_25 = arith.constant 1 : index
    %c1_26 = arith.constant 1 : index
    %c0_27 = arith.constant 0 : index
    %c0_28 = arith.constant 0 : index
    %26 = vector.load %arg6[%c1_25, %c1_26, %c0_27, %c0_28] : memref<3x3x128x128xbf16, #tpu.memory_space<vmem>>, vector<1x1x128x128xbf16>
    %27 = vector.shape_cast %26 : vector<1x1x128x128xbf16> to vector<128x128xbf16>
    %cst_29 = arith.constant dense<0.000000e+00> : vector<32x128xf32>
    %28 = tpu.matmul %25, %27, %cst_29 {dimension_numbers = #tpu.dot_dimension_numbers<[1], [0], [0], [1], [0, 0, 1, 1], [], []>} : vector<32x128xbf16>, vector<128x128xbf16>, vector<32x128xf32> -> vector<32x128xf32>
    %29 = arith.addf %24, %28 : vector<32x128xf32>
    %30 = vector.extract_strided_slice %19 {offsets = [2, 0], sizes = [32, 128], strides = [1, 1]} : vector<34x128xbf16> to vector<32x128xbf16>
    %c1_30 = arith.constant 1 : index
    %c2_31 = arith.constant 2 : index
    %c0_32 = arith.constant 0 : index
    %c0_33 = arith.constant 0 : index
    %31 = vector.load %arg6[%c1_30, %c2_31, %c0_32, %c0_33] : memref<3x3x128x128xbf16, #tpu.memory_space<vmem>>, vector<1x1x128x128xbf16>
    %32 = vector.shape_cast %31 : vector<1x1x128x128xbf16> to vector<128x128xbf16>
    %cst_34 = arith.constant dense<0.000000e+00> : vector<32x128xf32>
    %33 = tpu.matmul %30, %32, %cst_34 {dimension_numbers = #tpu.dot_dimension_numbers<[1], [0], [0], [1], [0, 0, 1, 1], [], []>} : vector<32x128xbf16>, vector<128x128xbf16>, vector<32x128xf32> -> vector<32x128xf32>
    %34 = arith.addf %29, %33 : vector<32x128xf32>
    %c0_35 = arith.constant 0 : index
    %c0_36 = arith.constant 0 : index
    %c0_37 = arith.constant 0 : index
    %c0_38 = arith.constant 0 : index
    %35 = vector.load %arg5[%c0_35, %c0_36, %c0_37, %c0_38] : memref<1x1x34x128xbf16, #tpu.memory_space<vmem>>, vector<1x1x34x128xbf16>
    %36 = vector.shape_cast %35 : vector<1x1x34x128xbf16> to vector<34x128xbf16>
    %37 = vector.extract_strided_slice %36 {offsets = [0, 0], sizes = [32, 128], strides = [1, 1]} : vector<34x128xbf16> to vector<32x128xbf16>
    %c2_39 = arith.constant 2 : index
    %c0_40 = arith.constant 0 : index
    %c0_41 = arith.constant 0 : index
    %c0_42 = arith.constant 0 : index
    %38 = vector.load %arg6[%c2_39, %c0_40, %c0_41, %c0_42] : memref<3x3x128x128xbf16, #tpu.memory_space<vmem>>, vector<1x1x128x128xbf16>
    %39 = vector.shape_cast %38 : vector<1x1x128x128xbf16> to vector<128x128xbf16>
    %cst_43 = arith.constant dense<0.000000e+00> : vector<32x128xf32>
    %40 = tpu.matmul %37, %39, %cst_43 {dimension_numbers = #tpu.dot_dimension_numbers<[1], [0], [0], [1], [0, 0, 1, 1], [], []>} : vector<32x128xbf16>, vector<128x128xbf16>, vector<32x128xf32> -> vector<32x128xf32>
    %41 = arith.addf %34, %40 : vector<32x128xf32>
    %42 = vector.extract_strided_slice %36 {offsets = [1, 0], sizes = [32, 128], strides = [1, 1]} : vector<34x128xbf16> to vector<32x128xbf16>
    %c2_44 = arith.constant 2 : index
    %c1_45 = arith.constant 1 : index
    %c0_46 = arith.constant 0 : index
    %c0_47 = arith.constant 0 : index
    %43 = vector.load %arg6[%c2_44, %c1_45, %c0_46, %c0_47] : memref<3x3x128x128xbf16, #tpu.memory_space<vmem>>, vector<1x1x128x128xbf16>
    %44 = vector.shape_cast %43 : vector<1x1x128x128xbf16> to vector<128x128xbf16>
    %cst_48 = arith.constant dense<0.000000e+00> : vector<32x128xf32>
    %45 = tpu.matmul %42, %44, %cst_48 {dimension_numbers = #tpu.dot_dimension_numbers<[1], [0], [0], [1], [0, 0, 1, 1], [], []>} : vector<32x128xbf16>, vector<128x128xbf16>, vector<32x128xf32> -> vector<32x128xf32>
    %46 = arith.addf %41, %45 : vector<32x128xf32>
    %47 = vector.extract_strided_slice %36 {offsets = [2, 0], sizes = [32, 128], strides = [1, 1]} : vector<34x128xbf16> to vector<32x128xbf16>
    %c2_49 = arith.constant 2 : index
    %c2_50 = arith.constant 2 : index
    %c0_51 = arith.constant 0 : index
    %c0_52 = arith.constant 0 : index
    %48 = vector.load %arg6[%c2_49, %c2_50, %c0_51, %c0_52] : memref<3x3x128x128xbf16, #tpu.memory_space<vmem>>, vector<1x1x128x128xbf16>
    %49 = vector.shape_cast %48 : vector<1x1x128x128xbf16> to vector<128x128xbf16>
    %cst_53 = arith.constant dense<0.000000e+00> : vector<32x128xf32>
    %50 = tpu.matmul %47, %49, %cst_53 {dimension_numbers = #tpu.dot_dimension_numbers<[1], [0], [0], [1], [0, 0, 1, 1], [], []>} : vector<32x128xbf16>, vector<128x128xbf16>, vector<32x128xf32> -> vector<32x128xf32>
    %51 = arith.addf %46, %50 : vector<32x128xf32>
    %52 = arith.truncf %51 : vector<32x128xf32> to vector<32x128xbf16>
    %c0_54 = arith.constant 0 : index
    %c0_55 = arith.constant 0 : index
    %c0_56 = arith.constant 0 : index
    %c0_57 = arith.constant 0 : index
    %53 = vector.load %arg7[%c0_54, %c0_55, %c0_56, %c0_57] : memref<1x1x32x128xbf16, #tpu.memory_space<vmem>>, vector<1x1x32x128xbf16>
    %54 = vector.shape_cast %53 : vector<1x1x32x128xbf16> to vector<32x128xbf16>
    %55 = vector.shape_cast %52 : vector<32x128xbf16> to vector<1x1x32x128xbf16>
    tpu.vector_store %arg7[%c0_54, %c0_55, %c0_56, %c0_57], %55 {strides = array<i32>} : memref<1x1x32x128xbf16, #tpu.memory_space<vmem>>, vector<1x1x32x128xbf16>,
    %cst_58 = arith.constant dense<0.000000e+00> : vector<128xf32>
    %56 = vector.multi_reduction <add>, %51, %cst_58 [0] : vector<32x128xf32> to vector<128xf32>
    %57 = vector.shape_cast %56 : vector<128xf32> to vector<1x128xf32>
    %c0_59 = arith.constant 0 : index
    %c0_60 = arith.constant 0 : index
    %c0_61 = arith.constant 0 : index
    %c0_62 = arith.constant 0 : index
    %58 = vector.load %arg8[%c0_59, %c0_60, %c0_61, %c0_62] : memref<1x1x2x128xf32, #tpu.memory_space<vmem>>, vector<1x1x1x128xf32>
    %59 = vector.shape_cast %58 : vector<1x1x1x128xf32> to vector<1x128xf32>
    %60 = vector.shape_cast %57 : vector<1x128xf32> to vector<1x1x1x128xf32>
    tpu.vector_store %arg8[%c0_59, %c0_60, %c0_61, %c0_62], %60 {strides = array<i32>} : memref<1x1x2x128xf32, #tpu.memory_space<vmem>>, vector<1x1x1x128xf32>,
    %61 = arith.mulf %51, %51 : vector<32x128xf32>
    %cst_63 = arith.constant dense<0.000000e+00> : vector<128xf32>
    %62 = vector.multi_reduction <add>, %61, %cst_63 [0] : vector<32x128xf32> to vector<128xf32>
    %63 = vector.shape_cast %62 : vector<128xf32> to vector<1x128xf32>
    %c0_64 = arith.constant 0 : index
    %c0_65 = arith.constant 0 : index
    %c1_66 = arith.constant 1 : index
    %c0_67 = arith.constant 0 : index
    %64 = vector.load %arg8[%c0_64, %c0_65, %c1_66, %c0_67] : memref<1x1x2x128xf32, #tpu.memory_space<vmem>>, vector<1x1x1x128xf32>
    %65 = vector.shape_cast %64 : vector<1x1x1x128xf32> to vector<1x128xf32>
    %66 = vector.shape_cast %63 : vector<1x128xf32> to vector<1x1x1x128xf32>
    tpu.vector_store %arg8[%c0_64, %c0_65, %c1_66, %c0_67], %66 {strides = array<i32>} : memref<1x1x2x128xf32, #tpu.memory_space<vmem>>, vector<1x1x1x128xf32>,
    return
  }
  func.func @transform_0(%arg0: i32, %arg1: i32, %arg2: i32) -> (i32, i32, i32, i32) {
    %c0_i32 = arith.constant 0 : i32
    %0 = arith.addi %arg2, %c0_i32 : i32
    %c0_i32_0 = arith.constant 0 : i32
    %c0_i32_1 = arith.constant 0 : i32
    %c0_i32_2 = arith.constant 0 : i32
    return %arg1, %0, %c0_i32_0, %c0_i32_1 : i32, i32, i32, i32
  }
  func.func @transform_1(%arg0: i32, %arg1: i32, %arg2: i32) -> (i32, i32, i32, i32) {
    %c1_i32 = arith.constant 1 : i32
    %0 = arith.addi %arg2, %c1_i32 : i32
    %c0_i32 = arith.constant 0 : i32
    %c0_i32_0 = arith.constant 0 : i32
    %c0_i32_1 = arith.constant 0 : i32
    return %arg1, %0, %c0_i32, %c0_i32_0 : i32, i32, i32, i32
  }
  func.func @transform_2(%arg0: i32, %arg1: i32, %arg2: i32) -> (i32, i32, i32, i32) {
    %c2_i32 = arith.constant 2 : i32
    %0 = arith.addi %arg2, %c2_i32 : i32
    %c0_i32 = arith.constant 0 : i32
    %c0_i32_0 = arith.constant 0 : i32
    %c0_i32_1 = arith.constant 0 : i32
    return %arg1, %0, %c0_i32, %c0_i32_0 : i32, i32, i32, i32
  }
  func.func @transform_3(%arg0: i32, %arg1: i32, %arg2: i32) -> (i32, i32, i32, i32) {
    %c0_i32 = arith.constant 0 : i32
    %c0_i32_0 = arith.constant 0 : i32
    %c0_i32_1 = arith.constant 0 : i32
    %c0_i32_2 = arith.constant 0 : i32
    return %c0_i32, %c0_i32_0, %c0_i32_1, %arg0 : i32, i32, i32, i32
  }
  func.func @transform_4(%arg0: i32, %arg1: i32, %arg2: i32) -> (i32, i32, i32, i32) {
    %c0_i32 = arith.constant 0 : i32
    %c0_i32_0 = arith.constant 0 : i32
    return %arg1, %arg2, %c0_i32, %arg0 : i32, i32, i32, i32
  }
  func.func @transform_5(%arg0: i32, %arg1: i32, %arg2: i32) -> (i32, i32, i32, i32) {
    %c0_i32 = arith.constant 0 : i32
    %c0_i32_0 = arith.constant 0 : i32
    return %arg1, %arg2, %c0_i32, %arg0 : i32, i32, i32, i32
  }
}

</mosaic_0001>

<bundles_post_ra>
// kernel: tile.8
= control target key start
LH: loop header
LB: loop body
LE: loop exit
PB: predicated region body
PF: predicated region fallthrough
CT: control target
= control target key end

     0   :  { %s22_s0 = inlined_call_operand.vmem [shape: f32[128], index: 0, kind: input, shape index: {}]   ;;  %s23_s1 = inlined_call_operand.vmem [shape: f32[2,128], index: 1, kind: output, shape index: {}]  }
   0x1   :  { %v4_v0 = vld [vmem:[%s22_s0] ss:$0 sm:$0xff] }
   0x2   :  { %5 = vst [vmem:[%s23_s1] sm:$0x3] %v4_v0 }

// kernel: decoder_block_forward.5
= control target key start
LH: loop header
LB: loop body
LE: loop exit
PB: predicated region body
PF: predicated region fallthrough
CT: control target
= control target key end

     0   :  { %s1324_s12 = smov 0   ;;  %s1326_s13 = smov 0   ;;  %s1571_s0 = inlined_call_operand.vmem [shape: bf16[2,16,16,256], index: 0, kind: input, shape index: {}]   ;;  %s1572_s1 = inlined_call_operand.vmem [shape: bf16[2,256,256], index: 1, kind: input, shape index: {}]   ;;  %s1573_s2 = inlined_call_operand.vmem [shape: f32[1,256], index: 2, kind: input, shape index: {}]   ;;  %s1574_s3 = inlined_call_operand.vmem [shape: bf16[2,16,2,16,256], index: 3, kind: output, shape index: {}]  }
   0x1   :  { %s1328_s14 = smov 0   ;;  %s1330_s15 = smov 0  }
   0x2   :  { %s1332_s16 = smov 0   ;;  %s1334_s17 = smov 0  }
   0x3   :  { %s1336_s18 = smov 0   ;;  %s1338_s19 = smov 0  }
   0x4   :  { %s1340_s20 = smov 0  }
   0x5 LB: > { %s25_s21 = sadd.s32 1, %s1290_s17  ;;  %s28_s22 = sadd.s32 1, %s1294_s18  ;;  %s1302_s20 = sphi %s1340_s20, %s13_s20   ;;  %s1298_s19 = sphi %s1338_s19, %s1583_s19   ;;  %s1294_s18 = sphi %s1336_s18, %s1582_s18   ;;  %s1290_s17 = sphi %s1334_s17, %s1581_s17   ;;  %s1286_s16 = sphi %s1332_s16, %s1580_s16   ;;  %s1282_s15 = sphi %s1330_s15, %s1579_s15   ;;  %s1278_s14 = sphi %s1328_s14, %s1578_s14   ;;  %s1274_s13 = sphi %s1326_s13, %s1577_s13   ;;  %s1270_s12 = sphi %s1324_s12, %s1576_s12  }
   0x6   : > { %p26_p0 = scmp.ge.s32.totalorder %s25_s21, 2  ;;  %s954_s23 = sadd.s32 4294967295, %s1302_s20  }
   0x7   : > { %s32_s24 = sadd.s32 1, %s1298_s19  ;;  %p128_p1 = scmp.ne.s32.totalorder %s1274_s13, %s1270_s12 }
   0x8   : > { %s1585_s21 = smov (%p26_p0, %s25_s21), 0  ;;  %s1587_s22 = smov (!%p26_p0, %s28_s22), %s1294_s18 }
   0x9   : > { %p30_p2 = scmp.ge.s32.totalorder %s1587_s22, 2  ;;  %p129_p3 = scmp.eq.s32.totalorder %s954_s23, 7 }
   0xa   : > { %p958_p4 = scmp.ge.s32.totalorder %s1302_s20, 1  ;;  %p178_p5 = scmp.lt.s32.totalorder %s1302_s20, 9 }
   0xb   : > { %s1589_s22 = smov (%p30_p2, %s1587_s22), 0  ;;  %s1591_s24 = smov (!%p30_p2, %s32_s24), %s1298_s19 }
   0xc   : > { %p1383_p6 = por %p129_p3, %p128_p1  ;;  %p34_p7 = scmp.ge.s32.totalorder %s1591_s24, 2 }
   0xd   : > { %p179_p8 = pnand %p958_p4, %p178_p5  ;;  %s112_s26 = ssub.s32 %s1294_s18, %s1589_s22 }
   0xe   : > { %s1593_s24 = smov (%p34_p7, %s1591_s24), 0  ;;  %s114_s27 = ssub.s32 %s1290_s17, %s1585_s21  ;;  %v278_v48 = vlaneseq (!%p179_p8)  ;;  %v276_v51 = vld [vmem:[%s1573_s2] sm:$0x3] (!%p179_p8) }
   0xf   : > { %s111_s28 = ssub.s32 %s1298_s19, %s1593_s24  ;;  %s118_s4 = sadd.s32 1, %s1274_s13 }
  0x10   : > { %s113_s29 = sor.u32 %s112_s26, %s111_s28  ;;  %182 = sbr.rel (%p179_p8) target bundleno = 345 (0x159), region = 32  ;;  %v279_v49 = vshrl.u32 (!%p179_p8), %v278_v48, 7 }
  0x11   : > { %s115_s30 = sor.u32 %s114_s27, %s113_s29  ;;  %p222_p10 = scmp.lt.s32.totalorder (!%p179_p8), %s1278_s14, 1 }
  0x12   : > { %p116_p9 = scmp.eq.s32.totalorder %s115_s30, 0  ;;  %s960_s11 = sshll.u32 (!%p179_p8), %s1282_s15, 3  ;;  %v280_v50 = vsub.s32 (!%p179_p8), 0, %v279_v49  ;;  %v284_v52 = vsub.s32 (!%p179_p8), 1, %v279_v49 }
  0x13   : > { %p212_p11 = scmp.lt.s32.totalorder (!%p179_p8), %s1286_s16, 1  ;;  %p214_p12 = scmp.lt.s32.totalorder (!%p179_p8), %s960_s11, 15 }
  0x14   : > { %s1397_s5 = scalar_select %p116_p9, %s1274_s13, %s118_s4  }
  0x15   : > { %v1465_v53 = vrot.slane (!%p179_p8), %v276_v51, %v280_v50  ;;  %s208_s9 = sand.u32 (!%p179_p8), 1, %s1270_s12   ;;  %v1468_v54 = vrot.slane (!%p179_p8), %v276_v51, %v284_v52 }
  0x17   : > { %s223_s6 = scalar_select %p222_p10, %s1278_s14, 1 }
  0x18   : > { %s213_s23 = scalar_select %p212_p11, %s1286_s16, 1 }
  0x19   : > { %s1038_s7 = sshll.u32 %s223_s6, 8  ;;  %s1595_s11 = smov (!%p214_p12, %s960_s11), 15 }
  0x1a   : > { %s1404_s10 = scalar_lea.vmem %s1572_s1, %s1038_s7  ;;  %s961_s26 = sshll.u32 %s1595_s11, 2 }
  0x1b   : > { %v1160_v0 = vld [vmem:[%s1404_s10 + $0x4] ss:$8 sps:$4 sm:$0xff]   ;;  %v1162_v1 = vld [vmem:[%s1404_s10] ss:$8 sps:$4 sm:$0xff]   ;;  %v1163_v2 = vld [vmem:[%s1404_s10 + $0x14] ss:$8 sps:$4 sm:$0xff]  }
  0x1c   : > { %528 = vmatprep.subr.bf16.mxu0 %v1160_v0  ;;  %1056 = vmatprep.subr.bf16.mxu1 %v1160_v0  ;;  %v1165_v3 = vld [vmem:[%s1404_s10 + $0x10] ss:$8 sps:$4 sm:$0xff]   ;;  %v1166_v4 = vld [vmem:[%s1404_s10 + $0x24] ss:$8 sps:$4 sm:$0xff]   ;;  %v1168_v5 = vld [vmem:[%s1404_s10 + $0x20] ss:$8 sps:$4 sm:$0xff]  }
  0x1d   : > { %529 = vmatpush1.bf16.msra.mxu0 %v1162_v1  ;;  %1072 = vmatpush1.bf16.msra.mxu1 %v1162_v1  ;;  %v1169_v6 = vld [vmem:[%s1404_s10 + $0x34] ss:$8 sps:$4 sm:$0xff]   ;;  %s962_s27 = sshll.u32 %s213_s23, 6  ;;  %v1171_v7 = vld [vmem:[%s1404_s10 + $0x30] ss:$8 sps:$4 sm:$0xff]   ;;  %s1032_s11 = sshll.u32 (%p1383_p6), %s1278_s14, 2 }
  0x1e   : > { %530 = vmatprep.subr.bf16.mxu0 %v1163_v2  ;;  %1057 = vmatprep.subr.bf16.mxu1 %v1163_v2  ;;  %v1172_v8 = vld [vmem:[%s1404_s10 + $0x44] ss:$8 sps:$4 sm:$0xff]   ;;  %s218_s28 = sadd.s32 %s962_s27, %s961_s26  ;;  %v1174_v9 = vld [vmem:[%s1404_s10 + $0x40] ss:$8 sps:$4 sm:$0xff]   ;;  %v1175_v10 = vld [vmem:[%s1404_s10 + $0x54] ss:$8 sps:$4 sm:$0xff]  }
  0x1f   : > { %s963_s29 = sshll.u32 %s218_s28, 2  ;;  %v1177_v11 = vld [vmem:[%s1404_s10 + $0x50] ss:$8 sps:$4 sm:$0xff]   ;;  %v1178_v12 = vld [vmem:[%s1404_s10 + $0x64] ss:$8 sps:$4 sm:$0xff]   ;;  %s1055_s23 = sshll.u32 (%p1383_p6), %s1282_s15, 6 }
  0x20   : > { %s1424_s6 = scalar_lea.vmem %s1571_s0, %s963_s29  ;;  %v1180_v14 = vld [vmem:[%s1404_s10 + $0x60] ss:$8 sps:$4 sm:$0xff]   ;;  %v1181_v16 = vld [vmem:[%s1404_s10 + $0x74] ss:$8 sps:$4 sm:$0xff]   ;;  %v1183_v17 = vld [vmem:[%s1404_s10 + $0x70] ss:$8 sps:$4 sm:$0xff]   ;;  %s763_s25 = sadd.s32 (%p1383_p6), %s1055_s23, %s1032_s11 }
  0x21   : > { %531 = vmatpush1.bf16.msra.mxu0 %v1165_v3  ;;  %1073 = vmatpush1.bf16.msra.mxu1 %v1165_v3  ;;  %v1210_v13 = vld [vmem:[%s1424_s6 + $0x4] ss:$8 sps:$4 sm:$0xff]   ;;  %v1186_v19 = vld [vmem:[%s1404_s10 + $0x80] ss:$8 sps:$4 sm:$0xff]   ;;  %v1187_v20 = vld [vmem:[%s1404_s10 + $0x94] ss:$8 sps:$4 sm:$0xff]  }
  0x22   : > { %532 = vmatprep.subr.bf16.mxu0 %v1166_v4  ;;  %1058 = vmatprep.subr.bf16.mxu1 %v1166_v4  ;;  %v1213_v15 = vld [vmem:[%s1424_s6 + $0x44] ss:$8 sps:$4 sm:$0xff]   ;;  %v1189_v21 = vld [vmem:[%s1404_s10 + $0x90] ss:$8 sps:$4 sm:$0xff]   ;;  %v1192_v23 = vld [vmem:[%s1404_s10 + $0xa0] ss:$8 sps:$4 sm:$0xff]  }
  0x23   : > { %560 = vmatprep.mubr.bf16.mxu0 %v1210_v13  ;;  %600 = vmatprep.mubr.bf16.mxu1 %v1213_v15  ;;  %v1184_v18 = vld [vmem:[%s1404_s10 + $0x84] ss:$8 sps:$4 sm:$0xff]   ;;  %v1193_v24 = vld [vmem:[%s1404_s10 + $0xb4] ss:$8 sps:$4 sm:$0xff]   ;;  %v1195_v25 = vld [vmem:[%s1404_s10 + $0xb0] ss:$8 sps:$4 sm:$0xff]  }
  0x24   : > { %v1190_v22 = vld [vmem:[%s1404_s10 + $0xa4] ss:$8 sps:$4 sm:$0xff]   ;;  %v1198_v27 = vld [vmem:[%s1404_s10 + $0xc0] ss:$8 sps:$4 sm:$0xff]   ;;  %v1199_v28 = vld [vmem:[%s1404_s10 + $0xd4] ss:$8 sps:$4 sm:$0xff]  }
  0x25   : > { %533 = vmatpush1.bf16.msra.mxu0 %v1168_v5  ;;  %1074 = vmatpush1.bf16.msra.mxu1 %v1168_v5  ;;  %v1196_v26 = vld [vmem:[%s1404_s10 + $0xc4] ss:$8 sps:$4 sm:$0xff]   ;;  %v1201_v29 = vld [vmem:[%s1404_s10 + $0xd0] ss:$8 sps:$4 sm:$0xff]   ;;  %v1204_v31 = vld [vmem:[%s1404_s10 + $0xe0] ss:$8 sps:$4 sm:$0xff]  }
  0x26   : > { %534 = vmatprep.subr.bf16.mxu0 %v1169_v6  ;;  %1059 = vmatprep.subr.bf16.mxu1 %v1169_v6  ;;  %v1202_v30 = vld [vmem:[%s1404_s10 + $0xe4] ss:$8 sps:$4 sm:$0xff]   ;;  %v1205_v32 = vld [vmem:[%s1404_s10 + $0xf4] ss:$8 sps:$4 sm:$0xff]   ;;  %v1207_v33 = vld [vmem:[%s1404_s10 + $0xf0] ss:$8 sps:$4 sm:$0xff]  }
  0x27   : > { %v1208_v34 = vld [vmem:[%s1424_s6] ss:$8 sps:$4 sm:$0xff]   ;;  %v1214_v36 = vld [vmem:[%s1424_s6 + $0x14] ss:$8 sps:$4 sm:$0xff]   ;;  %v1218_v38 = vld [vmem:[%s1424_s6 + $0x10] ss:$8 sps:$4 sm:$0xff]  }
  0x28   : > { %v1211_v35 = vld [vmem:[%s1424_s6 + $0x40] ss:$8 sps:$4 sm:$0xff]   ;;  %v1216_v37 = vld [vmem:[%s1424_s6 + $0x54] ss:$8 sps:$4 sm:$0xff]   ;;  %v1219_v39 = vld [vmem:[%s1424_s6 + $0x50] ss:$8 sps:$4 sm:$0xff]  }
  0x29   : > { %535 = vmatpush1.bf16.msra.mxu0 %v1171_v7  ;;  %1075 = vmatpush1.bf16.msra.mxu1 %v1171_v7  ;;  %v1220_v40 = vld [vmem:[%s1424_s6 + $0x24] ss:$8 sps:$4 sm:$0xff]   ;;  %v1224_v42 = vld [vmem:[%s1424_s6 + $0x20] ss:$8 sps:$4 sm:$0xff]   ;;  %v1226_v44 = vld [vmem:[%s1424_s6 + $0x34] ss:$8 sps:$4 sm:$0xff]  }
  0x2a   : > { %536 = vmatprep.subr.bf16.mxu0 %v1172_v8  ;;  %1060 = vmatprep.subr.bf16.mxu1 %v1172_v8  ;;  %v1222_v41 = vld [vmem:[%s1424_s6 + $0x64] ss:$8 sps:$4 sm:$0xff]   ;;  %v1225_v43 = vld [vmem:[%s1424_s6 + $0x60] ss:$8 sps:$4 sm:$0xff]   ;;  %v1228_v45 = vld [vmem:[%s1424_s6 + $0x74] ss:$8 sps:$4 sm:$0xff]  }
  0x2b   : > { %v1230_v46 = vld [vmem:[%s1424_s6 + $0x30] ss:$8 sps:$4 sm:$0xff]   ;;  %s959_s10 = sshll.u32 %s208_s9, 7  ;;  %s1034_s26 = sshll.u32 (%p1383_p6), %s1286_s16, 7 }
  0x2c   : > { %v1231_v47 = vld [vmem:[%s1424_s6 + $0x70] ss:$8 sps:$4 sm:$0xff]   ;;  %s1478_s12 = scalar_lea.vmem [#allocation2], %s959_s10  ;;  %s765_s27 = sadd.s32 (%p1383_p6), %s1034_s26, %s763_s25 }
  0x2d   : > { %537 = vmatpush1.bf16.msra.mxu0 %v1174_v9  ;;  %1076 = vmatpush1.bf16.msra.mxu1 %v1174_v9  ;;  %s1035_s28 = sshll.u32 (%p1383_p6), %s765_s27, 2 }
  0x2e   : > { %538 = vmatprep.subr.bf16.mxu0 %v1175_v10  ;;  %1061 = vmatprep.subr.bf16.mxu1 %v1175_v10  ;;  %s767_s29 = scalar_lea.vmem (%p1383_p6), %s1574_s3, %s1035_s28 }
  0x31   : > { %539 = vmatpush1.bf16.msra.mxu0 %v1177_v11  ;;  %1077 = vmatpush1.bf16.msra.mxu1 %v1177_v11 }
  0x32   : > { %540 = vmatprep.subr.bf16.mxu0 %v1178_v12  ;;  %1062 = vmatprep.subr.bf16.mxu1 %v1178_v12 }
  0x35   : > { %541 = vmatpush1.bf16.msra.mxu0 %v1180_v14  ;;  %1078 = vmatpush1.bf16.msra.mxu1 %v1180_v14 }
  0x36   : > { %542 = vmatprep.subr.bf16.mxu0 %v1181_v16  ;;  %1063 = vmatprep.subr.bf16.mxu1 %v1181_v16 }
  0x39   : > { %543 = vmatpush1.bf16.msra.mxu0 %v1183_v17  ;;  %1079 = vmatpush1.bf16.msra.mxu1 %v1183_v17 }
  0x3a   : > { %544 = vmatprep.subr.bf16.mxu0 %v1184_v18  ;;  %1064 = vmatprep.subr.bf16.mxu1 %v1184_v18 }
  0x3d   : > { %545 = vmatpush1.bf16.msra.mxu0 %v1186_v19  ;;  %1080 = vmatpush1.bf16.msra.mxu1 %v1186_v19 }
  0x3e   : > { %546 = vmatprep.subr.bf16.mxu0 %v1187_v20  ;;  %1065 = vmatprep.subr.bf16.mxu1 %v1187_v20 }
  0x41   : > { %547 = vmatpush1.bf16.msra.mxu0 %v1189_v21  ;;  %1081 = vmatpush1.bf16.msra.mxu1 %v1189_v21 }
  0x42   : > { %548 = vmatprep.subr.bf16.mxu0 %v1190_v22  ;;  %1066 = vmatprep.subr.bf16.mxu1 %v1190_v22 }
  0x45   : > { %549 = vmatpush1.bf16.msra.mxu0 %v1192_v23  ;;  %1082 = vmatpush1.bf16.msra.mxu1 %v1192_v23 }
  0x46   : > { %550 = vmatprep.subr.bf16.mxu0 %v1193_v24  ;;  %1067 = vmatprep.subr.bf16.mxu1 %v1193_v24 }
  0x49   : > { %551 = vmatpush1.bf16.msra.mxu0 %v1195_v25  ;;  %1083 = vmatpush1.bf16.msra.mxu1 %v1195_v25 }
  0x4a   : > { %552 = vmatprep.subr.bf16.mxu0 %v1196_v26  ;;  %1068 = vmatprep.subr.bf16.mxu1 %v1196_v26 }
  0x4d   : > { %553 = vmatpush1.bf16.msra.mxu0 %v1198_v27  ;;  %1084 = vmatpush1.bf16.msra.mxu1 %v1198_v27 }
  0x4e   : > { %554 = vmatprep.subr.bf16.mxu0 %v1199_v28  ;;  %1069 = vmatprep.subr.bf16.mxu1 %v1199_v28 }
  0x51   : > { %555 = vmatpush1.bf16.msra.mxu0 %v1201_v29  ;;  %1085 = vmatpush1.bf16.msra.mxu1 %v1201_v29 }
  0x52   : > { %556 = vmatprep.subr.bf16.mxu0 %v1202_v30  ;;  %1070 = vmatprep.subr.bf16.mxu1 %v1202_v30 }
  0x55   : > { %557 = vmatpush1.bf16.msra.mxu0 %v1204_v31  ;;  %1086 = vmatpush1.bf16.msra.mxu1 %v1204_v31 }
  0x56   : > { %558 = vmatprep.subr.bf16.mxu0 %v1205_v32  ;;  %1071 = vmatprep.subr.bf16.mxu1 %v1205_v32 }
  0x59   : > { %559 = vmatpush1.bf16.msra.mxu0 %v1207_v33  ;;  %1087 = vmatpush1.bf16.msra.mxu1 %v1207_v33 }
  0x5c   : > { %561 = vmatmul.mubr.bf16.vlgmr.msra.gmra.mrb[0].mxu0 %v1208_v34  ;;  %601 = vmatmul.mubr.bf16.vlgmr.msra.gmra.mrb[0].mxu1 %v1211_v35 }
  0x5d   : > { %570 = vmatprep.mubr.bf16.mxu0 %v1214_v36  ;;  %610 = vmatprep.mubr.bf16.mxu1 %v1216_v37 }
  0x64   : > { %571 = vmatmul.mubr.bf16.gmra.mrb[4].mxu0 %v1218_v38  ;;  %611 = vmatmul.mubr.bf16.gmra.mrb[4].mxu1 %v1219_v39 }
  0x65   : > { %580 = vmatprep.mubr.bf16.mxu0 %v1220_v40  ;;  %620 = vmatprep.mubr.bf16.mxu1 %v1222_v41 }
  0x6c   : > { %581 = vmatmul.mubr.bf16.gmra.mrb[8].mxu0 %v1224_v42  ;;  %621 = vmatmul.mubr.bf16.gmra.mrb[8].mxu1 %v1225_v43 }
  0x6d   : > { %590 = vmatprep.mubr.bf16.mxu0 %v1226_v44  ;;  %630 = vmatprep.mubr.bf16.mxu1 %v1228_v45 }
  0x74   : > { %591 = vmatmul.mubr.bf16.gmra.mrb[12].mxu0 %v1230_v46  ;;  %631 = vmatmul.mubr.bf16.gmra.mrb[12].mxu1 %v1231_v47 }
 0x12f   : > { %v562_v55 = vpop.f32.mrb[0].mxu0  ;;  %v602_v56 = vpop.f32.mrb[0].mxu1 }
 0x130   : > { %v563_v57 = vadd.f32 %v562_v55, %v1465_v53  ;;  %v603_v58 = vadd.f32 %v602_v56, %v1465_v53  ;;  %v564_v59 = vpop.f32.mrb[1].mxu0  ;;  %v604_v60 = vpop.f32.mrb[1].mxu1 }
 0x131   : > { %v565_v61 = vadd.f32 %v564_v59, %v1468_v54  ;;  %v605_v62 = vadd.f32 %v604_v60, %v1468_v54  ;;  %v566_v63 = vpop.f32.mrb[2].mxu0  ;;  %v606_v0 = vpop.f32.mrb[2].mxu1 }
 0x132   : > { %v567_v1 = vadd.f32 %v566_v63, %v1465_v53  ;;  %v607_v2 = vadd.f32 %v606_v0, %v1465_v53  ;;  %v568_v3 = vpop.f32.mrb[3].mxu0  ;;  %v608_v4 = vpop.f32.mrb[3].mxu1 }
 0x133   : > { %v1039_v5 = vpack.c.bf16 %v565_v61, %v563_v57  ;;  %v1047_v6 = vpack.c.bf16 %v605_v62, %v603_v58  ;;  %v569_v7 = vadd.f32 %v568_v3, %v1468_v54  ;;  %v609_v8 = vadd.f32 %v608_v4, %v1468_v54 }
 0x135   : > { %737 = vst [vmem:[%s1478_s12] sm:$0xff] %v1039_v5  ;;  %745 = vst [vmem:[%s1478_s12 + $0x40] sm:$0xff] %v1047_v6  ;;  %v1040_v9 = vpack.c.bf16 %v569_v7, %v567_v1  ;;  %v1048_v10 = vpack.c.bf16 %v609_v8, %v607_v2 }
 0x137   : > { %738 = vst [vmem:[%s1478_s12 + $0x8] sm:$0xff] %v1040_v9  ;;  %746 = vst [vmem:[%s1478_s12 + $0x48] sm:$0xff] %v1048_v10  ;;  %v572_v11 = vpop.f32.mrb[4].mxu0  ;;  %v612_v12 = vpop.f32.mrb[4].mxu1 }
 0x138   : > { %v573_v13 = vadd.f32 %v572_v11, %v1465_v53  ;;  %v613_v14 = vadd.f32 %v612_v12, %v1465_v53  ;;  %v574_v15 = vpop.f32.mrb[5].mxu0  ;;  %v614_v16 = vpop.f32.mrb[5].mxu1 }
 0x139   : > { %v575_v17 = vadd.f32 %v574_v15, %v1468_v54  ;;  %v615_v18 = vadd.f32 %v614_v16, %v1468_v54  ;;  %v576_v19 = vpop.f32.mrb[6].mxu0  ;;  %v616_v20 = vpop.f32.mrb[6].mxu1 }
 0x13a   : > { %v577_v21 = vadd.f32 %v576_v19, %v1465_v53  ;;  %v617_v22 = vadd.f32 %v616_v20, %v1465_v53  ;;  %v578_v23 = vpop.f32.mrb[7].mxu0  ;;  %v618_v24 = vpop.f32.mrb[7].mxu1 }
 0x13b   : > { %v1041_v25 = vpack.c.bf16 %v575_v17, %v573_v13  ;;  %v1049_v26 = vpack.c.bf16 %v615_v18, %v613_v14  ;;  %v579_v27 = vadd.f32 %v578_v23, %v1468_v54  ;;  %v619_v28 = vadd.f32 %v618_v24, %v1468_v54 }
 0x13c   : > { %v841_v15 = vld [vmem:[%s1478_s12 + $0x40] sm:$0xff] (%p1383_p6) }
 0x13d   : > { %739 = vst [vmem:[%s1478_s12 + $0x10] sm:$0xff] %v1041_v25  ;;  %747 = vst [vmem:[%s1478_s12 + $0x50] sm:$0xff] %v1049_v26  ;;  %v1042_v29 = vpack.c.bf16 %v579_v27, %v577_v21  ;;  %v1050_v30 = vpack.c.bf16 %v619_v28, %v617_v22 }
 0x13e   : > { %v843_v16 = vld [vmem:[%s1478_s12 + $0x48] sm:$0xff] (%p1383_p6)  ;;  %842 = vst [vmem:[%s767_s29 + $0x80] sm:$0xff] (%p1383_p6), %v841_v15 }
 0x13f   : > { %740 = vst [vmem:[%s1478_s12 + $0x18] sm:$0xff] %v1042_v29  ;;  %748 = vst [vmem:[%s1478_s12 + $0x58] sm:$0xff] %v1050_v30  ;;  %v582_v31 = vpop.f32.mrb[8].mxu0  ;;  %v622_v32 = vpop.f32.mrb[8].mxu1 }
 0x140   : > { %v583_v33 = vadd.f32 %v582_v31, %v1465_v53  ;;  %v623_v34 = vadd.f32 %v622_v32, %v1465_v53  ;;  %v584_v35 = vpop.f32.mrb[9].mxu0  ;;  %v624_v36 = vpop.f32.mrb[9].mxu1  ;;  %844 = vst [vmem:[%s767_s29 + $0x88] sm:$0xff] (%p1383_p6), %v843_v16 }
 0x141   : > { %v585_v37 = vadd.f32 %v584_v35, %v1468_v54  ;;  %v625_v38 = vadd.f32 %v624_v36, %v1468_v54  ;;  %v586_v39 = vpop.f32.mrb[10].mxu0  ;;  %v626_v40 = vpop.f32.mrb[10].mxu1 }
 0x142   : > { %v587_v41 = vadd.f32 %v586_v39, %v1465_v53  ;;  %v627_v42 = vadd.f32 %v626_v40, %v1465_v53  ;;  %v588_v43 = vpop.f32.mrb[11].mxu0  ;;  %v628_v44 = vpop.f32.mrb[11].mxu1 }
 0x143   : > { %v1043_v45 = vpack.c.bf16 %v585_v37, %v583_v33  ;;  %v1051_v46 = vpack.c.bf16 %v625_v38, %v623_v34  ;;  %v589_v47 = vadd.f32 %v588_v43, %v1468_v54  ;;  %v629_v48 = vadd.f32 %v628_v44, %v1468_v54 }
 0x144   : > { %v829_v9 = vld [vmem:[%s1478_s12 + $0x10] sm:$0xff] (%p1383_p6) }
 0x145   : > { %741 = vst [vmem:[%s1478_s12 + $0x20] sm:$0xff] %v1043_v45  ;;  %749 = vst [vmem:[%s1478_s12 + $0x60] sm:$0xff] %v1051_v46  ;;  %v1044_v49 = vpack.c.bf16 %v589_v47, %v587_v41  ;;  %v1052_v50 = vpack.c.bf16 %v629_v48, %v627_v42  ;;  %v845_v17 = vld [vmem:[%s1478_s12 + $0x50] sm:$0xff] (%p1383_p6) }
 0x146   : > { %v831_v10 = vld [vmem:[%s1478_s12 + $0x18] sm:$0xff] (%p1383_p6)  ;;  %830 = vst [vmem:[%s767_s29 + $0x20] sm:$0xff] (%p1383_p6), %v829_v9  ;;  %846 = vst [vmem:[%s767_s29 + $0xa0] sm:$0xff] (%p1383_p6), %v845_v17 }
 0x147   : > { %742 = vst [vmem:[%s1478_s12 + $0x28] sm:$0xff] %v1044_v49  ;;  %750 = vst [vmem:[%s1478_s12 + $0x68] sm:$0xff] %v1052_v50  ;;  %v592_v51 = vpop.f32.mrb[12].mxu0  ;;  %v632_v52 = vpop.f32.mrb[12].mxu1  ;;  %v847_v18 = vld [vmem:[%s1478_s12 + $0x58] sm:$0xff] (%p1383_p6) }
 0x148   : > { %v593_v55 = vadd.f32 %v592_v51, %v1465_v53  ;;  %v633_v56 = vadd.f32 %v632_v52, %v1465_v53  ;;  %v594_v57 = vpop.f32.mrb[13].mxu0  ;;  %v634_v58 = vpop.f32.mrb[13].mxu1  ;;  %832 = vst [vmem:[%s767_s29 + $0x28] sm:$0xff] (%p1383_p6), %v831_v10  ;;  %848 = vst [vmem:[%s767_s29 + $0xa8] sm:$0xff] (%p1383_p6), %v847_v18 }
 0x149   : > { %v595_v59 = vadd.f32 %v594_v57, %v1468_v54  ;;  %v635_v60 = vadd.f32 %v634_v58, %v1468_v54  ;;  %v596_v61 = vpop.f32.mrb[14].mxu0  ;;  %v636_v62 = vpop.f32.mrb[14].mxu1  ;;  %759 = sbr.rel (!%p1383_p6) target bundleno = 345 (0x159), region = 36 }
 0x14a   : > { %v597_v63 = vadd.f32 %v596_v61, %v1465_v53  ;;  %v637_v0 = vadd.f32 %v636_v62, %v1465_v53  ;;  %v598_v1 = vpop.f32.mrb[15].mxu0  ;;  %v638_v2 = vpop.f32.mrb[15].mxu1  ;;  %v825_v53 = vld [vmem:[%s1478_s12] sm:$0xff] (%p1383_p6) }
 0x14b   : > { %v1045_v3 = vpack.c.bf16 %v595_v59, %v593_v55  ;;  %v1053_v4 = vpack.c.bf16 %v635_v60, %v633_v56  ;;  %v599_v5 = vadd.f32 %v598_v1, %v1468_v54  ;;  %v639_v6 = vadd.f32 %v638_v2, %v1468_v54  ;;  %v827_v54 = vld [vmem:[%s1478_s12 + $0x8] sm:$0xff] (%p1383_p6)  ;;  %826 = vst [vmem:[%s767_s29] sm:$0xff] (%p1383_p6), %v825_v53 }
 0x14c   : > { %v833_v11 = vld [vmem:[%s1478_s12 + $0x20] sm:$0xff] (%p1383_p6)  ;;  %828 = vst [vmem:[%s767_s29 + $0x8] sm:$0xff] (%p1383_p6), %v827_v54 }
 0x14d   : > { %743 = vst [vmem:[%s1478_s12 + $0x30] sm:$0xff] %v1045_v3  ;;  %751 = vst [vmem:[%s1478_s12 + $0x70] sm:$0xff] %v1053_v4  ;;  %v1046_v7 = vpack.c.bf16 %v599_v5, %v597_v63  ;;  %v1054_v8 = vpack.c.bf16 %v639_v6, %v637_v0  ;;  %v849_v19 = vld [vmem:[%s1478_s12 + $0x60] sm:$0xff] (%p1383_p6) }
 0x14e   : > { %v835_v12 = vld [vmem:[%s1478_s12 + $0x28] sm:$0xff] (%p1383_p6)  ;;  %834 = vst [vmem:[%s767_s29 + $0x40] sm:$0xff] (%p1383_p6), %v833_v11  ;;  %850 = vst [vmem:[%s767_s29 + $0xc0] sm:$0xff] (%p1383_p6), %v849_v19 }
 0x14f   : > { %744 = vst [vmem:[%s1478_s12 + $0x38] sm:$0xff] %v1046_v7  ;;  %752 = vst [vmem:[%s1478_s12 + $0x78] sm:$0xff] %v1054_v8  ;;  %v851_v20 = vld [vmem:[%s1478_s12 + $0x68] sm:$0xff] (%p1383_p6) }
 0x150   : > { %836 = vst [vmem:[%s767_s29 + $0x48] sm:$0xff] %v835_v12  ;;  %852 = vst [vmem:[%s767_s29 + $0xc8] sm:$0xff] %v851_v20 }
 0x154   : > { %v837_v13 = vld [vmem:[%s1478_s12 + $0x30] sm:$0xff] }
 0x155   : > { %v853_v21 = vld [vmem:[%s1478_s12 + $0x70] sm:$0xff]  ;;  %838 = vst [vmem:[%s767_s29 + $0x60] sm:$0xff] %v837_v13 }
 0x156   : > { %v839_v14 = vld [vmem:[%s1478_s12 + $0x38] sm:$0xff]  ;;  %854 = vst [vmem:[%s767_s29 + $0xe0] sm:$0xff] %v853_v21 }
 0x157   : > { %840 = vst [vmem:[%s767_s29 + $0x68] sm:$0xff] %v839_v14  ;;  %v855_v22 = vld [vmem:[%s1478_s12 + $0x78] sm:$0xff] }
 0x158   : > { %856 = vst [vmem:[%s767_s29 + $0xe8] sm:$0xff] %v855_v22 }
 0x159 PF: > { %s13_s20 = sadd.s32 1, %s1302_s20   ;;  %s1576_s12 = smov %s1274_s13 }
 0x15a   : > { %p10_p13 = scmp.ge.s32.totalorder %s13_s20, 10   ;;  %s1577_s13 = smov %s1397_s5 }
 0x15b   : > { %s1578_s14 = smov %s1290_s17  ;;  %s1579_s15 = smov %s1294_s18 }
 0x15c   : > { %s1580_s16 = smov %s1298_s19  ;;  %s1581_s17 = smov %s1585_s21 }
 0x15d   : > { %s1582_s18 = smov %s1589_s22  ;;  %s1583_s19 = smov %s1593_s24 }
 0x15e   :  { %12 = sbr.rel (!%p10_p13) target bundleno = 5 (0x5), region = 103 }

// kernel: decoder_block_forward.7
= control target key start
LH: loop header
LB: loop body
LE: loop exit
PB: predicated region body
PF: predicated region fallthrough
CT: control target
= control target key end

     0   :  { %s1046_s15 = smov 0   ;;  %s1048_s16 = smov 0   ;;  %s1303_s0 = inlined_call_operand.vmem [shape: bf16[2,32,32,128], index: 0, kind: input, shape index: {}]   ;;  %s1304_s1 = inlined_call_operand.vmem [shape: f32[2,128], index: 1, kind: input, shape index: {}]   ;;  %s1305_s2 = inlined_call_operand.vmem [shape: f32[1,128], index: 2, kind: input, shape index: {}]   ;;  %s1306_s3 = inlined_call_operand.vmem [shape: f32[1,128], index: 3, kind: input, shape index: {}]   ;;  %s1307_s4 = inlined_call_operand.vmem [shape: bf16[2,32,32,128], index: 4, kind: output, shape index: {}]  }
   0x1   :  { %s1050_s17 = smov 0   ;;  %s1052_s18 = smov 0  }
   0x2   :  { %s1054_s19 = smov 0  }
   0x3 LB: > { %s23_s20 = sadd.s32 1, %s1011_s17  ;;  %s26_s21 = sadd.s32 1, %s1015_s18  ;;  %s1019_s19 = sphi %s1054_s19, %s14_s19   ;;  %s1015_s18 = sphi %s1052_s18, %s1311_s18   ;;  %s1011_s17 = sphi %s1050_s17, %s1310_s17   ;;  %s1007_s16 = sphi %s1048_s16, %s1309_s16   ;;  %s1003_s15 = sphi %s1046_s15, %s1308_s15  }
   0x4   : > { %p24_p0 = scmp.ge.s32.totalorder %s23_s20, 4  ;;  %p690_p1 = scmp.ge.s32.totalorder %s1019_s19, 1 }
   0x5   : > { %p184_p2 = scmp.lt.s32.totalorder %s1019_s19, 9 }
   0x6   : > { %s1313_s20 = smov (%p24_p0, %s23_s20), 0  ;;  %s1315_s21 = smov (!%p24_p0, %s26_s21), %s1015_s18 }
   0x7   : > { %p185_p3 = pnand %p690_p1, %p184_p2  ;;  %p28_p4 = scmp.ge.s32.totalorder %s1315_s21, 2 }
   0x8   : > { %s691_s22 = sshll.u32 (!%p185_p3), %s1003_s15, 3  ;;  %p221_p5 = scmp.lt.s32.totalorder (!%p185_p3), %s1007_s16, 1  ;;  %v242_v0 = vld [vmem:[%s1304_s1] sm:$0x1] (!%p185_p3)  ;;  %v244_v1 = vld [vmem:[%s1304_s1 + $0x1] sm:$0x1] (!%p185_p3)  ;;  %v320_v7 = vlaneseq (!%p185_p3) }
   0x9   : > { %s1317_s21 = smov (%p28_p4, %s1315_s21), 0  ;;  %188 = sbr.rel (%p185_p3) target bundleno = 67 (0x43), region = 36 }
   0xa   : > { %p223_p6 = scmp.lt.s32.totalorder (!%p185_p3), %s691_s22, 31  ;;  %v243_v2 = vmul.f32 (!%p185_p3), 0.00048828125, %v242_v0  ;;  %v245_v3 = vmul.f32 (!%p185_p3), 0.00048828125, %v244_v1  ;;  %v1092_v8 = vshrl.u32 (!%p185_p3), %v320_v7, 7  ;;  %v248_v27 = vld [vmem:[%s1305_s2] sm:$0x1] (!%p185_p3) }
   0xb   : > { %v252_v51 = vld [vmem:[%s1306_s3] sm:$0x1] (!%p185_p3) }
   0xc   : > { %v246_v4 = vmul.f32 (!%p185_p3), %v243_v2, %v243_v2  ;;  %v322_v17 = vsub.s32 (!%p185_p3), 0, %v1092_v8 }
   0xe   : > { %v247_v5 = vsub.f32 (!%p185_p3), %v245_v3, %v246_v4 }
  0x10   : > { %s1319_s16 = smov (!%p221_p5, %s1007_s16), 1  ;;  %s1321_s22 = smov (!%p223_p6, %s691_s22), 31  ;;  %v249_v6 = vadd.f32 1e-05, %v247_v5 }
  0x11   : > { %s693_s27 = sshll.u32 %s1319_s16, 7  ;;  %s692_s28 = sshll.u32 %s1321_s22, 2 }
  0x12   : > { %s1082_s29 = sadd.s32 %s693_s27, %s692_s28  ;;  %979 = vrsqrt.f32 %v249_v6 }
  0x13   : > { %s694_s30 = sshll.u32 %s1082_s29, 2 }
  0x14   : > { %s1090_s7 = scalar_lea.vmem %s1303_s0, %s694_s30  ;;  %s1192_s14 = scalar_lea.vmem %s1307_s4, %s694_s30 }
  0x15   : > { %v766_v9 = vld [vmem:[%s1090_s7] sm:$0xff]   ;;  %v909_v10 = vld [vmem:[%s1090_s7 + $0x8] sm:$0xff]   ;;  %v910_v11 = vld [vmem:[%s1090_s7 + $0x10] sm:$0xff]  }
  0x16   : > { %v911_v12 = vld [vmem:[%s1090_s7 + $0x18] sm:$0xff]   ;;  %v1099_v13 = vld [vmem:[%s1090_s7 + $0x20] sm:$0xff]   ;;  %v1102_v14 = vld [vmem:[%s1090_s7 + $0x28] sm:$0xff]   ;;  %v767_v15 = vunpack.c.l.bf16 %v766_v9  ;;  %v768_v16 = vunpack.c.h.bf16 %v766_v9  ;;  %v771_v18 = vunpack.c.l.bf16 %v909_v10  ;;  %v772_v21 = vunpack.c.h.bf16 %v909_v10 }
  0x17   : > { %v914_v19 = vld [vmem:[%s1090_s7 + $0x30] sm:$0xff]   ;;  %v1107_v20 = vld [vmem:[%s1090_s7 + $0x38] sm:$0xff]   ;;  %v775_v22 = vunpack.c.l.bf16 %v910_v11  ;;  %v776_v23 = vunpack.c.h.bf16 %v910_v11  ;;  %v779_v24 = vunpack.c.l.bf16 %v911_v12  ;;  %v1110_v25 = vld [vmem:[%s1090_s7 + $0x40] sm:$0xff]   ;;  %v780_v28 = vunpack.c.h.bf16 %v911_v12 }
  0x18   : > { %v1113_v26 = vld [vmem:[%s1090_s7 + $0x48] sm:$0xff]   ;;  %v783_v29 = vunpack.c.l.bf16 %v1099_v13  ;;  %v784_v30 = vunpack.c.h.bf16 %v1099_v13  ;;  %v787_v31 = vunpack.c.l.bf16 %v1102_v14  ;;  %v1122_v32 = vld [vmem:[%s1090_s7 + $0x50] sm:$0xff]   ;;  %v788_v33 = vunpack.c.h.bf16 %v1102_v14  ;;  %v1127_v37 = vld [vmem:[%s1090_s7 + $0x58] sm:$0xff]  }
  0x19   : > { %v791_v34 = vunpack.c.l.bf16 %v914_v19  ;;  %v792_v35 = vunpack.c.h.bf16 %v914_v19  ;;  %v795_v36 = vunpack.c.l.bf16 %v1107_v20  ;;  %v1130_v38 = vld [vmem:[%s1090_s7 + $0x60] sm:$0xff]   ;;  %v796_v40 = vunpack.c.h.bf16 %v1107_v20  ;;  %v1137_v44 = vld [vmem:[%s1090_s7 + $0x68] sm:$0xff]   ;;  %v1143_v49 = vld [vmem:[%s1090_s7 + $0x70] sm:$0xff]  }
  0x1a   : > { %v799_v41 = vunpack.c.l.bf16 %v1110_v25  ;;  %v800_v42 = vunpack.c.h.bf16 %v1110_v25  ;;  %v803_v43 = vunpack.c.l.bf16 %v1113_v26  ;;  %v804_v46 = vunpack.c.h.bf16 %v1113_v26  ;;  %v1146_v50 = vld [vmem:[%s1090_s7 + $0x78] sm:$0xff]  }
  0x1b   : > { %v807_v47 = vunpack.c.l.bf16 %v1122_v32  ;;  %v808_v48 = vunpack.c.h.bf16 %v1122_v32  ;;  %v811_v52 = vunpack.c.l.bf16 %v1127_v37  ;;  %v812_v53 = vunpack.c.h.bf16 %v1127_v37 }
  0x1c   : > { %v980_v39 = vpop.eup %979  ;;  %v815_v54 = vunpack.c.l.bf16 %v1130_v38  ;;  %v816_v55 = vunpack.c.h.bf16 %v1130_v38  ;;  %v819_v58 = vunpack.c.l.bf16 %v1137_v44  ;;  %v820_v59 = vunpack.c.h.bf16 %v1137_v44 }
  0x1d   : > { %v251_v45 = vmul.f32 %v980_v39, %v248_v27  ;;  %v823_v60 = vunpack.c.l.bf16 %v1143_v49  ;;  %v824_v61 = vunpack.c.h.bf16 %v1143_v49  ;;  %v827_v62 = vunpack.c.l.bf16 %v1146_v50 }
  0x1e   : > { %v828_v63 = vunpack.c.h.bf16 %v1146_v50 }
  0x1f   : > { %v253_v56 = vmul.f32 %v251_v45, %v243_v2  ;;  %v1155_v57 = vrot.slane %v251_v45, %v322_v17 }
  0x21   : > { %v254_v0 = vsub.f32 %v252_v51, %v253_v56  ;;  %v325_v1 = vmul.f32 %v767_v15, %v1155_v57  ;;  %v326_v3 = vmul.f32 %v768_v16, %v1155_v57  ;;  %v327_v2 = vmul.f32 %v771_v18, %v1155_v57 }
  0x22   : > { %v328_v4 = vmul.f32 %v772_v21, %v1155_v57  ;;  %v329_v5 = vmul.f32 %v775_v22, %v1155_v57  ;;  %v330_v6 = vmul.f32 %v776_v23, %v1155_v57  ;;  %v331_v7 = vmul.f32 %v779_v24, %v1155_v57 }
  0x23   : > { %v1170_v8 = vrot.slane %v254_v0, %v322_v17  ;;  %v332_v9 = vmul.f32 %v780_v28, %v1155_v57  ;;  %v333_v10 = vmul.f32 %v783_v29, %v1155_v57  ;;  %v334_v11 = vmul.f32 %v784_v30, %v1155_v57 }
  0x24   : > { %v335_v12 = vmul.f32 %v787_v31, %v1155_v57  ;;  %v336_v13 = vmul.f32 %v788_v33, %v1155_v57  ;;  %v337_v14 = vmul.f32 %v791_v34, %v1155_v57  ;;  %v338_v15 = vmul.f32 %v792_v35, %v1155_v57 }
  0x25   : > { %v363_v16 = vadd.f32 %v1170_v8, %v325_v1  ;;  %v364_v17 = vadd.f32 %v1170_v8, %v326_v3  ;;  %v365_v18 = vadd.f32 %v1170_v8, %v327_v2  ;;  %v366_v19 = vadd.f32 %v1170_v8, %v328_v4 }
  0x26   : > { %v367_v21 = vadd.f32 %v1170_v8, %v329_v5  ;;  %v368_v22 = vadd.f32 %v1170_v8, %v330_v6  ;;  %v369_v23 = vadd.f32 %v1170_v8, %v331_v7  ;;  %v370_v24 = vadd.f32 %v1170_v8, %v332_v9 }
  0x27   : > { %v395_v27 = vmax.f32 %v363_v16, 0.0  ;;  %v396_v28 = vmax.f32 %v364_v17, 0.0  ;;  %v397_v29 = vmax.f32 %v365_v18, 0.0  ;;  %v398_v30 = vmax.f32 %v366_v19, 0.0 }
  0x28   : > { %v399_v31 = vmax.f32 %v367_v21, 0.0  ;;  %v400_v33 = vmax.f32 %v368_v22, 0.0  ;;  %v401_v34 = vmax.f32 %v369_v23, 0.0  ;;  %v402_v35 = vmax.f32 %v370_v24, 0.0 }
  0x29   : > { %v832_v39 = vpack.c.bf16 %v396_v28, %v395_v27  ;;  %v837_v45 = vpack.c.bf16 %v398_v30, %v397_v29  ;;  %v371_v51 = vadd.f32 %v1170_v8, %v333_v10  ;;  %v372_v56 = vadd.f32 %v1170_v8, %v334_v11 }
  0x2a   : > { %v842_v0 = vpack.c.bf16 %v400_v33, %v399_v31  ;;  %v847_v1 = vpack.c.bf16 %v402_v35, %v401_v34  ;;  %v373_v3 = vadd.f32 %v1170_v8, %v335_v12  ;;  %v374_v2 = vadd.f32 %v1170_v8, %v336_v13 }
  0x2b   : > { %833 = vst [vmem:[%s1192_s14] sm:$0xff] %v832_v39   ;;  %924 = vst [vmem:[%s1192_s14 + $0x8] sm:$0xff] %v837_v45   ;;  %v403_v4 = vmax.f32 %v371_v51, 0.0  ;;  %v404_v5 = vmax.f32 %v372_v56, 0.0  ;;  %v375_v6 = vadd.f32 %v1170_v8, %v337_v14  ;;  %v376_v7 = vadd.f32 %v1170_v8, %v338_v15 }
  0x2c   : > { %925 = vst [vmem:[%s1192_s14 + $0x10] sm:$0xff] %v842_v0   ;;  %926 = vst [vmem:[%s1192_s14 + $0x18] sm:$0xff] %v847_v1   ;;  %v405_v9 = vmax.f32 %v373_v3, 0.0  ;;  %v406_v10 = vmax.f32 %v374_v2, 0.0  ;;  %v339_v11 = vmul.f32 %v795_v36, %v1155_v57  ;;  %v340_v12 = vmul.f32 %v796_v40, %v1155_v57 }
  0x2d   : > { %v852_v13 = vpack.c.bf16 %v404_v5, %v403_v4  ;;  %v407_v16 = vmax.f32 %v375_v6, 0.0  ;;  %v408_v17 = vmax.f32 %v376_v7, 0.0  ;;  %v341_v14 = vmul.f32 %v799_v41, %v1155_v57 }
  0x2e   : > { %v857_v15 = vpack.c.bf16 %v406_v10, %v405_v9  ;;  %v377_v18 = vadd.f32 %v1170_v8, %v339_v11  ;;  %v378_v19 = vadd.f32 %v1170_v8, %v340_v12  ;;  %v342_v36 = vmul.f32 %v800_v42, %v1155_v57 }
  0x2f   : > { %927 = vst [vmem:[%s1192_s14 + $0x20] sm:$0xff] %v852_v13   ;;  %v862_v20 = vpack.c.bf16 %v408_v17, %v407_v16  ;;  %v379_v40 = vadd.f32 %v1170_v8, %v341_v14  ;;  %v343_v21 = vmul.f32 %v803_v43, %v1155_v57  ;;  %v344_v41 = vmul.f32 %v804_v46, %v1155_v57 }
  0x30   : > { %928 = vst [vmem:[%s1192_s14 + $0x28] sm:$0xff] %v857_v15   ;;  %v409_v22 = vmax.f32 %v377_v18, 0.0  ;;  %v410_v23 = vmax.f32 %v378_v19, 0.0  ;;  %v380_v24 = vadd.f32 %v1170_v8, %v342_v36  ;;  %v345_v25 = vmul.f32 %v807_v47, %v1155_v57 }
  0x31   : > { %929 = vst [vmem:[%s1192_s14 + $0x30] sm:$0xff] %v862_v20   ;;  %v411_v42 = vmax.f32 %v379_v40, 0.0  ;;  %v381_v27 = vadd.f32 %v1170_v8, %v343_v21  ;;  %v382_v43 = vadd.f32 %v1170_v8, %v344_v41  ;;  %v346_v26 = vmul.f32 %v808_v48, %v1155_v57 }
  0x32   : > { %v867_v46 = vpack.c.bf16 %v410_v23, %v409_v22  ;;  %v412_v28 = vmax.f32 %v380_v24, 0.0  ;;  %v383_v29 = vadd.f32 %v1170_v8, %v345_v25  ;;  %v347_v30 = vmul.f32 %v811_v52, %v1155_v57 }
  0x33   : > { %v413_v47 = vmax.f32 %v381_v27, 0.0  ;;  %v414_v31 = vmax.f32 %v382_v43, 0.0  ;;  %v384_v33 = vadd.f32 %v1170_v8, %v346_v26  ;;  %v348_v34 = vmul.f32 %v812_v53, %v1155_v57 }
  0x34   : > { %930 = vst [vmem:[%s1192_s14 + $0x38] sm:$0xff] %v867_v46   ;;  %v872_v32 = vpack.c.bf16 %v412_v28, %v411_v42  ;;  %v415_v48 = vmax.f32 %v383_v29, 0.0  ;;  %v385_v35 = vadd.f32 %v1170_v8, %v347_v30  ;;  %v349_v39 = vmul.f32 %v815_v54, %v1155_v57 }
  0x35   : > { %v877_v45 = vpack.c.bf16 %v414_v31, %v413_v47  ;;  %v416_v52 = vmax.f32 %v384_v33, 0.0  ;;  %v386_v51 = vadd.f32 %v1170_v8, %v348_v34  ;;  %v350_v37 = vmul.f32 %v816_v55, %v1155_v57 }
  0x36   : > { %931 = vst [vmem:[%s1192_s14 + $0x40] sm:$0xff] %v872_v32   ;;  %v417_v53 = vmax.f32 %v385_v35, 0.0  ;;  %v387_v56 = vadd.f32 %v1170_v8, %v349_v39  ;;  %v351_v0 = vmul.f32 %v819_v58, %v1155_v57  ;;  %v352_v54 = vmul.f32 %v820_v59, %v1155_v57 }
  0x37   : > { %932 = vst [vmem:[%s1192_s14 + $0x48] sm:$0xff] %v877_v45   ;;  %v882_v1 = vpack.c.bf16 %v416_v52, %v415_v48  ;;  %v418_v3 = vmax.f32 %v386_v51, 0.0  ;;  %v388_v38 = vadd.f32 %v1170_v8, %v350_v37  ;;  %v353_v55 = vmul.f32 %v823_v60, %v1155_v57 }
  0x38   : > { %v419_v2 = vmax.f32 %v387_v56, 0.0  ;;  %v389_v4 = vadd.f32 %v1170_v8, %v351_v0  ;;  %v390_v5 = vadd.f32 %v1170_v8, %v352_v54  ;;  %v354_v44 = vmul.f32 %v824_v61, %v1155_v57 }
  0x39   : > { %933 = vst [vmem:[%s1192_s14 + $0x50] sm:$0xff] %v882_v1   ;;  %v887_v58 = vpack.c.bf16 %v418_v3, %v417_v53  ;;  %v420_v59 = vmax.f32 %v388_v38, 0.0  ;;  %v391_v6 = vadd.f32 %v1170_v8, %v353_v55  ;;  %v355_v60 = vmul.f32 %v827_v62, %v1155_v57 }
  0x3a   : > { %v421_v7 = vmax.f32 %v389_v4, 0.0  ;;  %v422_v9 = vmax.f32 %v390_v5, 0.0  ;;  %v392_v10 = vadd.f32 %v1170_v8, %v354_v44  ;;  %v356_v49 = vmul.f32 %v828_v63, %v1155_v57 }
  0x3b   : > { %934 = vst [vmem:[%s1192_s14 + $0x58] sm:$0xff] %v887_v58   ;;  %v892_v61 = vpack.c.bf16 %v420_v59, %v419_v2  ;;  %v423_v11 = vmax.f32 %v391_v6, 0.0  ;;  %v393_v12 = vadd.f32 %v1170_v8, %v355_v60 }
  0x3c   : > { %v897_v13 = vpack.c.bf16 %v422_v9, %v421_v7  ;;  %v424_v16 = vmax.f32 %v392_v10, 0.0  ;;  %v394_v17 = vadd.f32 %v1170_v8, %v356_v49 }
  0x3d   : > { %935 = vst [vmem:[%s1192_s14 + $0x60] sm:$0xff] %v892_v61   ;;  %v425_v62 = vmax.f32 %v393_v12, 0.0 }
  0x3e   : > { %936 = vst [vmem:[%s1192_s14 + $0x68] sm:$0xff] %v897_v13   ;;  %v902_v14 = vpack.c.bf16 %v424_v16, %v423_v11  ;;  %v426_v15 = vmax.f32 %v394_v17, 0.0 }
  0x40   : > { %937 = vst [vmem:[%s1192_s14 + $0x70] sm:$0xff] %v902_v14   ;;  %v907_v18 = vpack.c.bf16 %v426_v15, %v425_v62 }
  0x42   : > { %938 = vst [vmem:[%s1192_s14 + $0x78] sm:$0xff] %v907_v18  }
  0x43 PF: > { %s14_s19 = sadd.s32 1, %s1019_s19   ;;  %s1308_s15 = smov %s1011_s17 }
  0x44   : > { %p11_p7 = scmp.ge.s32.totalorder %s14_s19, 10   ;;  %s1309_s16 = smov %s1015_s18 }
  0x45   : > { %s1310_s17 = smov %s1313_s20  ;;  %s1311_s18 = smov %s1317_s21 }
  0x46   :  { %13 = sbr.rel (!%p11_p7) target bundleno = 3 (0x3), region = 66 }

// kernel: decoder_block_forward.6
= control target key start
LH: loop header
LB: loop body
LE: loop exit
PB: predicated region body
PF: predicated region fallthrough
CT: control target
= control target key end

     0   :  { %s4762_s30 = smov 0   ;;  %s4764_s10 = smov 0   ;;  %s5442_s0 = inlined_call_operand.vmem [shape: bf16[2,34,34,128], index: 0, kind: input, shape index: {}, may-alias: {0,1,2}]   ;;  %s5443_s1 = inlined_call_operand.vmem [shape: bf16[2,34,34,128], index: 1, kind: input, shape index: {}, may-alias: {0,1,2}]   ;;  %s5444_s2 = inlined_call_operand.vmem [shape: bf16[2,34,34,128], index: 2, kind: input, shape index: {}, may-alias: {0,1,2}]   ;;  %s5445_s3 = inlined_call_operand.vmem [shape: bf16[2,34,34,128], index: 3, kind: input, shape index: {}, may-alias: {3,4,5}]   ;;  %s5446_s4 = inlined_call_operand.vmem [shape: bf16[2,34,34,128], index: 4, kind: input, shape index: {}, may-alias: {3,4,5}]   ;;  %s5447_s5 = inlined_call_operand.vmem [shape: bf16[2,34,34,128], index: 5, kind: input, shape index: {}, may-alias: {3,4,5}]   ;;  %s5448_s6 = inlined_call_operand.vmem [shape: bf16[3,3,128,128], index: 6, kind: input, shape index: {}]   ;;  %s5449_s7 = inlined_call_operand.vmem [shape: bf16[3,3,128,128], index: 7, kind: input, shape index: {}]   ;;  %s5450_s8 = inlined_call_operand.vmem [shape: bf16[2,32,32,128], index: 8, kind: output, shape index: {0}]   ;;  %s5451_s9 = inlined_call_operand.vmem [shape: f32[2,32,2,128], index: 9, kind: output, shape index: {1}]  }
   0x1   :  { %s4766_s11 = smov 0   ;;  %s4768_s12 = smov 0  }
   0x2   :  { %s4770_s13 = smov 0  }
   0x3 LB: > { %s32_s14 = sadd.s32 1, %s4702_s11  ;;  %s35_s15 = sadd.s32 1, %s4706_s12  ;;  %s4710_s13 = sphi %s4770_s13, %s20_s13   ;;  %s4706_s12 = sphi %s4768_s12, %s5455_s12   ;;  %s4702_s11 = sphi %s4766_s11, %s5454_s11   ;;  %s4698_s10 = sphi %s4764_s10, %s5453_s10   ;;  %s4694_s30 = sphi %s4762_s30, %s5452_s30  }
   0x4   : > { %p33_p0 = scmp.ge.s32.totalorder %s32_s14, 32  ;;  %p3407_p1 = scmp.ge.s32.totalorder %s4710_s13, 1 }
   0x5   : > { %p437_p2 = scmp.lt.s32.totalorder %s4710_s13, 65 }
   0x6   : > { %s5457_s14 = smov (%p33_p0, %s32_s14), 0  ;;  %s5459_s15 = smov (!%p33_p0, %s35_s15), %s4706_s12 }
   0x7   : > { %p438_p3 = pnand %p3407_p1, %p437_p2  ;;  %p37_p4 = scmp.ge.s32.totalorder %s5459_s15, 2 }
   0x8   : > { %v4510_v0 = vld [vmem:[%s5448_s6 + $0x40] sm:$0xff] (!%p438_p3)   ;;  %p552_p5 = scmp.lt.s32.totalorder (!%p438_p3), %s4698_s10, 1  ;;  %p554_p6 = scmp.lt.s32.totalorder (!%p438_p3), %s4694_s30, 33  ;;  %v4512_v2 = vld [vmem:[%s5448_s6 + $0x48] sm:$0xff] (!%p438_p3)   ;;  %v4514_v4 = vld [vmem:[%s5448_s6 + $0x50] sm:$0xff] (!%p438_p3)   ;;  %vm933_vm1 = vcmask (!%p438_p3), 1046528  }
   0x9   : > { %s5461_s15 = smov (%p37_p4, %s5459_s15), 0  ;;  %441 = sbr.rel (%p438_p3) target bundleno = 537 (0x219), region = 52 }
   0xa   : > { %v4511_v1 = vld [vmem:[%s5449_s7] sm:$0xff] (!%p438_p3)   ;;  %4038 = vmatprep.subr.bf16.mxu1 (!%p438_p3), %v4510_v0  ;;  %v4513_v3 = vld [vmem:[%s5449_s7 + $0x8] sm:$0xff] (!%p438_p3)   ;;  %v4515_v5 = vld [vmem:[%s5449_s7 + $0x10] sm:$0xff] (!%p438_p3)   ;;  %vm697_vm0 = vsmask.f32 (!%p438_p3), 7424  ;;  %s561_s17 = sadd.s32 (!%p438_p3), 1, %s4694_s30 }
   0xb   : > { %4218 = vmatprep.subr.bf16.mxu0 (!%p438_p3), %v4511_v1  ;;  %4039 = vmatpush3.bf16.msra.mxu1 (!%p438_p3), %v4510_v0  ;;  %v4516_v6 = vld [vmem:[%s5448_s6 + $0x58] sm:$0xff] (!%p438_p3)   ;;  %v4518_v8 = vld [vmem:[%s5448_s6 + $0x60] sm:$0xff] (!%p438_p3)   ;;  %v4520_v10 = vld [vmem:[%s5448_s6 + $0x68] sm:$0xff] (!%p438_p3)   ;;  %p564_p7 = scmp.lt.s32.totalorder (!%p438_p3), %s561_s17, 33  ;;  %s572_s21 = sadd.s32 (!%p438_p3), 2, %s4694_s30 }
   0xc   : > { %4219 = vmatpush3.bf16.msra.mxu0 (!%p438_p3), %v4511_v1  ;;  %4040 = vmatprep.subr.bf16.mxu1 (!%p438_p3), %v4512_v2  ;;  %v4517_v7 = vld [vmem:[%s5449_s7 + $0x18] sm:$0xff] (!%p438_p3)   ;;  %v4519_v9 = vld [vmem:[%s5449_s7 + $0x20] sm:$0xff] (!%p438_p3)   ;;  %v4521_v11 = vld [vmem:[%s5449_s7 + $0x28] sm:$0xff] (!%p438_p3)   ;;  %p575_p8 = scmp.lt.s32.totalorder (!%p438_p3), %s572_s21, 33  ;;  %p624_p9 = scmp.lt.s32.totalorder (!%p438_p3), %s4694_s30, 31 }
   0xd   : > { %4220 = vmatprep.subr.bf16.mxu0 (!%p438_p3), %v4513_v3  ;;  %v4522_v14 = vld [vmem:[%s5448_s6 + $0x70] sm:$0xff] (!%p438_p3)   ;;  %v4524_v25 = vld [vmem:[%s5448_s6 + $0x78] sm:$0xff] (!%p438_p3)   ;;  %v4528_v34 = vld [vmem:[%s5448_s6] sm:$0xff] (!%p438_p3)  }
   0xe   : > { %v4523_v15 = vld [vmem:[%s5449_s7 + $0x30] sm:$0xff] (!%p438_p3)   ;;  %v4525_v27 = vld [vmem:[%s5449_s7 + $0x38] sm:$0xff] (!%p438_p3)   ;;  %v4530_v36 = vld [vmem:[%s5449_s7 + $0x40] sm:$0xff] (!%p438_p3)  }
   0xf   : > { %4041 = vmatpush3.bf16.msra.mxu1 (!%p438_p3), %v4512_v2  ;;  %v4533_v41 = vld [vmem:[%s5448_s6 + $0x8] sm:$0xff] (!%p438_p3)   ;;  %v4535_v44 = vld [vmem:[%s5448_s6 + $0x10] sm:$0xff] (!%p438_p3)   ;;  %v4537_v46 = vld [vmem:[%s5448_s6 + $0x18] sm:$0xff] (!%p438_p3)  }
  0x10   : > { %s5463_s10 = smov (!%p552_p5, %s4698_s10), 1  ;;  %4221 = vmatpush3.bf16.msra.mxu0 %v4513_v3  ;;  %4042 = vmatprep.subr.bf16.mxu1 %v4514_v4  ;;  %v4534_v42 = vld [vmem:[%s5449_s7 + $0x48] sm:$0xff]   ;;  %v4536_v45 = vld [vmem:[%s5449_s7 + $0x50] sm:$0xff]   ;;  %v4538_v47 = vld [vmem:[%s5449_s7 + $0x58] sm:$0xff]   ;;  %s5465_s17 = smov (!%p564_p7, %s561_s17), 33 }
  0x11   : > { %s555_s24 = scalar_select %p554_p6, %s4694_s30, 33  ;;  %4222 = vmatprep.subr.bf16.mxu0 %v4515_v5  ;;  %v4539_v48 = vld [vmem:[%s5448_s6 + $0x20] sm:$0xff]   ;;  %v4541_v50 = vld [vmem:[%s5448_s6 + $0x28] sm:$0xff]   ;;  %v4543_v53 = vld [vmem:[%s5448_s6 + $0x30] sm:$0xff]  }
  0x12   : > { %s4814_s27 = smul.u32 170, %s5463_s10  ;;  %v4540_v49 = vld [vmem:[%s5449_s7 + $0x60] sm:$0xff]   ;;  %v4542_v51 = vld [vmem:[%s5449_s7 + $0x68] sm:$0xff]   ;;  %v4544_v54 = vld [vmem:[%s5449_s7 + $0x70] sm:$0xff]   ;;  %s5467_s21 = smov (!%p575_p8, %s572_s21), 33 }
  0x13   : > { %s4466_s16 = smul.u32 5, %s555_s24  ;;  %4043 = vmatpush3.bf16.msra.mxu1 %v4514_v4  ;;  %v4545_v56 = vld [vmem:[%s5448_s6 + $0x38] sm:$0xff]   ;;  %v4547_v59 = vld [vmem:[%s5448_s6 + $0x80] sm:$0xff]   ;;  %v4550_v4 = vld [vmem:[%s5448_s6 + $0x88] sm:$0xff]   ;;  %s5469_s30 = smov (!%p624_p9, %s4694_s30), 31 }
  0x14   : > { %4223 = vmatpush3.bf16.msra.mxu0 %v4515_v5  ;;  %4044 = vmatprep.subr.bf16.mxu1 %v4516_v6  ;;  %v4546_v58 = vld [vmem:[%s5449_s7 + $0x78] sm:$0xff]   ;;  %v4548_v62 = vld [vmem:[%s5449_s7 + $0x80] sm:$0xff]   ;;  %v4551_v5 = vld [vmem:[%s5449_s7 + $0x88] sm:$0xff]   ;;  %s4469_s24 = smul.u32 5, %s5467_s21 }
  0x15   : > { %s558_s19 = sadd.s32 %s4814_s27, %s4466_s16  ;;  %4224 = vmatprep.subr.bf16.mxu0 %v4517_v7 }
  0x16   : > { %s3408_s22 = sshll.u32 %s558_s19, 2  ;;  %s579_s16 = sadd.s32 %s4469_s24, %s4814_s27 }
  0x17   : > { %s560_s18 = scalar_lea.vmem %s5442_s0, %s3408_s22  ;;  %4045 = vmatpush3.bf16.msra.mxu1 %v4516_v6  ;;  %s4844_s25 = scalar_lea.vmem %s5445_s3, %s3408_s22 }
  0x18   : > { %4225 = vmatpush3.bf16.msra.mxu0 %v4517_v7  ;;  %4046 = vmatprep.subr.bf16.mxu1 %v4518_v8  ;;  %v4846_v12 = vld [vmem:[%s560_s18] sm:$0xff]   ;;  %v4848_v13 = vld [vmem:[%s560_s18 + $0x8] sm:$0xff]   ;;  %v4863_v22 = vld [vmem:[%s560_s18 + $0x10] ss:$0 sps:$4 sm:$0x11]   ;;  %s4468_s22 = smul.u32 5, %s5465_s17 }
  0x19   : > { %4226 = vmatprep.subr.bf16.mxu0 %v4519_v9  ;;  %v699_v16 = vshrl.u32 %v4846_v12, 16  ;;  %v701_v17 = vshll.u32 %v4846_v12, 16  ;;  %v706_v18 = vshll.u32 %v4848_v13, 16  ;;  %v4860_v19 = vld [vmem:[%s4844_s25] sm:$0xff]   ;;  %v710_v23 = vshrl.u32 %v4848_v13, 16  ;;  %v4875_v29 = vld [vmem:[%s4844_s25 + $0x8] sm:$0xff]  }
  0x1a   : > { %4234 = vmatprep.mubr.bf16.mxu0 %v4860_v19  ;;  %v714_v26 = vshll.u32 %v4863_v22, 16  ;;  %v2003_v30 = vshrl.u32 %v4860_v19, 16  ;;  %v2005_v33 = vshll.u32 %v4860_v19, 16  ;;  %v2010_v35 = vshll.u32 %v4875_v29, 16  ;;  %s568_s17 = sadd.s32 %s4468_s22, %s4814_s27  ;;  %s3410_s28 = sshll.u32 %s579_s16, 2 }
  0x1b   : > { %4047 = vmatpush3.bf16.msra.mxu1 %v4518_v8  ;;  %v703_v20 = vrot.slane %v701_v17, 1  ;;  %v708_v21 = vrot.slane %v706_v18, 1  ;;  %v4922_v52 = vld [vmem:[%s4844_s25 + $0x10] ss:$0 sps:$4 sm:$0x11]   ;;  %v2014_v55 = vshrl.u32 %v4875_v29, 16  ;;  %s5089_s29 = scalar_lea.vmem %s5444_s2, %s3410_s28  ;;  %s5098_s21 = scalar_lea.vmem %s5447_s5, %s3410_s28 }
  0x1c   : > { %4227 = vmatpush3.bf16.msra.mxu0 %v4519_v9  ;;  %4048 = vmatprep.subr.bf16.mxu1 %v4520_v10  ;;  %v716_v32 = vrot.slane %v714_v26, 1  ;;  %v2007_v37 = vrot.slane %v2005_v33, 1  ;;  %v2012_v40 = vrot.slane %v2010_v35, 1  ;;  %v2018_v57 = vshll.u32 %v4922_v52, 16  ;;  %s3409_s26 = sshll.u32 %s568_s17, 2  ;;  %v4552_v8 = vld [vmem:[%s5448_s6 + $0x90] sm:$0xff]  }
  0x1d   : > { %4228 = vmatprep.subr.bf16.mxu0 %v4521_v11  ;;  %v704_v24 = vor.u32 %v703_v20, %v699_v16  ;;  %v712_v31 = vor.u32 %v710_v23, %v708_v21  ;;  %v934_v63 = vrot.slane %v4846_v12, 1  ;;  %v935_v0 = vrot.slane %v4848_v13, 1  ;;  %v4553_v9 = vld [vmem:[%s5449_s7 + $0x90] sm:$0xff]   ;;  %s4972_s20 = scalar_lea.vmem %s5443_s1, %s3409_s26  ;;  %s4977_s23 = scalar_lea.vmem %s5446_s4, %s3409_s26  ;;  %v4559_v16 = vld [vmem:[%s5449_s7 + $0xa8] sm:$0xff]   ;;  %v4563_v20 = vld [vmem:[%s5449_s7 + $0xb8] sm:$0xff]  }
  0x1e   : > { %v2008_v39 = vor.u32 %v2007_v37, %v2003_v30  ;;  %v2016_v60 = vor.u32 %v2014_v55, %v2012_v40  ;;  %v2020_v61 = vrot.slane %v2018_v57, 1  ;;  %v2142_v1 = vrot.slane %v4860_v19, 1  ;;  %v4560_v17 = vld [vmem:[%s5448_s6 + $0xb0] sm:$0xff]   ;;  %v4562_v19 = vld [vmem:[%s5448_s6 + $0xb8] sm:$0xff]   ;;  %v4564_v23 = vld [vmem:[%s5448_s6 + $0xc0] sm:$0xff]   ;;  %s3414_s18 = sshll.u32 %s5469_s30, 2 }
  0x1f   : > { %4049 = vmatpush3.bf16.msra.mxu1 %v4520_v10  ;;  %v709_v28 = vsel %vm697_vm0, %v704_v24, %v708_v21  ;;  %v717_v38 = vsel %vm697_vm0, %v712_v31, %v716_v32  ;;  %v2143_v2 = vrot.slane %v4875_v29, 1  ;;  %v936_v6 = vsel %vm933_vm1, %v934_v63, %v935_v0  ;;  %v4554_v10 = vld [vmem:[%s5448_s6 + $0x98] sm:$0xff]   ;;  %v4561_v18 = vld [vmem:[%s5449_s7 + $0xb0] sm:$0xff]   ;;  %v4566_v26 = vld [vmem:[%s5448_s6 + $0xc8] sm:$0xff]   ;;  %s3415_s17 = sshll.u32 %s5463_s10, 7 }
  0x20   : > { %4229 = vmatpush3.bf16.msra.mxu0 %v4521_v11  ;;  %4050 = vmatprep.subr.bf16.mxu1 %v4522_v14  ;;  %v2013_v43 = vsel %vm697_vm0, %v2008_v39, %v2012_v40  ;;  %v2021_v3 = vsel %vm697_vm0, %v2016_v60, %v2020_v61  ;;  %v4555_v11 = vld [vmem:[%s5449_s7 + $0x98] sm:$0xff]   ;;  %v937_v21 = vrot.slane %v4863_v22, 1  ;;  %v2145_v24 = vrot.slane %v4922_v52, 1  ;;  %v5030_v30 = vld [vmem:[%s4972_s20] sm:$0xff]   ;;  %v4575_v37 = vld [vmem:[%s5449_s7 + $0xe8] sm:$0xff]   ;;  %s631_s25 = sadd.s32 %s3415_s17, %s3414_s18 }
  0x21   : > { %4230 = vmatprep.subr.bf16.mxu0 %v4523_v15  ;;  %4054 = vmatprep.mubr.bf16.mxu1 %v709_v28  ;;  %v2144_v7 = vsel %vm933_vm1, %v2142_v1, %v2143_v2  ;;  %v5033_v31 = vld [vmem:[%s4977_s23] sm:$0xff]   ;;  %v4570_v32 = vld [vmem:[%s5448_s6 + $0xd8] sm:$0xff]   ;;  %v4577_v39 = vld [vmem:[%s5449_s7 + $0xf0] sm:$0xff]   ;;  %s3416_s27 = sshll.u32 %s631_s25, 2 }
  0x22   : > { %v938_v22 = vsel %vm933_vm1, %v935_v0, %v937_v21  ;;  %v2146_v28 = vsel %vm933_vm1, %v2143_v2, %v2145_v24  ;;  %v4571_v33 = vld [vmem:[%s5449_s7 + $0xd8] sm:$0xff]   ;;  %v4573_v35 = vld [vmem:[%s5449_s7 + $0xe0] sm:$0xff]   ;;  %v4589_v63 = vld [vmem:[%s5449_s7 + $0x110] sm:$0xff]   ;;  %v1337_v24 = vrot.slane %v5030_v30, 1 }
  0x23   : > { %4051 = vmatpush3.bf16.msra.mxu1 %v4522_v14  ;;  %v4557_v14 = vld [vmem:[%s5449_s7 + $0xa0] sm:$0xff]   ;;  %v4578_v40 = vld [vmem:[%s5448_s6 + $0xf8] sm:$0xff]  }
  0x24   : > { %4231 = vmatpush3.bf16.msra.mxu0 %v4523_v15  ;;  %4052 = vmatprep.subr.bf16.mxu1 %v4524_v25  ;;  %v4558_v15 = vld [vmem:[%s5448_s6 + $0xa8] sm:$0xff]   ;;  %v4581_v52 = vld [vmem:[%s5448_s6 + $0x100] sm:$0xff]   ;;  %v4590_v0 = vld [vmem:[%s5448_s6 + $0x118] sm:$0xff]  }
  0x25   : > { %4232 = vmatprep.subr.bf16.mxu0 %v4525_v27  ;;  %v4591_v1 = vld [vmem:[%s5449_s7 + $0x118] sm:$0xff]   ;;  %v4592_v2 = vld [vmem:[%s5448_s6 + $0x120] sm:$0xff]  }
  0x27   : > { %4053 = vmatpush3.bf16.msra.mxu1 %v4524_v25  ;;  %v4565_v25 = vld [vmem:[%s5449_s7 + $0xc0] sm:$0xff]  }
  0x28   : > { %4233 = vmatpush3.bf16.msra.mxu0 %v4525_v27  ;;  %4058 = vmatprep.subr.bf16.mxu1 %v4528_v34  ;;  %v4567_v27 = vld [vmem:[%s5449_s7 + $0xc8] sm:$0xff]  }
  0x29   : > { %4238 = vmatprep.subr.bf16.mxu0 %v4530_v36 }
  0x2a   : > { %4055 = vmatmul.mubr.bf16.vlgmr.msra.gmra.mrb[0].mxu1 %v717_v38  ;;  %v4576_v38 = vld [vmem:[%s5448_s6 + $0xf0] sm:$0xff]  }
  0x2b   : > { %4059 = vmatpush3.bf16.msra.mxu1 %v4528_v34  ;;  %4235 = vmatmul.mubr.bf16.vlgmr.msra.gmra.mrb[0].mxu0 %v4875_v29  ;;  %v4569_v29 = vld [vmem:[%s5449_s7 + $0xd0] sm:$0xff]   ;;  %v4572_v34 = vld [vmem:[%s5448_s6 + $0xe0] sm:$0xff]  }
  0x2c   : > { %4239 = vmatpush3.bf16.msra.mxu0 %v4530_v36  ;;  %4060 = vmatprep.subr.bf16.mxu1 %v4533_v41  ;;  %v4574_v36 = vld [vmem:[%s5448_s6 + $0xe8] sm:$0xff]  }
  0x2d   : > { %4240 = vmatprep.subr.bf16.mxu0 %v4534_v42  ;;  %4074 = vmatprep.mubr.bf16.mxu1 %v4846_v12  ;;  %v4556_v12 = vld [vmem:[%s5448_s6 + $0xa0] sm:$0xff]  }
  0x2e   : > { %4254 = vmatprep.mubr.bf16.mxu0 %v2013_v43  ;;  %v2408_v43 = vshll.u32 %v5033_v31, 16 }
  0x2f   : > { %4061 = vmatpush3.bf16.msra.mxu1 %v4533_v41  ;;  %v1200_v41 = vshll.u32 %v5030_v30, 16 }
  0x30   : > { %4241 = vmatpush3.bf16.msra.mxu0 %v4534_v42  ;;  %4062 = vmatprep.subr.bf16.mxu1 %v4535_v44  ;;  %v4579_v42 = vld [vmem:[%s5449_s7 + $0xf8] sm:$0xff]  }
  0x31   : > { %4242 = vmatprep.subr.bf16.mxu0 %v4536_v45 }
  0x33   : > { %4063 = vmatpush3.bf16.msra.mxu1 %v4535_v44  ;;  %v5078_v44 = vld [vmem:[%s4972_s20 + $0x8] sm:$0xff]  }
  0x34   : > { %4243 = vmatpush3.bf16.msra.mxu0 %v4536_v45  ;;  %4064 = vmatprep.subr.bf16.mxu1 %v4537_v46  ;;  %v1198_v45 = vshrl.u32 %v5030_v30, 16 }
  0x35   : > { %4244 = vmatprep.subr.bf16.mxu0 %v4538_v47 }
  0x37   : > { %4065 = vmatpush3.bf16.msra.mxu1 %v4537_v46  ;;  %v5082_v46 = vld [vmem:[%s4977_s23 + $0x8] sm:$0xff]  }
  0x38   : > { %4245 = vmatpush3.bf16.msra.mxu0 %v4538_v47  ;;  %4066 = vmatprep.subr.bf16.mxu1 %v4539_v48  ;;  %v2406_v47 = vshrl.u32 %v5033_v31, 16 }
  0x39   : > { %4246 = vmatprep.subr.bf16.mxu0 %v4540_v49 }
  0x3b   : > { %4067 = vmatpush3.bf16.msra.mxu1 %v4539_v48  ;;  %v1202_v48 = vrot.slane %v1200_v41, 1  ;;  %v4615_v41 = vld [vmem:[%s5449_s7 + $0x170] sm:$0xff]  }
  0x3c   : > { %4247 = vmatpush3.bf16.msra.mxu0 %v4540_v49  ;;  %4068 = vmatprep.subr.bf16.mxu1 %v4541_v50  ;;  %v1205_v49 = vshll.u32 %v5078_v44, 16 }
  0x3d   : > { %4248 = vmatprep.subr.bf16.mxu0 %v4542_v51 }
  0x3e   : > { %v1207_v55 = vrot.slane %v1205_v49, 1 }
  0x3f   : > { %4069 = vmatpush3.bf16.msra.mxu1 %v4541_v50  ;;  %v2410_v50 = vrot.slane %v2408_v43, 1  ;;  %v4617_v43 = vld [vmem:[%s5449_s7 + $0x178] sm:$0xff]  }
  0x40   : > { %4249 = vmatpush3.bf16.msra.mxu0 %v4542_v51  ;;  %4070 = vmatprep.subr.bf16.mxu1 %v4543_v53  ;;  %v2413_v51 = vshll.u32 %v5082_v46, 16 }
  0x41   : > { %4250 = vmatprep.subr.bf16.mxu0 %v4544_v54 }
  0x42   : > { %v2415_v57 = vrot.slane %v2413_v51, 1  ;;  %v4620_v51 = vld [vmem:[%s5448_s6 + $0x188] sm:$0xff]  }
  0x43   : > { %4071 = vmatpush3.bf16.msra.mxu1 %v4543_v53  ;;  %v4583_v53 = vld [vmem:[%s5449_s7 + $0x100] sm:$0xff]  }
  0x44   : > { %4251 = vmatpush3.bf16.msra.mxu0 %v4544_v54  ;;  %4072 = vmatprep.subr.bf16.mxu1 %v4545_v56  ;;  %v1203_v54 = vor.u32 %v1202_v48, %v1198_v45  ;;  %v4619_v48 = vld [vmem:[%s5449_s7 + $0x180] sm:$0xff]  }
  0x45   : > { %4252 = vmatprep.subr.bf16.mxu0 %v4546_v58 }
  0x46   : > { %v1208_v60 = vsel %vm697_vm0, %v1203_v54, %v1207_v55  ;;  %v5239_v54 = vld [vmem:[%s5098_s21] sm:$0xff]  }
  0x47   : > { %4073 = vmatpush3.bf16.msra.mxu1 %v4545_v56  ;;  %v2411_v56 = vor.u32 %v2410_v50, %v2406_v47 }
  0x48   : > { %4253 = vmatpush3.bf16.msra.mxu0 %v4546_v58  ;;  %4078 = vmatprep.subr.bf16.mxu1 %v4547_v59  ;;  %v4586_v58 = vld [vmem:[%s5448_s6 + $0x108] sm:$0xff]  }
  0x49   : > { %4258 = vmatprep.subr.bf16.mxu0 %v4548_v62  ;;  %v2416_v61 = vsel %vm697_vm0, %v2411_v56, %v2415_v57  ;;  %v4624_v56 = vld [vmem:[%s5448_s6 + $0x198] sm:$0xff]  }
  0x4a   : > { %4075 = vmatmul.mubr.bf16.vlgmr.msra.gmra.mrb[0].mxu1 %v4848_v13  ;;  %v4568_v13 = vld [vmem:[%s5448_s6 + $0xd0] sm:$0xff]  }
  0x4b   : > { %4079 = vmatpush3.bf16.msra.mxu1 %v4547_v59  ;;  %4255 = vmatmul.mubr.bf16.vlgmr.msra.gmra.mrb[0].mxu0 %v2021_v3  ;;  %v4587_v59 = vld [vmem:[%s5449_s7 + $0x108] sm:$0xff]   ;;  %v4593_v3 = vld [vmem:[%s5449_s7 + $0x120] sm:$0xff]  }
  0x4c   : > { %4259 = vmatpush3.bf16.msra.mxu0 %v4548_v62  ;;  %4080 = vmatprep.subr.bf16.mxu1 %v4550_v4  ;;  %v4588_v62 = vld [vmem:[%s5448_s6 + $0x110] sm:$0xff]  }
  0x4d   : > { %4260 = vmatprep.subr.bf16.mxu0 %v4551_v5  ;;  %4094 = vmatprep.mubr.bf16.mxu1 %v936_v6  ;;  %v5138_v6 = vld [vmem:[%s4972_s20 + $0x10] ss:$0 sps:$4 sm:$0x11]   ;;  %s3417_s20 = sshll.u32 %s5463_s10, 5 }
  0x4e   : > { %4274 = vmatprep.mubr.bf16.mxu0 %v2144_v7  ;;  %v5141_v7 = vld [vmem:[%s4977_s23 + $0x10] ss:$0 sps:$4 sm:$0x11]   ;;  %v1340_v45 = vrot.slane %v5138_v6, 1 }
  0x4f   : > { %4081 = vmatpush3.bf16.msra.mxu1 %v4550_v4  ;;  %v4594_v4 = vld [vmem:[%s5448_s6 + $0x128] sm:$0xff]   ;;  %v2548_v47 = vrot.slane %v5141_v7, 1 }
  0x50   : > { %4261 = vmatpush3.bf16.msra.mxu0 %v4551_v5  ;;  %4082 = vmatprep.subr.bf16.mxu1 %v4552_v8  ;;  %v4595_v5 = vld [vmem:[%s5449_s7 + $0x128] sm:$0xff]  }
  0x51   : > { %4262 = vmatprep.subr.bf16.mxu0 %v4553_v9 }
  0x53   : > { %4083 = vmatpush3.bf16.msra.mxu1 %v4552_v8  ;;  %v4596_v8 = vld [vmem:[%s5448_s6 + $0x130] sm:$0xff]  }
  0x54   : > { %4263 = vmatpush3.bf16.msra.mxu0 %v4553_v9  ;;  %4084 = vmatprep.subr.bf16.mxu1 %v4554_v10  ;;  %v4597_v9 = vld [vmem:[%s5449_s7 + $0x130] sm:$0xff]  }
  0x55   : > { %4264 = vmatprep.subr.bf16.mxu0 %v4555_v11 }
  0x57   : > { %4085 = vmatpush3.bf16.msra.mxu1 %v4554_v10  ;;  %v1209_v10 = vshrl.u32 %v5078_v44, 16 }
  0x58   : > { %4265 = vmatpush3.bf16.msra.mxu0 %v4555_v11  ;;  %4086 = vmatprep.subr.bf16.mxu1 %v4556_v12  ;;  %v1213_v11 = vshll.u32 %v5138_v6, 16 }
  0x59   : > { %4266 = vmatprep.subr.bf16.mxu0 %v4557_v14 }
  0x5b   : > { %4087 = vmatpush3.bf16.msra.mxu1 %v4556_v12  ;;  %v2417_v12 = vshrl.u32 %v5082_v46, 16 }
  0x5c   : > { %4267 = vmatpush3.bf16.msra.mxu0 %v4557_v14  ;;  %4088 = vmatprep.subr.bf16.mxu1 %v4558_v15  ;;  %v4598_v14 = vld [vmem:[%s5448_s6 + $0x138] sm:$0xff]  }
  0x5d   : > { %4268 = vmatprep.subr.bf16.mxu0 %v4559_v16 }
  0x5f   : > { %4089 = vmatpush3.bf16.msra.mxu1 %v4558_v15  ;;  %v2421_v15 = vshll.u32 %v5141_v7, 16 }
  0x60   : > { %4269 = vmatpush3.bf16.msra.mxu0 %v4559_v16  ;;  %4090 = vmatprep.subr.bf16.mxu1 %v4560_v17  ;;  %v4599_v16 = vld [vmem:[%s5449_s7 + $0x138] sm:$0xff]  }
  0x61   : > { %4270 = vmatprep.subr.bf16.mxu0 %v4561_v18  ;;  %v2423_v21 = vrot.slane %v2421_v15, 1 }
  0x63   : > { %4091 = vmatpush3.bf16.msra.mxu1 %v4560_v17  ;;  %v1211_v17 = vor.u32 %v1209_v10, %v1207_v55  ;;  %v4623_v55 = vld [vmem:[%s5449_s7 + $0x190] sm:$0xff]  }
  0x64   : > { %4271 = vmatpush3.bf16.msra.mxu0 %v4561_v18  ;;  %4092 = vmatprep.subr.bf16.mxu1 %v4562_v19  ;;  %v1215_v18 = vrot.slane %v1213_v11, 1 }
  0x65   : > { %4272 = vmatprep.subr.bf16.mxu0 %v4563_v20 }
  0x67   : > { %4093 = vmatpush3.bf16.msra.mxu1 %v4562_v19  ;;  %v4600_v19 = vld [vmem:[%s5448_s6 + $0x140] sm:$0xff]  }
  0x68   : > { %4273 = vmatpush3.bf16.msra.mxu0 %v4563_v20  ;;  %4098 = vmatprep.subr.bf16.mxu1 %v4564_v23  ;;  %v2419_v20 = vor.u32 %v2417_v12, %v2415_v57  ;;  %v4625_v57 = vld [vmem:[%s5449_s7 + $0x198] sm:$0xff]   ;;  %v4635_v12 = vld [vmem:[%s5448_s6 + $0x1c0] sm:$0xff]  }
  0x69   : > { %4278 = vmatprep.subr.bf16.mxu0 %v4565_v25 }
  0x6a   : > { %4095 = vmatmul.mubr.bf16.vlgmr.msra.gmra.mrb[0].mxu1 %v938_v22  ;;  %v2545_v22 = vrot.slane %v5033_v31, 1 }
  0x6b   : > { %4099 = vmatpush3.bf16.msra.mxu1 %v4564_v23  ;;  %4275 = vmatmul.mubr.bf16.vlgmr.msra.gmra.mrb[0].mxu0 %v2146_v28  ;;  %v4601_v23 = vld [vmem:[%s5449_s7 + $0x140] sm:$0xff]   ;;  %v2424_v28 = vsel %vm697_vm0, %v2419_v20, %v2423_v21  ;;  %v4641_v20 = vld [vmem:[%s5449_s7 + $0x1c8] sm:$0xff]  }
  0x6c   : > { %4279 = vmatpush3.bf16.msra.mxu0 %v4565_v25  ;;  %4100 = vmatprep.subr.bf16.mxu1 %v4566_v26  ;;  %v1338_v25 = vrot.slane %v5078_v44, 1 }
  0x6d   : > { %4280 = vmatprep.subr.bf16.mxu0 %v4567_v27  ;;  %4114 = vmatprep.mubr.bf16.mxu1 %v5030_v30  ;;  %v4605_v30 = vld [vmem:[%s5449_s7 + $0x148] sm:$0xff]  }
  0x6e   : > { %4294 = vmatprep.mubr.bf16.mxu0 %v5033_v31  ;;  %v1339_v31 = vsel %vm933_vm1, %v1337_v24, %v1338_v25  ;;  %v1341_v49 = vsel %vm933_vm1, %v1338_v25, %v1340_v45  ;;  %v4642_v24 = vld [vmem:[%s5448_s6 + $0x1d0] sm:$0xff]  }
  0x6f   : > { %4101 = vmatpush3.bf16.msra.mxu1 %v4566_v26  ;;  %v1216_v26 = vsel %vm697_vm0, %v1211_v17, %v1215_v18  ;;  %v4643_v25 = vld [vmem:[%s5449_s7 + $0x1d0] sm:$0xff]  }
  0x70   : > { %4281 = vmatpush3.bf16.msra.mxu0 %v4567_v27  ;;  %4102 = vmatprep.subr.bf16.mxu1 %v4568_v13  ;;  %v2546_v27 = vrot.slane %v5082_v46, 1 }
  0x71   : > { %4282 = vmatprep.subr.bf16.mxu0 %v4569_v29 }
  0x72   : > { %v2549_v50 = vsel %vm933_vm1, %v2546_v27, %v2548_v47 }
  0x73   : > { %4103 = vmatpush3.bf16.msra.mxu1 %v4568_v13  ;;  %v4604_v13 = vld [vmem:[%s5448_s6 + $0x148] sm:$0xff]  }
  0x74   : > { %4283 = vmatpush3.bf16.msra.mxu0 %v4569_v29  ;;  %4104 = vmatprep.subr.bf16.mxu1 %v4570_v32  ;;  %v2547_v29 = vsel %vm933_vm1, %v2545_v22, %v2546_v27  ;;  %v4645_v22 = vld [vmem:[%s5449_s7 + $0x1d8] sm:$0xff]   ;;  %v4646_v27 = vld [vmem:[%s5448_s6 + $0x1e0] sm:$0xff]  }
  0x75   : > { %4284 = vmatprep.subr.bf16.mxu0 %v4571_v33 }
  0x77   : > { %4105 = vmatpush3.bf16.msra.mxu1 %v4570_v32  ;;  %v4606_v32 = vld [vmem:[%s5448_s6 + $0x150] sm:$0xff]  }
  0x78   : > { %4285 = vmatpush3.bf16.msra.mxu0 %v4571_v33  ;;  %4106 = vmatprep.subr.bf16.mxu1 %v4572_v34  ;;  %v4607_v33 = vld [vmem:[%s5449_s7 + $0x150] sm:$0xff]  }
  0x79   : > { %4286 = vmatprep.subr.bf16.mxu0 %v4573_v35 }
  0x7b   : > { %4107 = vmatpush3.bf16.msra.mxu1 %v4572_v34  ;;  %v4608_v34 = vld [vmem:[%s5448_s6 + $0x158] sm:$0xff]  }
  0x7c   : > { %4287 = vmatpush3.bf16.msra.mxu0 %v4573_v35  ;;  %4108 = vmatprep.subr.bf16.mxu1 %v4574_v36  ;;  %v4609_v35 = vld [vmem:[%s5449_s7 + $0x158] sm:$0xff]  }
  0x7d   : > { %4288 = vmatprep.subr.bf16.mxu0 %v4575_v37 }
  0x7f   : > { %4109 = vmatpush3.bf16.msra.mxu1 %v4574_v36  ;;  %v4610_v36 = vld [vmem:[%s5448_s6 + $0x160] sm:$0xff]  }
  0x80   : > { %4289 = vmatpush3.bf16.msra.mxu0 %v4575_v37  ;;  %4110 = vmatprep.subr.bf16.mxu1 %v4576_v38  ;;  %v4611_v37 = vld [vmem:[%s5449_s7 + $0x160] sm:$0xff]  }
  0x81   : > { %4290 = vmatprep.subr.bf16.mxu0 %v4577_v39 }
  0x83   : > { %4111 = vmatpush3.bf16.msra.mxu1 %v4576_v38  ;;  %v4612_v38 = vld [vmem:[%s5448_s6 + $0x168] sm:$0xff]  }
  0x84   : > { %4291 = vmatpush3.bf16.msra.mxu0 %v4577_v39  ;;  %4112 = vmatprep.subr.bf16.mxu1 %v4578_v40  ;;  %v4613_v39 = vld [vmem:[%s5449_s7 + $0x168] sm:$0xff]  }
  0x85   : > { %4292 = vmatprep.subr.bf16.mxu0 %v4579_v42 }
  0x87   : > { %4113 = vmatpush3.bf16.msra.mxu1 %v4578_v40  ;;  %v4614_v40 = vld [vmem:[%s5448_s6 + $0x170] sm:$0xff]  }
  0x88   : > { %4293 = vmatpush3.bf16.msra.mxu0 %v4579_v42  ;;  %4118 = vmatprep.subr.bf16.mxu1 %v4581_v52  ;;  %v4616_v42 = vld [vmem:[%s5448_s6 + $0x178] sm:$0xff]  }
  0x89   : > { %4298 = vmatprep.subr.bf16.mxu0 %v4583_v53 }
  0x8a   : > { %4115 = vmatmul.mubr.bf16.vlgmr.msra.gmra.mrb[0].mxu1 %v5078_v44  ;;  %v4622_v44 = vld [vmem:[%s5448_s6 + $0x190] sm:$0xff]  }
  0x8b   : > { %4119 = vmatpush3.bf16.msra.mxu1 %v4581_v52  ;;  %4295 = vmatmul.mubr.bf16.vlgmr.msra.gmra.mrb[0].mxu0 %v5082_v46  ;;  %v4618_v46 = vld [vmem:[%s5448_s6 + $0x180] sm:$0xff]   ;;  %v4621_v52 = vld [vmem:[%s5449_s7 + $0x188] sm:$0xff]  }
  0x8c   : > { %4299 = vmatpush3.bf16.msra.mxu0 %v4583_v53  ;;  %4120 = vmatprep.subr.bf16.mxu1 %v4586_v58  ;;  %v5236_v53 = vld [vmem:[%s5089_s29] sm:$0xff]  }
  0x8d   : > { %4300 = vmatprep.subr.bf16.mxu0 %v4587_v59  ;;  %4134 = vmatprep.mubr.bf16.mxu1 %v1208_v60  ;;  %v4628_v60 = vld [vmem:[%s5448_s6 + $0x1a8] sm:$0xff]   ;;  %v1601_v6 = vshrl.u32 %v5236_v53, 16  ;;  %v1740_v47 = vrot.slane %v5236_v53, 1 }
  0x8e   : > { %4314 = vmatprep.mubr.bf16.mxu0 %v2416_v61  ;;  %v4629_v61 = vld [vmem:[%s5449_s7 + $0x1a8] sm:$0xff]  }
  0x8f   : > { %4121 = vmatpush3.bf16.msra.mxu1 %v4586_v58  ;;  %v4626_v58 = vld [vmem:[%s5448_s6 + $0x1a0] sm:$0xff]  }
  0x90   : > { %4301 = vmatpush3.bf16.msra.mxu0 %v4587_v59  ;;  %4122 = vmatprep.subr.bf16.mxu1 %v4588_v62  ;;  %v4627_v59 = vld [vmem:[%s5449_s7 + $0x1a0] sm:$0xff]  }
  0x91   : > { %4302 = vmatprep.subr.bf16.mxu0 %v4589_v63 }
  0x93   : > { %4123 = vmatpush3.bf16.msra.mxu1 %v4588_v62  ;;  %v4630_v62 = vld [vmem:[%s5448_s6 + $0x1b0] sm:$0xff]  }
  0x94   : > { %4303 = vmatpush3.bf16.msra.mxu0 %v4589_v63  ;;  %4124 = vmatprep.subr.bf16.mxu1 %v4590_v0  ;;  %v4631_v63 = vld [vmem:[%s5449_s7 + $0x1b0] sm:$0xff]  }
  0x95   : > { %4304 = vmatprep.subr.bf16.mxu0 %v4591_v1 }
  0x97   : > { %4125 = vmatpush3.bf16.msra.mxu1 %v4590_v0  ;;  %v1603_v0 = vshll.u32 %v5236_v53, 16 }
  0x98   : > { %4305 = vmatpush3.bf16.msra.mxu0 %v4591_v1  ;;  %4126 = vmatprep.subr.bf16.mxu1 %v4592_v2  ;;  %v2811_v1 = vshll.u32 %v5239_v54, 16 }
  0x99   : > { %4306 = vmatprep.subr.bf16.mxu0 %v4593_v3  ;;  %v1605_v7 = vrot.slane %v1603_v0, 1  ;;  %v4668_v0 = vld [vmem:[%s5448_s6 + $0x230] sm:$0xff]  }
  0x9a   : > { %v2813_v10 = vrot.slane %v2811_v1, 1  ;;  %v4669_v1 = vld [vmem:[%s5449_s7 + $0x230] sm:$0xff]  }
  0x9b   : > { %4127 = vmatpush3.bf16.msra.mxu1 %v4592_v2  ;;  %v4632_v2 = vld [vmem:[%s5448_s6 + $0x1b8] sm:$0xff]   ;;  %v1606_v15 = vor.u32 %v1605_v7, %v1601_v6 }
  0x9c   : > { %4307 = vmatpush3.bf16.msra.mxu0 %v4593_v3  ;;  %4128 = vmatprep.subr.bf16.mxu1 %v4594_v4  ;;  %v5279_v3 = vld [vmem:[%s5089_s29 + $0x8] sm:$0xff]  }
  0x9d   : > { %4308 = vmatprep.subr.bf16.mxu0 %v4595_v5 }
  0x9f   : > { %4129 = vmatpush3.bf16.msra.mxu1 %v4594_v4  ;;  %v4633_v4 = vld [vmem:[%s5449_s7 + $0x1b8] sm:$0xff]  }
  0xa0   : > { %4309 = vmatpush3.bf16.msra.mxu0 %v4595_v5  ;;  %4130 = vmatprep.subr.bf16.mxu1 %v4596_v8  ;;  %v5285_v5 = vld [vmem:[%s5098_s21 + $0x8] sm:$0xff]  }
  0xa1   : > { %4310 = vmatprep.subr.bf16.mxu0 %v4597_v9  ;;  %v2816_v11 = vshll.u32 %v5285_v5, 16 }
  0xa3   : > { %4131 = vmatpush3.bf16.msra.mxu1 %v4596_v8  ;;  %v1608_v8 = vshll.u32 %v5279_v3, 16  ;;  %v2818_v18 = vrot.slane %v2816_v11, 1 }
  0xa4   : > { %4311 = vmatpush3.bf16.msra.mxu0 %v4597_v9  ;;  %4132 = vmatprep.subr.bf16.mxu1 %v4598_v14  ;;  %v2809_v9 = vshrl.u32 %v5239_v54, 16 }
  0xa5   : > { %4312 = vmatprep.subr.bf16.mxu0 %v4599_v16 }
  0xa6   : > { %v2814_v17 = vor.u32 %v2813_v10, %v2809_v9 }
  0xa7   : > { %4133 = vmatpush3.bf16.msra.mxu1 %v4598_v14  ;;  %v4637_v14 = vld [vmem:[%s5449_s7 + $0x1c0] sm:$0xff]  }
  0xa8   : > { %4313 = vmatpush3.bf16.msra.mxu0 %v4599_v16  ;;  %4138 = vmatprep.subr.bf16.mxu1 %v4600_v19  ;;  %v1610_v16 = vrot.slane %v1608_v8, 1 }
  0xa9   : > { %4318 = vmatprep.subr.bf16.mxu0 %v4601_v23 }
  0xaa   : > { %4135 = vmatmul.mubr.bf16.vlgmr.msra.gmra.mrb[0].mxu1 %v1216_v26  ;;  %v1611_v21 = vsel %vm697_vm0, %v1606_v15, %v1610_v16  ;;  %v4644_v26 = vld [vmem:[%s5448_s6 + $0x1d8] sm:$0xff]  }
  0xab   : > { %4139 = vmatpush3.bf16.msra.mxu1 %v4600_v19  ;;  %4315 = vmatmul.mubr.bf16.vlgmr.msra.gmra.mrb[0].mxu0 %v2424_v28  ;;  %v4640_v19 = vld [vmem:[%s5448_s6 + $0x1c8] sm:$0xff]   ;;  %v4647_v28 = vld [vmem:[%s5449_s7 + $0x1e0] sm:$0xff]  }
  0xac   : > { %4319 = vmatpush3.bf16.msra.mxu0 %v4601_v23  ;;  %4140 = vmatprep.subr.bf16.mxu1 %v4604_v13  ;;  %v2819_v23 = vsel %vm697_vm0, %v2814_v17, %v2818_v18 }
  0xad   : > { %4320 = vmatprep.subr.bf16.mxu0 %v4605_v30  ;;  %4154 = vmatprep.mubr.bf16.mxu1 %v1339_v31  ;;  %v5332_v31 = vld [vmem:[%s5089_s29 + $0x10] ss:$0 sps:$4 sm:$0x11]   ;;  %s633_s29 = scalar_lea.vmem %s5450_s8, %s3416_s27 }
  0xae   : > { %4334 = vmatprep.mubr.bf16.mxu0 %v2547_v29  ;;  %v4650_v29 = vld [vmem:[%s5448_s6 + $0x1f0] sm:$0xff]  }
  0xaf   : > { %4141 = vmatpush3.bf16.msra.mxu1 %v4604_v13  ;;  %v4648_v13 = vld [vmem:[%s5448_s6 + $0x1e8] sm:$0xff]  }
  0xb0   : > { %4321 = vmatpush3.bf16.msra.mxu0 %v4605_v30  ;;  %4142 = vmatprep.subr.bf16.mxu1 %v4606_v32  ;;  %v4649_v30 = vld [vmem:[%s5449_s7 + $0x1e8] sm:$0xff]  }
  0xb1   : > { %4322 = vmatprep.subr.bf16.mxu0 %v4607_v33 }
  0xb3   : > { %4143 = vmatpush3.bf16.msra.mxu1 %v4606_v32  ;;  %v5338_v32 = vld [vmem:[%s5098_s21 + $0x10] ss:$0 sps:$4 sm:$0x11]   ;;  %s642_s21 = sadd.s32 %s3417_s20, %s5469_s30 }
  0xb4   : > { %4323 = vmatpush3.bf16.msra.mxu0 %v4607_v33  ;;  %4144 = vmatprep.subr.bf16.mxu1 %v4608_v34  ;;  %v4651_v33 = vld [vmem:[%s5449_s7 + $0x1f0] sm:$0xff]   ;;  %s3418_s23 = sshll.u32 %s642_s21, 1 }
  0xb5   : > { %4324 = vmatprep.subr.bf16.mxu0 %v4609_v35  ;;  %s644_s26 = scalar_lea.vmem %s5451_s9, %s3418_s23 }
  0xb7   : > { %4145 = vmatpush3.bf16.msra.mxu1 %v4608_v34  ;;  %v1612_v34 = vshrl.u32 %v5279_v3, 16 }
  0xb8   : > { %4325 = vmatpush3.bf16.msra.mxu0 %v4609_v35  ;;  %4146 = vmatprep.subr.bf16.mxu1 %v4610_v36  ;;  %v1616_v35 = vshll.u32 %v5332_v31, 16 }
  0xb9   : > { %4326 = vmatprep.subr.bf16.mxu0 %v4611_v37 }
  0xbb   : > { %4147 = vmatpush3.bf16.msra.mxu1 %v4610_v36  ;;  %v4652_v36 = vld [vmem:[%s5448_s6 + $0x1f8] sm:$0xff]  }
  0xbc   : > { %4327 = vmatpush3.bf16.msra.mxu0 %v4611_v37  ;;  %4148 = vmatprep.subr.bf16.mxu1 %v4612_v38  ;;  %v2820_v37 = vshrl.u32 %v5285_v5, 16 }
  0xbd   : > { %4328 = vmatprep.subr.bf16.mxu0 %v4613_v39 }
  0xbf   : > { %4149 = vmatpush3.bf16.msra.mxu1 %v4612_v38  ;;  %v2824_v38 = vshll.u32 %v5338_v32, 16 }
  0xc0   : > { %4329 = vmatpush3.bf16.msra.mxu0 %v4613_v39  ;;  %4150 = vmatprep.subr.bf16.mxu1 %v4614_v40  ;;  %v4653_v39 = vld [vmem:[%s5449_s7 + $0x1f8] sm:$0xff]  }
  0xc1   : > { %4330 = vmatprep.subr.bf16.mxu0 %v4615_v41  ;;  %v2826_v45 = vrot.slane %v2824_v38, 1 }
  0xc3   : > { %4151 = vmatpush3.bf16.msra.mxu1 %v4614_v40  ;;  %v1614_v40 = vor.u32 %v1612_v34, %v1610_v16 }
  0xc4   : > { %4331 = vmatpush3.bf16.msra.mxu0 %v4615_v41  ;;  %4152 = vmatprep.subr.bf16.mxu1 %v4616_v42  ;;  %v1618_v41 = vrot.slane %v1616_v35, 1 }
  0xc5   : > { %4332 = vmatprep.subr.bf16.mxu0 %v4617_v43 }
  0xc7   : > { %4153 = vmatpush3.bf16.msra.mxu1 %v4616_v42  ;;  %v4654_v42 = vld [vmem:[%s5448_s6 + $0x200] sm:$0xff]  }
  0xc8   : > { %4333 = vmatpush3.bf16.msra.mxu0 %v4617_v43  ;;  %4158 = vmatprep.subr.bf16.mxu1 %v4618_v46  ;;  %v2822_v43 = vor.u32 %v2820_v37, %v2818_v18 }
  0xc9   : > { %4338 = vmatprep.subr.bf16.mxu0 %v4619_v48 }
  0xca   : > { %4155 = vmatmul.mubr.bf16.vlgmr.msra.gmra.mrb[0].mxu1 %v1341_v49  ;;  %v1619_v49 = vsel %vm697_vm0, %v1614_v40, %v1618_v41 }
  0xcb   : > { %4159 = vmatpush3.bf16.msra.mxu1 %v4618_v46  ;;  %4335 = vmatmul.mubr.bf16.vlgmr.msra.gmra.mrb[0].mxu0 %v2549_v50  ;;  %v4655_v46 = vld [vmem:[%s5449_s7 + $0x200] sm:$0xff]   ;;  %v2948_v50 = vrot.slane %v5239_v54, 1 }
  0xcc   : > { %4339 = vmatpush3.bf16.msra.mxu0 %v4619_v48  ;;  %4160 = vmatprep.subr.bf16.mxu1 %v4620_v51  ;;  %v1741_v48 = vrot.slane %v5279_v3, 1 }
  0xcd   : > { %4340 = vmatprep.subr.bf16.mxu0 %v4621_v52  ;;  %4174 = vmatprep.mubr.bf16.mxu1 %v5236_v53  ;;  %v4659_v53 = vld [vmem:[%s5449_s7 + $0x208] sm:$0xff]  }
  0xce   : > { %4354 = vmatprep.mubr.bf16.mxu0 %v5239_v54 }
  0xcf   : > { %4161 = vmatpush3.bf16.msra.mxu1 %v4620_v51  ;;  %v2949_v51 = vrot.slane %v5285_v5, 1 }
  0xd0   : > { %4341 = vmatpush3.bf16.msra.mxu0 %v4621_v52  ;;  %4162 = vmatprep.subr.bf16.mxu1 %v4622_v44  ;;  %v2827_v52 = vsel %vm697_vm0, %v2822_v43, %v2826_v45 }
  0xd1   : > { %4342 = vmatprep.subr.bf16.mxu0 %v4623_v55  ;;  %v2950_v54 = vsel %vm933_vm1, %v2948_v50, %v2949_v51 }
  0xd3   : > { %4163 = vmatpush3.bf16.msra.mxu1 %v4622_v44  ;;  %v4658_v44 = vld [vmem:[%s5448_s6 + $0x208] sm:$0xff]  }
  0xd4   : > { %4343 = vmatpush3.bf16.msra.mxu0 %v4623_v55  ;;  %4164 = vmatprep.subr.bf16.mxu1 %v4624_v56  ;;  %v1742_v55 = vsel %vm933_vm1, %v1740_v47, %v1741_v48 }
  0xd5   : > { %4344 = vmatprep.subr.bf16.mxu0 %v4625_v57 }
  0xd7   : > { %4165 = vmatpush3.bf16.msra.mxu1 %v4624_v56  ;;  %v4660_v56 = vld [vmem:[%s5448_s6 + $0x210] sm:$0xff]  }
  0xd8   : > { %4345 = vmatpush3.bf16.msra.mxu0 %v4625_v57  ;;  %4166 = vmatprep.subr.bf16.mxu1 %v4626_v58  ;;  %v4661_v57 = vld [vmem:[%s5449_s7 + $0x210] sm:$0xff]  }
  0xd9   : > { %4346 = vmatprep.subr.bf16.mxu0 %v4627_v59 }
  0xdb   : > { %4167 = vmatpush3.bf16.msra.mxu1 %v4626_v58  ;;  %v4662_v58 = vld [vmem:[%s5448_s6 + $0x218] sm:$0xff]  }
  0xdc   : > { %4347 = vmatpush3.bf16.msra.mxu0 %v4627_v59  ;;  %4168 = vmatprep.subr.bf16.mxu1 %v4628_v60  ;;  %v4663_v59 = vld [vmem:[%s5449_s7 + $0x218] sm:$0xff]  }
  0xdd   : > { %4348 = vmatprep.subr.bf16.mxu0 %v4629_v61 }
  0xdf   : > { %4169 = vmatpush3.bf16.msra.mxu1 %v4628_v60  ;;  %v4664_v60 = vld [vmem:[%s5448_s6 + $0x220] sm:$0xff]  }
  0xe0   : > { %4349 = vmatpush3.bf16.msra.mxu0 %v4629_v61  ;;  %4170 = vmatprep.subr.bf16.mxu1 %v4630_v62  ;;  %v4665_v61 = vld [vmem:[%s5449_s7 + $0x220] sm:$0xff]  }
  0xe1   : > { %4350 = vmatprep.subr.bf16.mxu0 %v4631_v63 }
  0xe3   : > { %4171 = vmatpush3.bf16.msra.mxu1 %v4630_v62  ;;  %v4666_v62 = vld [vmem:[%s5448_s6 + $0x228] sm:$0xff]  }
  0xe4   : > { %4351 = vmatpush3.bf16.msra.mxu0 %v4631_v63  ;;  %4172 = vmatprep.subr.bf16.mxu1 %v4632_v2  ;;  %v4667_v63 = vld [vmem:[%s5449_s7 + $0x228] sm:$0xff]  }
  0xe5   : > { %4352 = vmatprep.subr.bf16.mxu0 %v4633_v4 }
  0xe7   : > { %4173 = vmatpush3.bf16.msra.mxu1 %v4632_v2  ;;  %v4670_v2 = vld [vmem:[%s5448_s6 + $0x238] sm:$0xff]  }
  0xe8   : > { %4353 = vmatpush3.bf16.msra.mxu0 %v4633_v4  ;;  %4178 = vmatprep.subr.bf16.mxu1 %v4635_v12  ;;  %v1743_v4 = vrot.slane %v5332_v31, 1 }
  0xe9   : > { %4358 = vmatprep.subr.bf16.mxu0 %v4637_v14 }
  0xea   : > { %4175 = vmatmul.mubr.bf16.vlgmr.msra.gmra.mrb[0].mxu1 %v5279_v3  ;;  %v4671_v3 = vld [vmem:[%s5449_s7 + $0x238] sm:$0xff]   ;;  %v1744_v6 = vsel %vm933_vm1, %v1741_v48, %v1743_v4 }
  0xeb   : > { %4179 = vmatpush3.bf16.msra.mxu1 %v4635_v12  ;;  %4355 = vmatmul.mubr.bf16.vlgmr.msra.gmra.mrb[0].mxu0 %v5285_v5  ;;  %v2951_v5 = vrot.slane %v5338_v32, 1 }
  0xec   : > { %4359 = vmatpush3.bf16.msra.mxu0 %v4637_v14  ;;  %4180 = vmatprep.subr.bf16.mxu1 %v4640_v19 }
  0xed   : > { %4360 = vmatprep.subr.bf16.mxu0 %v4641_v20  ;;  %4194 = vmatprep.mubr.bf16.mxu1 %v1611_v21  ;;  %v2952_v7 = vsel %vm933_vm1, %v2949_v51, %v2951_v5 }
  0xee   : > { %4374 = vmatprep.mubr.bf16.mxu0 %v2819_v23 }
  0xef   : > { %4181 = vmatpush3.bf16.msra.mxu1 %v4640_v19 }
  0xf0   : > { %4361 = vmatpush3.bf16.msra.mxu0 %v4641_v20  ;;  %4182 = vmatprep.subr.bf16.mxu1 %v4642_v24 }
  0xf1   : > { %4362 = vmatprep.subr.bf16.mxu0 %v4643_v25 }
  0xf3   : > { %4183 = vmatpush3.bf16.msra.mxu1 %v4642_v24 }
  0xf4   : > { %4363 = vmatpush3.bf16.msra.mxu0 %v4643_v25  ;;  %4184 = vmatprep.subr.bf16.mxu1 %v4644_v26 }
  0xf5   : > { %4364 = vmatprep.subr.bf16.mxu0 %v4645_v22 }
  0xf7   : > { %4185 = vmatpush3.bf16.msra.mxu1 %v4644_v26 }
  0xf8   : > { %4365 = vmatpush3.bf16.msra.mxu0 %v4645_v22  ;;  %4186 = vmatprep.subr.bf16.mxu1 %v4646_v27 }
  0xf9   : > { %4366 = vmatprep.subr.bf16.mxu0 %v4647_v28 }
  0xfb   : > { %4187 = vmatpush3.bf16.msra.mxu1 %v4646_v27 }
  0xfc   : > { %4367 = vmatpush3.bf16.msra.mxu0 %v4647_v28  ;;  %4188 = vmatprep.subr.bf16.mxu1 %v4648_v13 }
  0xfd   : > { %4368 = vmatprep.subr.bf16.mxu0 %v4649_v30 }
  0xff   : > { %4189 = vmatpush3.bf16.msra.mxu1 %v4648_v13 }
 0x100   : > { %4369 = vmatpush3.bf16.msra.mxu0 %v4649_v30  ;;  %4190 = vmatprep.subr.bf16.mxu1 %v4650_v29 }
 0x101   : > { %4370 = vmatprep.subr.bf16.mxu0 %v4651_v33 }
 0x103   : > { %4191 = vmatpush3.bf16.msra.mxu1 %v4650_v29 }
 0x104   : > { %4371 = vmatpush3.bf16.msra.mxu0 %v4651_v33  ;;  %4192 = vmatprep.subr.bf16.mxu1 %v4652_v36 }
 0x105   : > { %4372 = vmatprep.subr.bf16.mxu0 %v4653_v39 }
 0x107   : > { %4193 = vmatpush3.bf16.msra.mxu1 %v4652_v36 }
 0x108   : > { %4373 = vmatpush3.bf16.msra.mxu0 %v4653_v39  ;;  %4198 = vmatprep.subr.bf16.mxu1 %v4654_v42 }
 0x109   : > { %4378 = vmatprep.subr.bf16.mxu0 %v4655_v46 }
 0x10a   : > { %4195 = vmatmul.mubr.bf16.vlgmr.msra.gmra.mrb[0].mxu1 %v1619_v49 }
 0x10b   : > { %4199 = vmatpush3.bf16.msra.mxu1 %v4654_v42  ;;  %4375 = vmatmul.mubr.bf16.vlgmr.msra.gmra.mrb[0].mxu0 %v2827_v52 }
 0x10c   : > { %4379 = vmatpush3.bf16.msra.mxu0 %v4655_v46  ;;  %4200 = vmatprep.subr.bf16.mxu1 %v4658_v44 }
 0x10d   : > { %4380 = vmatprep.subr.bf16.mxu0 %v4659_v53  ;;  %4214 = vmatprep.mubr.bf16.mxu1 %v1742_v55 }
 0x10e   : > { %4394 = vmatprep.mubr.bf16.mxu0 %v2950_v54 }
 0x10f   : > { %4201 = vmatpush3.bf16.msra.mxu1 %v4658_v44 }
 0x110   : > { %4381 = vmatpush3.bf16.msra.mxu0 %v4659_v53  ;;  %4202 = vmatprep.subr.bf16.mxu1 %v4660_v56 }
 0x111   : > { %4382 = vmatprep.subr.bf16.mxu0 %v4661_v57 }
 0x113   : > { %4203 = vmatpush3.bf16.msra.mxu1 %v4660_v56 }
 0x114   : > { %4383 = vmatpush3.bf16.msra.mxu0 %v4661_v57  ;;  %4204 = vmatprep.subr.bf16.mxu1 %v4662_v58 }
 0x115   : > { %4384 = vmatprep.subr.bf16.mxu0 %v4663_v59 }
 0x117   : > { %4205 = vmatpush3.bf16.msra.mxu1 %v4662_v58 }
 0x118   : > { %4385 = vmatpush3.bf16.msra.mxu0 %v4663_v59  ;;  %4206 = vmatprep.subr.bf16.mxu1 %v4664_v60 }
 0x119   : > { %4386 = vmatprep.subr.bf16.mxu0 %v4665_v61 }
 0x11b   : > { %4207 = vmatpush3.bf16.msra.mxu1 %v4664_v60 }
 0x11c   : > { %4387 = vmatpush3.bf16.msra.mxu0 %v4665_v61  ;;  %4208 = vmatprep.subr.bf16.mxu1 %v4666_v62 }
 0x11d   : > { %4388 = vmatprep.subr.bf16.mxu0 %v4667_v63 }
 0x11f   : > { %4209 = vmatpush3.bf16.msra.mxu1 %v4666_v62 }
 0x120   : > { %4389 = vmatpush3.bf16.msra.mxu0 %v4667_v63  ;;  %4210 = vmatprep.subr.bf16.mxu1 %v4668_v0 }
 0x121   : > { %4390 = vmatprep.subr.bf16.mxu0 %v4669_v1 }
 0x123   : > { %4211 = vmatpush3.bf16.msra.mxu1 %v4668_v0 }
 0x124   : > { %4391 = vmatpush3.bf16.msra.mxu0 %v4669_v1  ;;  %4212 = vmatprep.subr.bf16.mxu1 %v4670_v2 }
 0x125   : > { %4392 = vmatprep.subr.bf16.mxu0 %v4671_v3 }
 0x127   : > { %4213 = vmatpush3.bf16.msra.mxu1 %v4670_v2 }
 0x128   : > { %4393 = vmatpush3.bf16.msra.mxu0 %v4671_v3 }
 0x12a   : > { %4215 = vmatmul.mubr.bf16.vlgmr.msra.gmra.mrb[0].mxu1 %v1744_v6 }
 0x12b   : > { %4395 = vmatmul.mubr.bf16.vlgmr.msra.gmra.mrb[0].mxu0 %v2952_v7 }
 0x1fd   : > { %v4216_v8 = vpop.f32.mrb[0].mxu1 }
 0x1fe   : > { %v4396_v9 = vpop.f32.mrb[0].mxu0  ;;  %v1829_v10 = vpop.f32.mrb[1].mxu1 }
 0x1ff   : > { %v4398_v11 = vadd.f32 %v4396_v9, %v4216_v8  ;;  %v3037_v12 = vpop.f32.mrb[1].mxu0  ;;  %v4217_v14 = vpop.f32.mrb[2].mxu1 }
 0x200   : > { %v4399_v15 = vadd.f32 %v3037_v12, %v1829_v10  ;;  %v4397_v16 = vpop.f32.mrb[2].mxu0  ;;  %v1832_v17 = vpop.f32.mrb[3].mxu1 }
 0x201   : > { %v4400_v18 = vadd.f32 %v4397_v16, %v4217_v14  ;;  %v3040_v19 = vpop.f32.mrb[3].mxu0  ;;  %v3088_v22 = vmul.f32 %v4398_v11, %v4398_v11 }
 0x202   : > { %v4401_v20 = vadd.f32 %v3040_v19, %v1832_v17  ;;  %v3086_v23 = vmul.f32 %v4399_v15, %v4399_v15 }
 0x203   : > { %v3855_v21 = vpack.c.bf16 %v4400_v18, %v4398_v11  ;;  %v3089_v13 = vmul.f32 %v4400_v18, %v4400_v18 }
 0x204   : > { %v3850_v24 = vpack.c.bf16 %v4401_v20, %v4399_v15  ;;  %v3076_v25 = vadd.f32 %v4401_v20, %v4399_v15  ;;  %v3087_v26 = vmul.f32 %v4401_v20, %v4401_v20 }
 0x205   : > { %3857 = vst [vmem:[%s633_s29 + $0x8] sm:$0xff] %v3855_v21  }
 0x206   : > { %3851 = vst [vmem:[%s633_s29] sm:$0xff] %v3850_v24   ;;  %v3077_v27 = vadd.f32 %v4398_v11, %v3076_v25  ;;  %v3090_v28 = vadd.f32 %v3087_v26, %v3086_v23 }
 0x208   : > { %v3078_v30 = vadd.f32 %v4400_v18, %v3077_v27  ;;  %v3091_v31 = vadd.f32 %v3090_v28, %v3088_v22 }
 0x20a   : > { %v3079_v29 = vrot.slane %v3078_v30, 4  ;;  %v3092_v32 = vadd.f32 %v3091_v31, %v3089_v13 }
 0x20c   : > { %v3080_v33 = vadd.f32 %v3079_v29, %v3078_v30  ;;  %v3093_v34 = vrot.slane %v3092_v32, 4 }
 0x20e   : > { %v3081_v35 = vrot.slane %v3080_v33, 2  ;;  %v3094_v36 = vadd.f32 %v3093_v34, %v3092_v32 }
 0x210   : > { %v3082_v37 = vadd.f32 %v3081_v35, %v3080_v33  ;;  %v3095_v38 = vrot.slane %v3094_v36, 2 }
 0x212   : > { %v3083_v39 = vrot.slane %v3082_v37, 1  ;;  %v3096_v40 = vadd.f32 %v3095_v38, %v3094_v36 }
 0x214   : > { %v3084_v41 = vadd.f32 %v3083_v39, %v3082_v37  ;;  %v3097_v42 = vrot.slane %v3096_v40, 1 }
 0x216   : > { %3085 = vst [vmem:[%s644_s26] sm:$0x1] %v3084_v41  ;;  %v3098_v43 = vadd.f32 %v3097_v42, %v3096_v40 }
 0x218   : > { %3099 = vst [vmem:[%s644_s26 + $0x1] sm:$0x1] %v3098_v43 }
 0x219 PF: > { %s20_s13 = sadd.s32 1, %s4710_s13   ;;  %s5452_s30 = smov %s4702_s11 }
 0x21a   : > { %p17_p10 = scmp.ge.s32.totalorder %s20_s13, 66   ;;  %s5453_s10 = smov %s4706_s12 }
 0x21b   : > { %s5454_s11 = smov %s5457_s14  ;;  %s5455_s12 = smov %s5461_s15 }
 0x21c   :  { %19 = sbr.rel (!%p17_p10) target bundleno = 3 (0x3), region = 131 }

// kernel: decoder_block_forward.8
= control target key start
LH: loop header
LB: loop body
LE: loop exit
PB: predicated region body
PF: predicated region fallthrough
CT: control target
= control target key end

     0   :  { %s2615_s18 = smov 0   ;;  %s2617_s19 = smov 0   ;;  %s2997_s0 = inlined_call_operand.vmem [shape: bf16[2,34,34,128], index: 0, kind: input, shape index: {}, may-alias: {0,1,2}]   ;;  %s2998_s1 = inlined_call_operand.vmem [shape: bf16[2,34,34,128], index: 1, kind: input, shape index: {}, may-alias: {0,1,2}]   ;;  %s2999_s2 = inlined_call_operand.vmem [shape: bf16[2,34,34,128], index: 2, kind: input, shape index: {}, may-alias: {0,1,2}]   ;;  %s3000_s3 = inlined_call_operand.vmem [shape: bf16[3,3,128,128], index: 3, kind: input, shape index: {}]   ;;  %s3001_s4 = inlined_call_operand.vmem [shape: bf16[2,32,32,128], index: 4, kind: output, shape index: {0}]   ;;  %s3002_s5 = inlined_call_operand.vmem [shape: f32[2,32,2,128], index: 5, kind: output, shape index: {1}]  }
   0x1   :  { %s2619_s20 = smov 0   ;;  %s2621_s21 = smov 0  }
   0x2   :  { %s2623_s22 = smov 0  }
   0x3 LB: > { %s28_s23 = sadd.s32 1, %s2575_s20  ;;  %s31_s24 = sadd.s32 1, %s2579_s21  ;;  %s2583_s22 = sphi %s2623_s22, %s16_s22   ;;  %s2579_s21 = sphi %s2621_s21, %s3006_s21   ;;  %s2575_s20 = sphi %s2619_s20, %s3005_s20   ;;  %s2571_s19 = sphi %s2617_s19, %s3004_s19   ;;  %s2567_s18 = sphi %s2615_s18, %s3003_s18  }
   0x4   : > { %p29_p0 = scmp.ge.s32.totalorder %s28_s23, 32  ;;  %p1879_p1 = scmp.ge.s32.totalorder %s2583_s22, 1 }
   0x5   : > { %p272_p2 = scmp.lt.s32.totalorder %s2583_s22, 65 }
   0x6   : > { %s3008_s23 = smov (%p29_p0, %s28_s23), 0  ;;  %s3010_s24 = smov (!%p29_p0, %s31_s24), %s2579_s21 }
   0x7   : > { %p273_p3 = pnand %p1879_p1, %p272_p2  ;;  %p33_p4 = scmp.ge.s32.totalorder %s3010_s24, 2 }
   0x8   : > { %v2464_v0 = vld [vmem:[%s3000_s3 + $0x40] sm:$0xff] (!%p273_p3)   ;;  %p346_p5 = scmp.lt.s32.totalorder (!%p273_p3), %s2571_s19, 1  ;;  %p348_p6 = scmp.lt.s32.totalorder (!%p273_p3), %s2567_s18, 33  ;;  %v2466_v2 = vld [vmem:[%s3000_s3 + $0x48] sm:$0xff] (!%p273_p3)   ;;  %v2468_v4 = vld [vmem:[%s3000_s3 + $0x50] sm:$0xff] (!%p273_p3)   ;;  %vm692_vm1 = vcmask (!%p273_p3), 1046528  }
   0x9   : > { %s3012_s24 = smov (%p33_p4, %s3010_s24), 0  ;;  %276 = sbr.rel (%p273_p3) target bundleno = 409 (0x199), region = 36 }
   0xa   : > { %v2465_v1 = vld [vmem:[%s3000_s3 + $0x100] sm:$0xff] (!%p273_p3)   ;;  %2208 = vmatprep.subr.bf16.mxu1 (!%p273_p3), %v2464_v0  ;;  %v2467_v3 = vld [vmem:[%s3000_s3 + $0x108] sm:$0xff] (!%p273_p3)   ;;  %v2469_v5 = vld [vmem:[%s3000_s3 + $0x110] sm:$0xff] (!%p273_p3)   ;;  %s355_s15 = sadd.s32 (!%p273_p3), 1, %s2567_s18  ;;  %vm456_vm0 = vsmask.f32 (!%p273_p3), 7424 }
   0xb   : > { %2288 = vmatprep.subr.bf16.mxu0 (!%p273_p3), %v2465_v1  ;;  %2209 = vmatpush3.bf16.msra.mxu1 (!%p273_p3), %v2464_v0  ;;  %p358_p7 = scmp.lt.s32.totalorder (!%p273_p3), %s355_s15, 33  ;;  %v2470_v6 = vld [vmem:[%s3000_s3 + $0x58] sm:$0xff] (!%p273_p3)   ;;  %v2472_v8 = vld [vmem:[%s3000_s3 + $0x60] sm:$0xff] (!%p273_p3)   ;;  %v2474_v10 = vld [vmem:[%s3000_s3 + $0x68] sm:$0xff] (!%p273_p3)   ;;  %p383_p9 = scmp.lt.s32.totalorder (!%p273_p3), %s2567_s18, 31 }
   0xc   : > { %2289 = vmatpush3.bf16.msra.mxu0 (!%p273_p3), %v2465_v1  ;;  %2210 = vmatprep.subr.bf16.mxu1 (!%p273_p3), %v2466_v2  ;;  %v2471_v7 = vld [vmem:[%s3000_s3 + $0x118] sm:$0xff] (!%p273_p3)   ;;  %v2473_v9 = vld [vmem:[%s3000_s3 + $0x120] sm:$0xff] (!%p273_p3)   ;;  %v2475_v11 = vld [vmem:[%s3000_s3 + $0x128] sm:$0xff] (!%p273_p3)  }
   0xd   : > { %2290 = vmatprep.subr.bf16.mxu0 (!%p273_p3), %v2467_v3  ;;  %v2476_v14 = vld [vmem:[%s3000_s3 + $0x70] sm:$0xff] (!%p273_p3)   ;;  %v2478_v25 = vld [vmem:[%s3000_s3 + $0x78] sm:$0xff] (!%p273_p3)   ;;  %v2482_v41 = vld [vmem:[%s3000_s3] sm:$0xff] (!%p273_p3)  }
   0xe   : > { %v2477_v19 = vld [vmem:[%s3000_s3 + $0x130] sm:$0xff] (!%p273_p3)   ;;  %v2479_v33 = vld [vmem:[%s3000_s3 + $0x138] sm:$0xff] (!%p273_p3)   ;;  %v2485_v42 = vld [vmem:[%s3000_s3 + $0x140] sm:$0xff] (!%p273_p3)  }
   0xf   : > { %2211 = vmatpush3.bf16.msra.mxu1 (!%p273_p3), %v2466_v2  ;;  %v2488_v50 = vld [vmem:[%s3000_s3 + $0x8] sm:$0xff] (!%p273_p3)   ;;  %v2490_v53 = vld [vmem:[%s3000_s3 + $0x10] sm:$0xff] (!%p273_p3)   ;;  %v2492_v55 = vld [vmem:[%s3000_s3 + $0x18] sm:$0xff] (!%p273_p3)  }
  0x10   : > { %s3014_s19 = smov (!%p346_p5, %s2571_s19), 1  ;;  %2291 = vmatpush3.bf16.msra.mxu0 %v2467_v3  ;;  %2212 = vmatprep.subr.bf16.mxu1 %v2468_v4  ;;  %s3016_s15 = smov (!%p358_p7, %s355_s15), 33  ;;  %v2489_v51 = vld [vmem:[%s3000_s3 + $0x148] sm:$0xff]   ;;  %v2491_v54 = vld [vmem:[%s3000_s3 + $0x150] sm:$0xff]   ;;  %v2493_v56 = vld [vmem:[%s3000_s3 + $0x158] sm:$0xff]  }
  0x11   : > { %s349_s8 = scalar_select %p348_p6, %s2567_s18, 33  ;;  %2292 = vmatprep.subr.bf16.mxu0 %v2469_v5  ;;  %v2494_v57 = vld [vmem:[%s3000_s3 + $0x20] sm:$0xff]   ;;  %v2496_v59 = vld [vmem:[%s3000_s3 + $0x28] sm:$0xff]   ;;  %v2498_v61 = vld [vmem:[%s3000_s3 + $0x30] sm:$0xff]  }
  0x12   : > { %s2667_s11 = smul.u32 170, %s3014_s19  ;;  %v2495_v58 = vld [vmem:[%s3000_s3 + $0x160] sm:$0xff]   ;;  %v2497_v60 = vld [vmem:[%s3000_s3 + $0x168] sm:$0xff]   ;;  %v2499_v62 = vld [vmem:[%s3000_s3 + $0x170] sm:$0xff]  }
  0x13   : > { %s2420_s14 = smul.u32 5, %s349_s8  ;;  %2213 = vmatpush3.bf16.msra.mxu1 %v2468_v4  ;;  %v2500_v63 = vld [vmem:[%s3000_s3 + $0x38] sm:$0xff]   ;;  %v2502_v1 = vld [vmem:[%s3000_s3 + $0x80] sm:$0xff]   ;;  %s1884_s8 = sshll.u32 %s3014_s19, 7 }
  0x14   : > { %2293 = vmatpush3.bf16.msra.mxu0 %v2469_v5  ;;  %2214 = vmatprep.subr.bf16.mxu1 %v2470_v6  ;;  %s2422_s6 = smul.u32 5, %s3016_s15  ;;  %v2501_v0 = vld [vmem:[%s3000_s3 + $0x178] sm:$0xff]   ;;  %v2503_v3 = vld [vmem:[%s3000_s3 + $0x180] sm:$0xff]  }
  0x15   : > { %s352_s25 = sadd.s32 %s2667_s11, %s2420_s14  ;;  %2294 = vmatprep.subr.bf16.mxu0 %v2471_v7 }
  0x16   : > { %s1880_s28 = sshll.u32 %s352_s25, 2  ;;  %s362_s16 = sadd.s32 %s2422_s6, %s2667_s11 }
  0x17   : > { %s2692_s14 = scalar_lea.vmem %s2997_s0, %s1880_s28  ;;  %2215 = vmatpush3.bf16.msra.mxu1 %v2470_v6  ;;  %s1881_s25 = sshll.u32 %s362_s16, 2  ;;  %v2504_v6 = vld [vmem:[%s3000_s3 + $0x88] sm:$0xff]  }
  0x18   : > { %2295 = vmatpush3.bf16.msra.mxu0 %v2471_v7  ;;  %2216 = vmatprep.subr.bf16.mxu1 %v2472_v8  ;;  %s364_s29 = scalar_lea.vmem %s2998_s1, %s1881_s25  ;;  %v2702_v12 = vld [vmem:[%s2692_s14] sm:$0xff]   ;;  %v2705_v13 = vld [vmem:[%s2692_s14 + $0x8] sm:$0xff]   ;;  %v2727_v29 = vld [vmem:[%s2692_s14 + $0x10] ss:$0 sps:$4 sm:$0x11]   ;;  %s1886_s16 = sshll.u32 %s3014_s19, 5 }
  0x19   : > { %2296 = vmatprep.subr.bf16.mxu0 %v2473_v9  ;;  %v458_v15 = vshrl.u32 %v2702_v12, 16  ;;  %v460_v16 = vshll.u32 %v2702_v12, 16  ;;  %v465_v17 = vshll.u32 %v2705_v13, 16  ;;  %v2713_v18 = vld [vmem:[%s364_s29] sm:$0xff]   ;;  %v2718_v22 = vld [vmem:[%s364_s29 + $0x8] sm:$0xff]   ;;  %v469_v30 = vshrl.u32 %v2705_v13, 16 }
  0x1a   : > { %v957_v23 = vshrl.u32 %v2713_v18, 16  ;;  %v959_v24 = vshll.u32 %v2713_v18, 16  ;;  %v964_v28 = vshll.u32 %v2718_v22, 16  ;;  %v2730_v31 = vld [vmem:[%s364_s29 + $0x10] ss:$0 sps:$4 sm:$0x11]  }
  0x1b   : > { %2217 = vmatpush3.bf16.msra.mxu1 %v2472_v8  ;;  %v462_v20 = vrot.slane %v460_v16, 1  ;;  %v467_v21 = vrot.slane %v465_v17, 1  ;;  %v968_v32 = vshrl.u32 %v2718_v22, 16  ;;  %v473_v37 = vshll.u32 %v2727_v29, 16  ;;  %s366_s29 = sadd.s32 2, %s2567_s18  ;;  %v2505_v8 = vld [vmem:[%s3000_s3 + $0x188] sm:$0xff]  }
  0x1c   : > { %2297 = vmatpush3.bf16.msra.mxu0 %v2473_v9  ;;  %2218 = vmatprep.subr.bf16.mxu1 %v2474_v10  ;;  %v961_v27 = vrot.slane %v959_v24, 1  ;;  %v966_v36 = vrot.slane %v964_v28, 1  ;;  %v972_v38 = vshll.u32 %v2730_v31, 16  ;;  %v1096_v47 = vrot.slane %v2713_v18, 1  ;;  %p369_p8 = scmp.lt.s32.totalorder %s366_s29, 33  ;;  %v2508_v16 = vld [vmem:[%s3000_s3 + $0x98] sm:$0xff]  }
  0x1d   : > { %2298 = vmatprep.subr.bf16.mxu0 %v2475_v11  ;;  %v463_v26 = vor.u32 %v462_v20, %v458_v15  ;;  %v471_v40 = vor.u32 %v469_v30, %v467_v21  ;;  %v475_v43 = vrot.slane %v473_v37, 1  ;;  %v1097_v48 = vrot.slane %v2718_v22, 1  ;;  %v2507_v15 = vld [vmem:[%s3000_s3 + $0x190] sm:$0xff]   ;;  %v2509_v20 = vld [vmem:[%s3000_s3 + $0x198] sm:$0xff]   ;;  %v2510_v24 = vld [vmem:[%s3000_s3 + $0xa0] sm:$0xff]   ;;  %s3020_s18 = smov (!%p383_p9, %s2567_s18), 31 }
  0x1e   : > { %v962_v35 = vor.u32 %v961_v27, %v957_v23  ;;  %v970_v44 = vor.u32 %v968_v32, %v966_v36  ;;  %v974_v45 = vrot.slane %v972_v38, 1  ;;  %s3018_s29 = smov (!%p369_p8, %s366_s29), 33  ;;  %v1099_v2 = vrot.slane %v2730_v31, 1  ;;  %v2511_v27 = vld [vmem:[%s3000_s3 + $0x1a0] sm:$0xff]   ;;  %v2512_v32 = vld [vmem:[%s3000_s3 + $0xa8] sm:$0xff]   ;;  %v2516_v38 = vld [vmem:[%s3000_s3 + $0xb8] sm:$0xff]   ;;  %s401_s17 = sadd.s32 %s1886_s16, %s3020_s18 }
  0x1f   : > { %2219 = vmatpush3.bf16.msra.mxu1 %v2474_v10  ;;  %v468_v34 = vsel %vm456_vm0, %v463_v26, %v467_v21  ;;  %v476_v46 = vsel %vm456_vm0, %v471_v40, %v475_v43  ;;  %v1098_v52 = vsel %vm692_vm1, %v1096_v47, %v1097_v48  ;;  %s2423_s15 = smul.u32 5, %s3018_s29  ;;  %v693_v4 = vrot.slane %v2702_v12, 1  ;;  %v2518_v43 = vld [vmem:[%s3000_s3 + $0xc0] sm:$0xff]   ;;  %v2523_v47 = vld [vmem:[%s3000_s3 + $0x1c8] sm:$0xff]  }
  0x20   : > { %2299 = vmatpush3.bf16.msra.mxu0 %v2475_v11  ;;  %2220 = vmatprep.subr.bf16.mxu1 %v2476_v14  ;;  %v967_v39 = vsel %vm456_vm0, %v962_v35, %v966_v36  ;;  %v975_v49 = vsel %vm456_vm0, %v970_v44, %v974_v45  ;;  %v694_v5 = vrot.slane %v2705_v13, 1  ;;  %v1100_v7 = vsel %vm692_vm1, %v1097_v48, %v1099_v2  ;;  %v2514_v35 = vld [vmem:[%s3000_s3 + $0xb0] sm:$0xff]   ;;  %v2520_v44 = vld [vmem:[%s3000_s3 + $0x1c0] sm:$0xff]  }
  0x21   : > { %2300 = vmatprep.subr.bf16.mxu0 %v2477_v19  ;;  %2224 = vmatprep.mubr.bf16.mxu1 %v468_v34  ;;  %s373_s30 = sadd.s32 %s2423_s15, %s2667_s11  ;;  %v2513_v34 = vld [vmem:[%s3000_s3 + $0x1a8] sm:$0xff]   ;;  %v2515_v36 = vld [vmem:[%s3000_s3 + $0x1b0] sm:$0xff]   ;;  %v696_v40 = vrot.slane %v2727_v29, 1  ;;  %s1887_s15 = sshll.u32 %s401_s17, 1 }
  0x22   : > { %2304 = vmatprep.mubr.bf16.mxu0 %v967_v39  ;;  %s1882_s29 = sshll.u32 %s373_s30, 2  ;;  %v695_v10 = vsel %vm692_vm1, %v693_v4, %v694_v5  ;;  %v2517_v39 = vld [vmem:[%s3000_s3 + $0x1b8] sm:$0xff]   ;;  %v2524_v48 = vld [vmem:[%s3000_s3 + $0xd0] sm:$0xff]  }
  0x23   : > { %2221 = vmatpush3.bf16.msra.mxu1 %v2476_v14  ;;  %s2795_s13 = scalar_lea.vmem %s2999_s2, %s1882_s29  ;;  %v697_v45 = vsel %vm692_vm1, %v694_v5, %v696_v40  ;;  %v2543_v2 = vld [vmem:[%s3000_s3 + $0x230] sm:$0xff]   ;;  %s1883_s29 = sshll.u32 %s3020_s18, 2 }
  0x24   : > { %2301 = vmatpush3.bf16.msra.mxu0 %v2477_v19  ;;  %2222 = vmatprep.subr.bf16.mxu1 %v2478_v25  ;;  %v2822_v9 = vld [vmem:[%s2795_s13] sm:$0xff]   ;;  %v2829_v11 = vld [vmem:[%s2795_s13 + $0x8] sm:$0xff]   ;;  %v2537_v21 = vld [vmem:[%s2795_s13 + $0x10] ss:$0 sps:$4 sm:$0x11]   ;;  %s390_s9 = sadd.s32 %s1884_s8, %s1883_s29  ;;  %s403_s13 = scalar_lea.vmem %s3002_s5, %s1887_s15 }
  0x25   : > { %2302 = vmatprep.subr.bf16.mxu0 %v2479_v33  ;;  %v1367_v14 = vshll.u32 %v2829_v11, 16  ;;  %v1371_v19 = vshrl.u32 %v2829_v11, 16  ;;  %v1500_v23 = vrot.slane %v2829_v11, 1  ;;  %v1375_v26 = vshll.u32 %v2537_v21, 16  ;;  %s1885_s10 = sshll.u32 %s390_s9, 2 }
  0x26   : > { %v1502_v28 = vrot.slane %v2537_v21, 1  ;;  %v1362_v37 = vshll.u32 %v2822_v9, 16  ;;  %s392_s14 = scalar_lea.vmem %s3001_s4, %s1885_s10 }
  0x27   : > { %2223 = vmatpush3.bf16.msra.mxu1 %v2478_v25  ;;  %v1369_v17 = vrot.slane %v1367_v14, 1  ;;  %v1377_v30 = vrot.slane %v1375_v26, 1 }
  0x28   : > { %2303 = vmatpush3.bf16.msra.mxu0 %v2479_v33  ;;  %2228 = vmatprep.subr.bf16.mxu1 %v2482_v41  ;;  %v2857_v31 = vsel %vm692_vm1, %v1500_v23, %v1502_v28 }
  0x29   : > { %2308 = vmatprep.subr.bf16.mxu0 %v2485_v42  ;;  %v1373_v25 = vor.u32 %v1371_v19, %v1369_v17 }
  0x2a   : > { %2225 = vmatmul.mubr.bf16.vlgmr.msra.gmra.mrb[0].mxu1 %v476_v46  ;;  %v2522_v46 = vld [vmem:[%s3000_s3 + $0xc8] sm:$0xff]  }
  0x2b   : > { %2229 = vmatpush3.bf16.msra.mxu1 %v2482_v41  ;;  %2305 = vmatmul.mubr.bf16.vlgmr.msra.gmra.mrb[0].mxu0 %v975_v49  ;;  %v2863_v33 = vsel %vm456_vm0, %v1373_v25, %v1377_v30  ;;  %v1360_v41 = vshrl.u32 %v2822_v9, 16  ;;  %v2525_v49 = vld [vmem:[%s3000_s3 + $0x1d0] sm:$0xff]  }
  0x2c   : > { %2309 = vmatpush3.bf16.msra.mxu0 %v2485_v42  ;;  %2230 = vmatprep.subr.bf16.mxu1 %v2488_v50  ;;  %v1364_v42 = vrot.slane %v1362_v37, 1 }
  0x2d   : > { %2310 = vmatprep.subr.bf16.mxu0 %v2489_v51  ;;  %2244 = vmatprep.mubr.bf16.mxu1 %v2702_v12  ;;  %v2506_v12 = vld [vmem:[%s3000_s3 + $0x90] sm:$0xff]  }
  0x2e   : > { %2324 = vmatprep.mubr.bf16.mxu0 %v1098_v52  ;;  %v1365_v29 = vor.u32 %v1364_v42, %v1360_v41  ;;  %v2529_v52 = vld [vmem:[%s3000_s3 + $0x1e0] sm:$0xff]  }
  0x2f   : > { %2231 = vmatpush3.bf16.msra.mxu1 %v2488_v50  ;;  %v2526_v50 = vld [vmem:[%s3000_s3 + $0xd8] sm:$0xff]  }
  0x30   : > { %2311 = vmatpush3.bf16.msra.mxu0 %v2489_v51  ;;  %2232 = vmatprep.subr.bf16.mxu1 %v2490_v53  ;;  %v2527_v51 = vld [vmem:[%s3000_s3 + $0x1d8] sm:$0xff]  }
  0x31   : > { %2312 = vmatprep.subr.bf16.mxu0 %v2491_v54 }
  0x33   : > { %2233 = vmatpush3.bf16.msra.mxu1 %v2490_v53  ;;  %v2530_v53 = vld [vmem:[%s3000_s3 + $0xe8] sm:$0xff]  }
  0x34   : > { %2313 = vmatpush3.bf16.msra.mxu0 %v2491_v54  ;;  %2234 = vmatprep.subr.bf16.mxu1 %v2492_v55  ;;  %v2531_v54 = vld [vmem:[%s3000_s3 + $0x1e8] sm:$0xff]  }
  0x35   : > { %2314 = vmatprep.subr.bf16.mxu0 %v2493_v56 }
  0x37   : > { %2235 = vmatpush3.bf16.msra.mxu1 %v2492_v55  ;;  %v2532_v55 = vld [vmem:[%s3000_s3 + $0xf0] sm:$0xff]  }
  0x38   : > { %2315 = vmatpush3.bf16.msra.mxu0 %v2493_v56  ;;  %2236 = vmatprep.subr.bf16.mxu1 %v2494_v57  ;;  %v2533_v56 = vld [vmem:[%s3000_s3 + $0x1f0] sm:$0xff]  }
  0x39   : > { %2316 = vmatprep.subr.bf16.mxu0 %v2495_v58 }
  0x3b   : > { %2237 = vmatpush3.bf16.msra.mxu1 %v2494_v57  ;;  %v2534_v57 = vld [vmem:[%s3000_s3 + $0xf8] sm:$0xff]  }
  0x3c   : > { %2317 = vmatpush3.bf16.msra.mxu0 %v2495_v58  ;;  %2238 = vmatprep.subr.bf16.mxu1 %v2496_v59  ;;  %v2535_v58 = vld [vmem:[%s3000_s3 + $0x1f8] sm:$0xff]  }
  0x3d   : > { %2318 = vmatprep.subr.bf16.mxu0 %v2497_v60 }
  0x3f   : > { %2239 = vmatpush3.bf16.msra.mxu1 %v2496_v59  ;;  %v2536_v59 = vld [vmem:[%s3000_s3 + $0x200] sm:$0xff]  }
  0x40   : > { %2319 = vmatpush3.bf16.msra.mxu0 %v2497_v60  ;;  %2240 = vmatprep.subr.bf16.mxu1 %v2498_v61  ;;  %v1499_v60 = vrot.slane %v2822_v9, 1 }
  0x41   : > { %2320 = vmatprep.subr.bf16.mxu0 %v2499_v62 }
  0x43   : > { %2241 = vmatpush3.bf16.msra.mxu1 %v2498_v61  ;;  %v2538_v61 = vld [vmem:[%s3000_s3 + $0x208] sm:$0xff]  }
  0x44   : > { %2321 = vmatpush3.bf16.msra.mxu0 %v2499_v62  ;;  %2242 = vmatprep.subr.bf16.mxu1 %v2500_v63  ;;  %v1501_v62 = vsel %vm692_vm1, %v1499_v60, %v1500_v23 }
  0x45   : > { %2322 = vmatprep.subr.bf16.mxu0 %v2501_v0 }
  0x47   : > { %2243 = vmatpush3.bf16.msra.mxu1 %v2500_v63  ;;  %v2539_v63 = vld [vmem:[%s3000_s3 + $0x210] sm:$0xff]  }
  0x48   : > { %2323 = vmatpush3.bf16.msra.mxu0 %v2501_v0  ;;  %2248 = vmatprep.subr.bf16.mxu1 %v2502_v1  ;;  %v2540_v0 = vld [vmem:[%s3000_s3 + $0x218] sm:$0xff]  }
  0x49   : > { %2328 = vmatprep.subr.bf16.mxu0 %v2503_v3 }
  0x4a   : > { %2245 = vmatmul.mubr.bf16.vlgmr.msra.gmra.mrb[0].mxu1 %v2705_v13  ;;  %v1370_v13 = vsel %vm456_vm0, %v1365_v29, %v1369_v17 }
  0x4b   : > { %2249 = vmatpush3.bf16.msra.mxu1 %v2502_v1  ;;  %2325 = vmatmul.mubr.bf16.vlgmr.msra.gmra.mrb[0].mxu0 %v1100_v7  ;;  %v2542_v1 = vld [vmem:[%s3000_s3 + $0x228] sm:$0xff]  }
  0x4c   : > { %2329 = vmatpush3.bf16.msra.mxu0 %v2503_v3  ;;  %2250 = vmatprep.subr.bf16.mxu1 %v2504_v6  ;;  %v2544_v3 = vld [vmem:[%s3000_s3 + $0x238] sm:$0xff]  }
  0x4d   : > { %2330 = vmatprep.subr.bf16.mxu0 %v2505_v8  ;;  %2264 = vmatprep.mubr.bf16.mxu1 %v695_v10 }
  0x4e   : > { %2344 = vmatprep.mubr.bf16.mxu0 %v2822_v9 }
  0x4f   : > { %2251 = vmatpush3.bf16.msra.mxu1 %v2504_v6 }
  0x50   : > { %2331 = vmatpush3.bf16.msra.mxu0 %v2505_v8  ;;  %2252 = vmatprep.subr.bf16.mxu1 %v2506_v12 }
  0x51   : > { %2332 = vmatprep.subr.bf16.mxu0 %v2507_v15 }
  0x53   : > { %2253 = vmatpush3.bf16.msra.mxu1 %v2506_v12 }
  0x54   : > { %2333 = vmatpush3.bf16.msra.mxu0 %v2507_v15  ;;  %2254 = vmatprep.subr.bf16.mxu1 %v2508_v16 }
  0x55   : > { %2334 = vmatprep.subr.bf16.mxu0 %v2509_v20 }
  0x57   : > { %2255 = vmatpush3.bf16.msra.mxu1 %v2508_v16 }
  0x58   : > { %2335 = vmatpush3.bf16.msra.mxu0 %v2509_v20  ;;  %2256 = vmatprep.subr.bf16.mxu1 %v2510_v24 }
  0x59   : > { %2336 = vmatprep.subr.bf16.mxu0 %v2511_v27 }
  0x5b   : > { %2257 = vmatpush3.bf16.msra.mxu1 %v2510_v24 }
  0x5c   : > { %2337 = vmatpush3.bf16.msra.mxu0 %v2511_v27  ;;  %2258 = vmatprep.subr.bf16.mxu1 %v2512_v32 }
  0x5d   : > { %2338 = vmatprep.subr.bf16.mxu0 %v2513_v34 }
  0x5f   : > { %2259 = vmatpush3.bf16.msra.mxu1 %v2512_v32 }
  0x60   : > { %2339 = vmatpush3.bf16.msra.mxu0 %v2513_v34  ;;  %2260 = vmatprep.subr.bf16.mxu1 %v2514_v35 }
  0x61   : > { %2340 = vmatprep.subr.bf16.mxu0 %v2515_v36 }
  0x63   : > { %2261 = vmatpush3.bf16.msra.mxu1 %v2514_v35 }
  0x64   : > { %2341 = vmatpush3.bf16.msra.mxu0 %v2515_v36  ;;  %2262 = vmatprep.subr.bf16.mxu1 %v2516_v38 }
  0x65   : > { %2342 = vmatprep.subr.bf16.mxu0 %v2517_v39 }
  0x67   : > { %2263 = vmatpush3.bf16.msra.mxu1 %v2516_v38 }
  0x68   : > { %2343 = vmatpush3.bf16.msra.mxu0 %v2517_v39  ;;  %2268 = vmatprep.subr.bf16.mxu1 %v2518_v43 }
  0x69   : > { %2348 = vmatprep.subr.bf16.mxu0 %v2520_v44 }
  0x6a   : > { %2265 = vmatmul.mubr.bf16.vlgmr.msra.gmra.mrb[0].mxu1 %v697_v45 }
  0x6b   : > { %2269 = vmatpush3.bf16.msra.mxu1 %v2518_v43  ;;  %2345 = vmatmul.mubr.bf16.vlgmr.msra.gmra.mrb[0].mxu0 %v2829_v11 }
  0x6c   : > { %2349 = vmatpush3.bf16.msra.mxu0 %v2520_v44  ;;  %2270 = vmatprep.subr.bf16.mxu1 %v2522_v46 }
  0x6d   : > { %2350 = vmatprep.subr.bf16.mxu0 %v2523_v47  ;;  %2284 = vmatprep.mubr.bf16.mxu1 %v2713_v18  ;;  %v2528_v18 = vld [vmem:[%s3000_s3 + $0xe0] sm:$0xff]  }
  0x6e   : > { %2364 = vmatprep.mubr.bf16.mxu0 %v1370_v13 }
  0x6f   : > { %2271 = vmatpush3.bf16.msra.mxu1 %v2522_v46 }
  0x70   : > { %2351 = vmatpush3.bf16.msra.mxu0 %v2523_v47  ;;  %2272 = vmatprep.subr.bf16.mxu1 %v2524_v48 }
  0x71   : > { %2352 = vmatprep.subr.bf16.mxu0 %v2525_v49 }
  0x73   : > { %2273 = vmatpush3.bf16.msra.mxu1 %v2524_v48 }
  0x74   : > { %2353 = vmatpush3.bf16.msra.mxu0 %v2525_v49  ;;  %2274 = vmatprep.subr.bf16.mxu1 %v2526_v50 }
  0x75   : > { %2354 = vmatprep.subr.bf16.mxu0 %v2527_v51 }
  0x77   : > { %2275 = vmatpush3.bf16.msra.mxu1 %v2526_v50 }
  0x78   : > { %2355 = vmatpush3.bf16.msra.mxu0 %v2527_v51  ;;  %2276 = vmatprep.subr.bf16.mxu1 %v2528_v18 }
  0x79   : > { %2356 = vmatprep.subr.bf16.mxu0 %v2529_v52 }
  0x7b   : > { %2277 = vmatpush3.bf16.msra.mxu1 %v2528_v18 }
  0x7c   : > { %2357 = vmatpush3.bf16.msra.mxu0 %v2529_v52  ;;  %2278 = vmatprep.subr.bf16.mxu1 %v2530_v53 }
  0x7d   : > { %2358 = vmatprep.subr.bf16.mxu0 %v2531_v54 }
  0x7f   : > { %2279 = vmatpush3.bf16.msra.mxu1 %v2530_v53 }
  0x80   : > { %2359 = vmatpush3.bf16.msra.mxu0 %v2531_v54  ;;  %2280 = vmatprep.subr.bf16.mxu1 %v2532_v55 }
  0x81   : > { %2360 = vmatprep.subr.bf16.mxu0 %v2533_v56 }
  0x83   : > { %2281 = vmatpush3.bf16.msra.mxu1 %v2532_v55 }
  0x84   : > { %2361 = vmatpush3.bf16.msra.mxu0 %v2533_v56  ;;  %2282 = vmatprep.subr.bf16.mxu1 %v2534_v57 }
  0x85   : > { %2362 = vmatprep.subr.bf16.mxu0 %v2535_v58 }
  0x87   : > { %2283 = vmatpush3.bf16.msra.mxu1 %v2534_v57 }
  0x88   : > { %2363 = vmatpush3.bf16.msra.mxu0 %v2535_v58 }
  0x89   : > { %2368 = vmatprep.subr.bf16.mxu0 %v2536_v59 }
  0x8a   : > { %2285 = vmatmul.mubr.bf16.vlgmr.msra.gmra.mrb[0].mxu1 %v2718_v22  ;;  %v2541_v22 = vld [vmem:[%s3000_s3 + $0x220] sm:$0xff]  }
  0x8b   : > { %2365 = vmatmul.mubr.bf16.vlgmr.msra.gmra.mrb[0].mxu0 %v2863_v33 }
  0x8c   : > { %2369 = vmatpush3.bf16.msra.mxu0 %v2536_v59  ;;  %2384 = vmatprep.mubr.bf16.mxu0 %v1501_v62 }
  0x8d   : > { %2370 = vmatprep.subr.bf16.mxu0 %v2538_v61 }
  0x90   : > { %2371 = vmatpush3.bf16.msra.mxu0 %v2538_v61 }
  0x91   : > { %2372 = vmatprep.subr.bf16.mxu0 %v2539_v63 }
  0x94   : > { %2373 = vmatpush3.bf16.msra.mxu0 %v2539_v63 }
  0x95   : > { %2374 = vmatprep.subr.bf16.mxu0 %v2540_v0 }
  0x98   : > { %2375 = vmatpush3.bf16.msra.mxu0 %v2540_v0 }
  0x99   : > { %2376 = vmatprep.subr.bf16.mxu0 %v2541_v22 }
  0x9c   : > { %2377 = vmatpush3.bf16.msra.mxu0 %v2541_v22 }
  0x9d   : > { %2378 = vmatprep.subr.bf16.mxu0 %v2542_v1 }
  0xa0   : > { %2379 = vmatpush3.bf16.msra.mxu0 %v2542_v1 }
  0xa1   : > { %2380 = vmatprep.subr.bf16.mxu0 %v2543_v2 }
  0xa4   : > { %2381 = vmatpush3.bf16.msra.mxu0 %v2543_v2 }
  0xa5   : > { %2382 = vmatprep.subr.bf16.mxu0 %v2544_v3 }
  0xa8   : > { %2383 = vmatpush3.bf16.msra.mxu0 %v2544_v3 }
  0xab   : > { %2385 = vmatmul.mubr.bf16.vlgmr.msra.gmra.mrb[0].mxu0 %v2857_v31 }
 0x15d   : > { %v2286_v4 = vpop.f32.mrb[0].mxu1 }
 0x15e   : > { %v917_v5 = vpop.f32.mrb[1].mxu1 }
 0x15f   : > { %v2287_v6 = vpop.f32.mrb[2].mxu1 }
 0x160   : > { %v920_v7 = vpop.f32.mrb[3].mxu1 }
 0x17e   : > { %v2386_v8 = vpop.f32.mrb[0].mxu0 }
 0x17f   : > { %v2388_v9 = vadd.f32 %v2386_v8, %v2286_v4  ;;  %v1588_v10 = vpop.f32.mrb[1].mxu0 }
 0x180   : > { %v2389_v11 = vadd.f32 %v1588_v10, %v917_v5  ;;  %v2387_v12 = vpop.f32.mrb[2].mxu0 }
 0x181   : > { %v2390_v14 = vadd.f32 %v2387_v12, %v2287_v6  ;;  %v1591_v15 = vpop.f32.mrb[3].mxu0  ;;  %v1639_v24 = vmul.f32 %v2388_v9, %v2388_v9 }
 0x182   : > { %v2391_v16 = vadd.f32 %v1591_v15, %v920_v7  ;;  %v1637_v19 = vmul.f32 %v2389_v11, %v2389_v11 }
 0x183   : > { %v2115_v17 = vpack.c.bf16 %v2390_v14, %v2388_v9  ;;  %v1640_v27 = vmul.f32 %v2390_v14, %v2390_v14 }
 0x184   : > { %v2110_v20 = vpack.c.bf16 %v2391_v16, %v2389_v11  ;;  %v1627_v21 = vadd.f32 %v2391_v16, %v2389_v11  ;;  %v1638_v23 = vmul.f32 %v2391_v16, %v2391_v16 }
 0x185   : > { %2117 = vst [vmem:[%s392_s14 + $0x8] sm:$0xff] %v2115_v17  }
 0x186   : > { %2111 = vst [vmem:[%s392_s14] sm:$0xff] %v2110_v20   ;;  %v1628_v25 = vadd.f32 %v2388_v9, %v1627_v21  ;;  %v1641_v26 = vadd.f32 %v1638_v23, %v1637_v19 }
 0x188   : > { %v1629_v28 = vadd.f32 %v2390_v14, %v1628_v25  ;;  %v1642_v30 = vadd.f32 %v1641_v26, %v1639_v24 }
 0x18a   : > { %v1630_v31 = vrot.slane %v1629_v28, 4  ;;  %v1643_v32 = vadd.f32 %v1642_v30, %v1640_v27 }
 0x18c   : > { %v1631_v33 = vadd.f32 %v1630_v31, %v1629_v28  ;;  %v1644_v34 = vrot.slane %v1643_v32, 4 }
 0x18e   : > { %v1632_v35 = vrot.slane %v1631_v33, 2  ;;  %v1645_v36 = vadd.f32 %v1644_v34, %v1643_v32 }
 0x190   : > { %v1633_v37 = vadd.f32 %v1632_v35, %v1631_v33  ;;  %v1646_v38 = vrot.slane %v1645_v36, 2 }
 0x192   : > { %v1634_v39 = vrot.slane %v1633_v37, 1  ;;  %v1647_v40 = vadd.f32 %v1646_v38, %v1645_v36 }
 0x194   : > { %v1635_v41 = vadd.f32 %v1634_v39, %v1633_v37  ;;  %v1648_v42 = vrot.slane %v1647_v40, 1 }
 0x196   : > { %1636 = vst [vmem:[%s403_s13] sm:$0x1] %v1635_v41  ;;  %v1649_v43 = vadd.f32 %v1648_v42, %v1647_v40 }
 0x198   : > { %1650 = vst [vmem:[%s403_s13 + $0x1] sm:$0x1] %v1649_v43 }
 0x199 PF: > { %s16_s22 = sadd.s32 1, %s2583_s22   ;;  %s3003_s18 = smov %s2575_s20 }
 0x19a   : > { %p13_p10 = scmp.ge.s32.totalorder %s16_s22, 66   ;;  %s3004_s19 = smov %s2579_s21 }
 0x19b   : > { %s3005_s20 = smov %s3008_s23  ;;  %s3006_s21 = smov %s3012_s24 }
 0x19c   :  { %15 = sbr.rel (!%p13_p10) target bundleno = 3 (0x3), region = 95 }

</bundles_post_ra>
